<compile_context>
chip_gen: v7x
topology: tpu7x:2x2x1
jax: 0.10.0
libtpu: 0.0.40
codegen_flags: <defaults>
</compile_context>

<pallas_src>
import functools

import jax
import jax.numpy as jnp
from jax import lax
from jax.experimental import pallas as pl
from jax.experimental.pallas import tpu as pltpu

KSIZE = 7
PAD = 3
COMPUTE_DTYPE = jnp.bfloat16   # MXU input dtype; accumulation stays in f32.


def _outconv_kernel(x_ref, w_ref, b_ref, o_ref, *, wp):
    # x_ref: (1, C_in, Hp*Wp)   flattened reflection-padded image (bf16)
    # w_ref: (C_out, 49*C_in)   tap-major flattened weights (bf16)
    # b_ref: (C_out, 1)         bias (f32)
    # o_ref: (1, C_out, Q)      Q = (H-1)*Wp + W; valid outputs live at q = h*Wp + w
    _, c_in, _ = x_ref.shape
    _, c_out, q = o_ref.shape

    x = x_ref[0]        # (C_in, Hp*Wp)  -- lane-dense operand, loaded once
    w = w_ref[...]      # (C_out, 49*C_in)

    acc = jnp.zeros((c_out, q), dtype=jnp.float32)
    for kh in range(KSIZE):
        for kw in range(KSIZE):
            tap = kh * KSIZE + kw
            d = kh * wp + kw
            w_tap = w[:, tap * c_in:(tap + 1) * c_in]                 # (C_out, C_in)
            # Lane-dense MXU matmul over the whole padded plane.
            p = jnp.dot(w_tap, x, preferred_element_type=jnp.float32)  # (C_out, Hp*Wp)
            # Spatial shift of this tap == static lane slice of the tiny partial
            # product (C_out rows) -- never slices/reshapes the input.
            acc = acc + p[:, d:d + q]

    acc = acc + b_ref[...]                      # (C_out, 1) broadcast across lanes
    o_ref[0] = jnp.tanh(acc).astype(o_ref.dtype)


@jax.jit
def outconv_forward(x_nchw, weight, bias):
    """x_nchw: (N, C_in, H, W); weight: (C_out, C_in, 7, 7); bias: (C_out,)."""
    N, C_in, H, W = x_nchw.shape
    C_out = weight.shape[0]
    Hp, Wp = H + 2 * PAD, W + 2 * PAD
    HpWp = Hp * Wp
    Q = (H - 1) * Wp + W            # width of the flat accumulator / kernel output

    # ReflectionPad2d(3), staying in NCHW.  Flattening (Hp, Wp) -> Hp*Wp is a free
    # reshape of contiguous trailing dims (no transpose, no extra HBM pass).
    x_pad = jnp.pad(x_nchw, ((0, 0), (0, 0), (PAD, PAD), (PAD, PAD)), mode="reflect")
    x_flat = x_pad.reshape(N, C_in, HpWp).astype(COMPUTE_DTYPE)

    # weight (C_out, C_in, KH, KW) -> (C_out, KH*KW*C_in); column t*C_in + ci holds
    # weight[:, ci, kh, kw] with t = kh*KW + kw (matches the kernel's tap slices).
    w_flat = (jnp.transpose(weight, (0, 2, 3, 1))
              .reshape(C_out, KSIZE * KSIZE * C_in)
              .astype(COMPUTE_DTYPE))
    b_col = bias.reshape(C_out, 1).astype(jnp.float32)

    # TODO(synk): for production shapes (e.g. 256x256, C_in~64) add a halo'd
    # row-block grid axis (parallel) sized for v7x's 32 MiB scoped VMEM / 2 TCs.
    y_flat = pl.pallas_call(
        functools.partial(_outconv_kernel, wp=Wp),
        out_shape=jax.ShapeDtypeStruct((N, C_out, Q), x_nchw.dtype),
        grid_spec=pltpu.PrefetchScalarGridSpec(
            num_scalar_prefetch=0,
            grid=(N,),
            in_specs=[
                pl.BlockSpec((1, C_in, HpWp), lambda b: (b, 0, 0)),
                pl.BlockSpec((C_out, KSIZE * KSIZE * C_in), lambda b: (0, 0)),
                pl.BlockSpec((C_out, 1), lambda b: (0, 0)),
            ],
            out_specs=pl.BlockSpec((1, C_out, Q), lambda b: (b, 0, 0)),
        ),
        compiler_params=pltpu.CompilerParams(
            dimension_semantics=("parallel",),
            vmem_limit_bytes=64 * 1024 * 1024,
        ),
    )(x_flat, w_flat, b_col)

    # Undo the padded-width flat layout on the tiny C_out-channel output:
    # y_flat[n, co, h*Wp + w] == out[n, co, h, w].
    y_full = jnp.pad(y_flat, ((0, 0), (0, 0), (0, H * Wp - Q)))
    return y_full.reshape(N, C_out, H, Wp)[:, :, :, :W]


def _reference(x_nchw, weight, bias, dot_dtype=None):
    """Pure-JAX reference (reflection pad + conv + tanh) for validation."""
    x_pad = jnp.pad(x_nchw, ((0, 0), (0, 0), (PAD, PAD), (PAD, PAD)), mode="reflect")
    lhs = x_pad if dot_dtype is None else x_pad.astype(dot_dtype)
    rhs = weight if dot_dtype is None else weight.astype(dot_dtype)
    y = lax.conv_general_dilated(
        lhs, rhs, window_strides=(1, 1), padding="VALID",
        dimension_numbers=("NCHW", "OIHW", "NCHW"),
        preferred_element_type=jnp.float32,
    )
    y = y + bias.reshape(1, -1, 1, 1)
    return jnp.tanh(y).astype(x_nchw.dtype)


if __name__ == "__main__":
    key = jax.random.PRNGKey(0)
    kx, kw, kb = jax.random.split(key, 3)

    N, C_in, C_out, H, W = 2, 4, 3, 16, 16

    x = jax.random.normal(kx, (N, C_in, H, W), dtype=jnp.float32)
    # Deterministic init matching nn.Conv2d parameter shapes (kaiming-uniform-ish scale).
    fan_in = C_in * KSIZE * KSIZE
    bound = 1.0 / (fan_in ** 0.5)
    weight = jax.random.uniform(kw, (C_out, C_in, KSIZE, KSIZE),
                                minval=-bound, maxval=bound, dtype=jnp.float32)
    bias = jax.random.uniform(kb, (C_out,), minval=-bound, maxval=bound,
                              dtype=jnp.float32)

    out = jax.block_until_ready(outconv_forward(x, weight, bias))
    assert out.shape == (N, C_out, H, W)

    # Tight check against a reference using the same bf16 MXU input precision.
    ref_bf16 = _reference(x, weight, bias, dot_dtype=COMPUTE_DTYPE)
    assert jnp.allclose(out, ref_bf16, atol=1e-3, rtol=1e-3), "mismatch vs bf16 reference"

    # Looser check against full-f32 module semantics (bf16 cast is the only delta).
    ref_f32 = _reference(x, weight, bias)
    assert jnp.allclose(out, ref_f32, atol=3e-2, rtol=3e-2), "mismatch vs f32 reference"

    print("KERNEL_OK")
</pallas_src>

<mosaic_0001>
module attributes {stable_mosaic.version = 11 : i64} {
  func.func @_outconv_kernel(%arg0: i32, %arg1: memref<1x4x484xbf16, #tpu.memory_space<vmem>>, %arg2: memref<3x196xbf16, #tpu.memory_space<vmem>>, %arg3: memref<3x1xf32, #tpu.memory_space<vmem>>, %arg4: memref<1x3x346xf32, #tpu.memory_space<vmem>>) attributes {dimension_semantics = [#tpu.dimension_semantics<parallel>], iteration_bounds = array<i64: 2>, scalar_prefetch = 0 : i64, scratch_operands = 0 : i64, tpu.core_type = #tpu.core_type<tc>, window_params = [{transform_indices = @transform_0, window_bounds = array<i64: 1, 4, 484>}, {pipeline_mode = #tpu.pipeline_mode<synchronous>, transform_indices = @transform_1, window_bounds = array<i64: 3, 196>}, {pipeline_mode = #tpu.pipeline_mode<synchronous>, transform_indices = @transform_2, window_bounds = array<i64: 3, 1>}, {transform_indices = @transform_3, window_bounds = array<i64: 1, 3, 346>}]} {
    %c0 = arith.constant 0 : index
    %c0_0 = arith.constant 0 : index
    %c0_1 = arith.constant 0 : index
    %0 = vector.load %arg1[%c0, %c0_0, %c0_1] : memref<1x4x484xbf16, #tpu.memory_space<vmem>>, vector<1x4x484xbf16>
    %1 = vector.shape_cast %0 : vector<1x4x484xbf16> to vector<4x484xbf16>
    %c0_2 = arith.constant 0 : index
    %c0_3 = arith.constant 0 : index
    %2 = vector.load %arg2[%c0_2, %c0_3] : memref<3x196xbf16, #tpu.memory_space<vmem>>, vector<3x196xbf16>
    %cst = arith.constant 0.000000e+00 : f32
    %3 = vector.broadcast %cst : f32 to vector<3x346xf32>
    %4 = vector.extract_strided_slice %2 {offsets = [0, 0], sizes = [3, 4], strides = [1, 1]} : vector<3x196xbf16> to vector<3x4xbf16>
    %cst_4 = arith.constant dense<0.000000e+00> : vector<3x484xf32>
    %5 = tpu.matmul %4, %1, %cst_4 {dimension_numbers = #tpu.dot_dimension_numbers<[1], [0], [0], [1], [0, 0, 1, 1], [], []>} : vector<3x4xbf16>, vector<4x484xbf16>, vector<3x484xf32> -> vector<3x484xf32>
    %6 = vector.extract_strided_slice %5 {offsets = [0, 0], sizes = [3, 346], strides = [1, 1]} : vector<3x484xf32> to vector<3x346xf32>
    %7 = arith.addf %3, %6 : vector<3x346xf32>
    %8 = vector.extract_strided_slice %2 {offsets = [0, 4], sizes = [3, 4], strides = [1, 1]} : vector<3x196xbf16> to vector<3x4xbf16>
    %cst_5 = arith.constant dense<0.000000e+00> : vector<3x484xf32>
    %9 = tpu.matmul %8, %1, %cst_5 {dimension_numbers = #tpu.dot_dimension_numbers<[1], [0], [0], [1], [0, 0, 1, 1], [], []>} : vector<3x4xbf16>, vector<4x484xbf16>, vector<3x484xf32> -> vector<3x484xf32>
    %10 = vector.extract_strided_slice %9 {offsets = [0, 1], sizes = [3, 346], strides = [1, 1]} : vector<3x484xf32> to vector<3x346xf32>
    %11 = arith.addf %7, %10 : vector<3x346xf32>
    %12 = vector.extract_strided_slice %2 {offsets = [0, 8], sizes = [3, 4], strides = [1, 1]} : vector<3x196xbf16> to vector<3x4xbf16>
    %cst_6 = arith.constant dense<0.000000e+00> : vector<3x484xf32>
    %13 = tpu.matmul %12, %1, %cst_6 {dimension_numbers = #tpu.dot_dimension_numbers<[1], [0], [0], [1], [0, 0, 1, 1], [], []>} : vector<3x4xbf16>, vector<4x484xbf16>, vector<3x484xf32> -> vector<3x484xf32>
    %14 = vector.extract_strided_slice %13 {offsets = [0, 2], sizes = [3, 346], strides = [1, 1]} : vector<3x484xf32> to vector<3x346xf32>
    %15 = arith.addf %11, %14 : vector<3x346xf32>
    %16 = vector.extract_strided_slice %2 {offsets = [0, 12], sizes = [3, 4], strides = [1, 1]} : vector<3x196xbf16> to vector<3x4xbf16>
    %cst_7 = arith.constant dense<0.000000e+00> : vector<3x484xf32>
    %17 = tpu.matmul %16, %1, %cst_7 {dimension_numbers = #tpu.dot_dimension_numbers<[1], [0], [0], [1], [0, 0, 1, 1], [], []>} : vector<3x4xbf16>, vector<4x484xbf16>, vector<3x484xf32> -> vector<3x484xf32>
    %18 = vector.extract_strided_slice %17 {offsets = [0, 3], sizes = [3, 346], strides = [1, 1]} : vector<3x484xf32> to vector<3x346xf32>
    %19 = arith.addf %15, %18 : vector<3x346xf32>
    %20 = vector.extract_strided_slice %2 {offsets = [0, 16], sizes = [3, 4], strides = [1, 1]} : vector<3x196xbf16> to vector<3x4xbf16>
    %cst_8 = arith.constant dense<0.000000e+00> : vector<3x484xf32>
    %21 = tpu.matmul %20, %1, %cst_8 {dimension_numbers = #tpu.dot_dimension_numbers<[1], [0], [0], [1], [0, 0, 1, 1], [], []>} : vector<3x4xbf16>, vector<4x484xbf16>, vector<3x484xf32> -> vector<3x484xf32>
    %22 = vector.extract_strided_slice %21 {offsets = [0, 4], sizes = [3, 346], strides = [1, 1]} : vector<3x484xf32> to vector<3x346xf32>
    %23 = arith.addf %19, %22 : vector<3x346xf32>
    %24 = vector.extract_strided_slice %2 {offsets = [0, 20], sizes = [3, 4], strides = [1, 1]} : vector<3x196xbf16> to vector<3x4xbf16>
    %cst_9 = arith.constant dense<0.000000e+00> : vector<3x484xf32>
    %25 = tpu.matmul %24, %1, %cst_9 {dimension_numbers = #tpu.dot_dimension_numbers<[1], [0], [0], [1], [0, 0, 1, 1], [], []>} : vector<3x4xbf16>, vector<4x484xbf16>, vector<3x484xf32> -> vector<3x484xf32>
    %26 = vector.extract_strided_slice %25 {offsets = [0, 5], sizes = [3, 346], strides = [1, 1]} : vector<3x484xf32> to vector<3x346xf32>
    %27 = arith.addf %23, %26 : vector<3x346xf32>
    %28 = vector.extract_strided_slice %2 {offsets = [0, 24], sizes = [3, 4], strides = [1, 1]} : vector<3x196xbf16> to vector<3x4xbf16>
    %cst_10 = arith.constant dense<0.000000e+00> : vector<3x484xf32>
    %29 = tpu.matmul %28, %1, %cst_10 {dimension_numbers = #tpu.dot_dimension_numbers<[1], [0], [0], [1], [0, 0, 1, 1], [], []>} : vector<3x4xbf16>, vector<4x484xbf16>, vector<3x484xf32> -> vector<3x484xf32>
    %30 = vector.extract_strided_slice %29 {offsets = [0, 6], sizes = [3, 346], strides = [1, 1]} : vector<3x484xf32> to vector<3x346xf32>
    %31 = arith.addf %27, %30 : vector<3x346xf32>
    %32 = vector.extract_strided_slice %2 {offsets = [0, 28], sizes = [3, 4], strides = [1, 1]} : vector<3x196xbf16> to vector<3x4xbf16>
    %cst_11 = arith.constant dense<0.000000e+00> : vector<3x484xf32>
    %33 = tpu.matmul %32, %1, %cst_11 {dimension_numbers = #tpu.dot_dimension_numbers<[1], [0], [0], [1], [0, 0, 1, 1], [], []>} : vector<3x4xbf16>, vector<4x484xbf16>, vector<3x484xf32> -> vector<3x484xf32>
    %34 = vector.extract_strided_slice %33 {offsets = [0, 22], sizes = [3, 346], strides = [1, 1]} : vector<3x484xf32> to vector<3x346xf32>
    %35 = arith.addf %31, %34 : vector<3x346xf32>
    %36 = vector.extract_strided_slice %2 {offsets = [0, 32], sizes = [3, 4], strides = [1, 1]} : vector<3x196xbf16> to vector<3x4xbf16>
    %cst_12 = arith.constant dense<0.000000e+00> : vector<3x484xf32>
    %37 = tpu.matmul %36, %1, %cst_12 {dimension_numbers = #tpu.dot_dimension_numbers<[1], [0], [0], [1], [0, 0, 1, 1], [], []>} : vector<3x4xbf16>, vector<4x484xbf16>, vector<3x484xf32> -> vector<3x484xf32>
    %38 = vector.extract_strided_slice %37 {offsets = [0, 23], sizes = [3, 346], strides = [1, 1]} : vector<3x484xf32> to vector<3x346xf32>
    %39 = arith.addf %35, %38 : vector<3x346xf32>
    %40 = vector.extract_strided_slice %2 {offsets = [0, 36], sizes = [3, 4], strides = [1, 1]} : vector<3x196xbf16> to vector<3x4xbf16>
    %cst_13 = arith.constant dense<0.000000e+00> : vector<3x484xf32>
    %41 = tpu.matmul %40, %1, %cst_13 {dimension_numbers = #tpu.dot_dimension_numbers<[1], [0], [0], [1], [0, 0, 1, 1], [], []>} : vector<3x4xbf16>, vector<4x484xbf16>, vector<3x484xf32> -> vector<3x484xf32>
    %42 = vector.extract_strided_slice %41 {offsets = [0, 24], sizes = [3, 346], strides = [1, 1]} : vector<3x484xf32> to vector<3x346xf32>
    %43 = arith.addf %39, %42 : vector<3x346xf32>
    %44 = vector.extract_strided_slice %2 {offsets = [0, 40], sizes = [3, 4], strides = [1, 1]} : vector<3x196xbf16> to vector<3x4xbf16>
    %cst_14 = arith.constant dense<0.000000e+00> : vector<3x484xf32>
    %45 = tpu.matmul %44, %1, %cst_14 {dimension_numbers = #tpu.dot_dimension_numbers<[1], [0], [0], [1], [0, 0, 1, 1], [], []>} : vector<3x4xbf16>, vector<4x484xbf16>, vector<3x484xf32> -> vector<3x484xf32>
    %46 = vector.extract_strided_slice %45 {offsets = [0, 25], sizes = [3, 346], strides = [1, 1]} : vector<3x484xf32> to vector<3x346xf32>
    %47 = arith.addf %43, %46 : vector<3x346xf32>
    %48 = vector.extract_strided_slice %2 {offsets = [0, 44], sizes = [3, 4], strides = [1, 1]} : vector<3x196xbf16> to vector<3x4xbf16>
    %cst_15 = arith.constant dense<0.000000e+00> : vector<3x484xf32>
    %49 = tpu.matmul %48, %1, %cst_15 {dimension_numbers = #tpu.dot_dimension_numbers<[1], [0], [0], [1], [0, 0, 1, 1], [], []>} : vector<3x4xbf16>, vector<4x484xbf16>, vector<3x484xf32> -> vector<3x484xf32>
    %50 = vector.extract_strided_slice %49 {offsets = [0, 26], sizes = [3, 346], strides = [1, 1]} : vector<3x484xf32> to vector<3x346xf32>
    %51 = arith.addf %47, %50 : vector<3x346xf32>
    %52 = vector.extract_strided_slice %2 {offsets = [0, 48], sizes = [3, 4], strides = [1, 1]} : vector<3x196xbf16> to vector<3x4xbf16>
    %cst_16 = arith.constant dense<0.000000e+00> : vector<3x484xf32>
    %53 = tpu.matmul %52, %1, %cst_16 {dimension_numbers = #tpu.dot_dimension_numbers<[1], [0], [0], [1], [0, 0, 1, 1], [], []>} : vector<3x4xbf16>, vector<4x484xbf16>, vector<3x484xf32> -> vector<3x484xf32>
    %54 = vector.extract_strided_slice %53 {offsets = [0, 27], sizes = [3, 346], strides = [1, 1]} : vector<3x484xf32> to vector<3x346xf32>
    %55 = arith.addf %51, %54 : vector<3x346xf32>
    %56 = vector.extract_strided_slice %2 {offsets = [0, 52], sizes = [3, 4], strides = [1, 1]} : vector<3x196xbf16> to vector<3x4xbf16>
    %cst_17 = arith.constant dense<0.000000e+00> : vector<3x484xf32>
    %57 = tpu.matmul %56, %1, %cst_17 {dimension_numbers = #tpu.dot_dimension_numbers<[1], [0], [0], [1], [0, 0, 1, 1], [], []>} : vector<3x4xbf16>, vector<4x484xbf16>, vector<3x484xf32> -> vector<3x484xf32>
    %58 = vector.extract_strided_slice %57 {offsets = [0, 28], sizes = [3, 346], strides = [1, 1]} : vector<3x484xf32> to vector<3x346xf32>
    %59 = arith.addf %55, %58 : vector<3x346xf32>
    %60 = vector.extract_strided_slice %2 {offsets = [0, 56], sizes = [3, 4], strides = [1, 1]} : vector<3x196xbf16> to vector<3x4xbf16>
    %cst_18 = arith.constant dense<0.000000e+00> : vector<3x484xf32>
    %61 = tpu.matmul %60, %1, %cst_18 {dimension_numbers = #tpu.dot_dimension_numbers<[1], [0], [0], [1], [0, 0, 1, 1], [], []>} : vector<3x4xbf16>, vector<4x484xbf16>, vector<3x484xf32> -> vector<3x484xf32>
    %62 = vector.extract_strided_slice %61 {offsets = [0, 44], sizes = [3, 346], strides = [1, 1]} : vector<3x484xf32> to vector<3x346xf32>
    %63 = arith.addf %59, %62 : vector<3x346xf32>
    %64 = vector.extract_strided_slice %2 {offsets = [0, 60], sizes = [3, 4], strides = [1, 1]} : vector<3x196xbf16> to vector<3x4xbf16>
    %cst_19 = arith.constant dense<0.000000e+00> : vector<3x484xf32>
    %65 = tpu.matmul %64, %1, %cst_19 {dimension_numbers = #tpu.dot_dimension_numbers<[1], [0], [0], [1], [0, 0, 1, 1], [], []>} : vector<3x4xbf16>, vector<4x484xbf16>, vector<3x484xf32> -> vector<3x484xf32>
    %66 = vector.extract_strided_slice %65 {offsets = [0, 45], sizes = [3, 346], strides = [1, 1]} : vector<3x484xf32> to vector<3x346xf32>
    %67 = arith.addf %63, %66 : vector<3x346xf32>
    %68 = vector.extract_strided_slice %2 {offsets = [0, 64], sizes = [3, 4], strides = [1, 1]} : vector<3x196xbf16> to vector<3x4xbf16>
    %cst_20 = arith.constant dense<0.000000e+00> : vector<3x484xf32>
    %69 = tpu.matmul %68, %1, %cst_20 {dimension_numbers = #tpu.dot_dimension_numbers<[1], [0], [0], [1], [0, 0, 1, 1], [], []>} : vector<3x4xbf16>, vector<4x484xbf16>, vector<3x484xf32> -> vector<3x484xf32>
    %70 = vector.extract_strided_slice %69 {offsets = [0, 46], sizes = [3, 346], strides = [1, 1]} : vector<3x484xf32> to vector<3x346xf32>
    %71 = arith.addf %67, %70 : vector<3x346xf32>
    %72 = vector.extract_strided_slice %2 {offsets = [0, 68], sizes = [3, 4], strides = [1, 1]} : vector<3x196xbf16> to vector<3x4xbf16>
    %cst_21 = arith.constant dense<0.000000e+00> : vector<3x484xf32>
    %73 = tpu.matmul %72, %1, %cst_21 {dimension_numbers = #tpu.dot_dimension_numbers<[1], [0], [0], [1], [0, 0, 1, 1], [], []>} : vector<3x4xbf16>, vector<4x484xbf16>, vector<3x484xf32> -> vector<3x484xf32>
    %74 = vector.extract_strided_slice %73 {offsets = [0, 47], sizes = [3, 346], strides = [1, 1]} : vector<3x484xf32> to vector<3x346xf32>
    %75 = arith.addf %71, %74 : vector<3x346xf32>
    %76 = vector.extract_strided_slice %2 {offsets = [0, 72], sizes = [3, 4], strides = [1, 1]} : vector<3x196xbf16> to vector<3x4xbf16>
    %cst_22 = arith.constant dense<0.000000e+00> : vector<3x484xf32>
    %77 = tpu.matmul %76, %1, %cst_22 {dimension_numbers = #tpu.dot_dimension_numbers<[1], [0], [0], [1], [0, 0, 1, 1], [], []>} : vector<3x4xbf16>, vector<4x484xbf16>, vector<3x484xf32> -> vector<3x484xf32>
    %78 = vector.extract_strided_slice %77 {offsets = [0, 48], sizes = [3, 346], strides = [1, 1]} : vector<3x484xf32> to vector<3x346xf32>
    %79 = arith.addf %75, %78 : vector<3x346xf32>
    %80 = vector.extract_strided_slice %2 {offsets = [0, 76], sizes = [3, 4], strides = [1, 1]} : vector<3x196xbf16> to vector<3x4xbf16>
    %cst_23 = arith.constant dense<0.000000e+00> : vector<3x484xf32>
    %81 = tpu.matmul %80, %1, %cst_23 {dimension_numbers = #tpu.dot_dimension_numbers<[1], [0], [0], [1], [0, 0, 1, 1], [], []>} : vector<3x4xbf16>, vector<4x484xbf16>, vector<3x484xf32> -> vector<3x484xf32>
    %82 = vector.extract_strided_slice %81 {offsets = [0, 49], sizes = [3, 346], strides = [1, 1]} : vector<3x484xf32> to vector<3x346xf32>
    %83 = arith.addf %79, %82 : vector<3x346xf32>
    %84 = vector.extract_strided_slice %2 {offsets = [0, 80], sizes = [3, 4], strides = [1, 1]} : vector<3x196xbf16> to vector<3x4xbf16>
    %cst_24 = arith.constant dense<0.000000e+00> : vector<3x484xf32>
    %85 = tpu.matmul %84, %1, %cst_24 {dimension_numbers = #tpu.dot_dimension_numbers<[1], [0], [0], [1], [0, 0, 1, 1], [], []>} : vector<3x4xbf16>, vector<4x484xbf16>, vector<3x484xf32> -> vector<3x484xf32>
    %86 = vector.extract_strided_slice %85 {offsets = [0, 50], sizes = [3, 346], strides = [1, 1]} : vector<3x484xf32> to vector<3x346xf32>
    %87 = arith.addf %83, %86 : vector<3x346xf32>
    %88 = vector.extract_strided_slice %2 {offsets = [0, 84], sizes = [3, 4], strides = [1, 1]} : vector<3x196xbf16> to vector<3x4xbf16>
    %cst_25 = arith.constant dense<0.000000e+00> : vector<3x484xf32>
    %89 = tpu.matmul %88, %1, %cst_25 {dimension_numbers = #tpu.dot_dimension_numbers<[1], [0], [0], [1], [0, 0, 1, 1], [], []>} : vector<3x4xbf16>, vector<4x484xbf16>, vector<3x484xf32> -> vector<3x484xf32>
    %90 = vector.extract_strided_slice %89 {offsets = [0, 66], sizes = [3, 346], strides = [1, 1]} : vector<3x484xf32> to vector<3x346xf32>
    %91 = arith.addf %87, %90 : vector<3x346xf32>
    %92 = vector.extract_strided_slice %2 {offsets = [0, 88], sizes = [3, 4], strides = [1, 1]} : vector<3x196xbf16> to vector<3x4xbf16>
    %cst_26 = arith.constant dense<0.000000e+00> : vector<3x484xf32>
    %93 = tpu.matmul %92, %1, %cst_26 {dimension_numbers = #tpu.dot_dimension_numbers<[1], [0], [0], [1], [0, 0, 1, 1], [], []>} : vector<3x4xbf16>, vector<4x484xbf16>, vector<3x484xf32> -> vector<3x484xf32>
    %94 = vector.extract_strided_slice %93 {offsets = [0, 67], sizes = [3, 346], strides = [1, 1]} : vector<3x484xf32> to vector<3x346xf32>
    %95 = arith.addf %91, %94 : vector<3x346xf32>
    %96 = vector.extract_strided_slice %2 {offsets = [0, 92], sizes = [3, 4], strides = [1, 1]} : vector<3x196xbf16> to vector<3x4xbf16>
    %cst_27 = arith.constant dense<0.000000e+00> : vector<3x484xf32>
    %97 = tpu.matmul %96, %1, %cst_27 {dimension_numbers = #tpu.dot_dimension_numbers<[1], [0], [0], [1], [0, 0, 1, 1], [], []>} : vector<3x4xbf16>, vector<4x484xbf16>, vector<3x484xf32> -> vector<3x484xf32>
    %98 = vector.extract_strided_slice %97 {offsets = [0, 68], sizes = [3, 346], strides = [1, 1]} : vector<3x484xf32> to vector<3x346xf32>
    %99 = arith.addf %95, %98 : vector<3x346xf32>
    %100 = vector.extract_strided_slice %2 {offsets = [0, 96], sizes = [3, 4], strides = [1, 1]} : vector<3x196xbf16> to vector<3x4xbf16>
    %cst_28 = arith.constant dense<0.000000e+00> : vector<3x484xf32>
    %101 = tpu.matmul %100, %1, %cst_28 {dimension_numbers = #tpu.dot_dimension_numbers<[1], [0], [0], [1], [0, 0, 1, 1], [], []>} : vector<3x4xbf16>, vector<4x484xbf16>, vector<3x484xf32> -> vector<3x484xf32>
    %102 = vector.extract_strided_slice %101 {offsets = [0, 69], sizes = [3, 346], strides = [1, 1]} : vector<3x484xf32> to vector<3x346xf32>
    %103 = arith.addf %99, %102 : vector<3x346xf32>
    %104 = vector.extract_strided_slice %2 {offsets = [0, 100], sizes = [3, 4], strides = [1, 1]} : vector<3x196xbf16> to vector<3x4xbf16>
    %cst_29 = arith.constant dense<0.000000e+00> : vector<3x484xf32>
    %105 = tpu.matmul %104, %1, %cst_29 {dimension_numbers = #tpu.dot_dimension_numbers<[1], [0], [0], [1], [0, 0, 1, 1], [], []>} : vector<3x4xbf16>, vector<4x484xbf16>, vector<3x484xf32> -> vector<3x484xf32>
    %106 = vector.extract_strided_slice %105 {offsets = [0, 70], sizes = [3, 346], strides = [1, 1]} : vector<3x484xf32> to vector<3x346xf32>
    %107 = arith.addf %103, %106 : vector<3x346xf32>
    %108 = vector.extract_strided_slice %2 {offsets = [0, 104], sizes = [3, 4], strides = [1, 1]} : vector<3x196xbf16> to vector<3x4xbf16>
    %cst_30 = arith.constant dense<0.000000e+00> : vector<3x484xf32>
    %109 = tpu.matmul %108, %1, %cst_30 {dimension_numbers = #tpu.dot_dimension_numbers<[1], [0], [0], [1], [0, 0, 1, 1], [], []>} : vector<3x4xbf16>, vector<4x484xbf16>, vector<3x484xf32> -> vector<3x484xf32>
    %110 = vector.extract_strided_slice %109 {offsets = [0, 71], sizes = [3, 346], strides = [1, 1]} : vector<3x484xf32> to vector<3x346xf32>
    %111 = arith.addf %107, %110 : vector<3x346xf32>
    %112 = vector.extract_strided_slice %2 {offsets = [0, 108], sizes = [3, 4], strides = [1, 1]} : vector<3x196xbf16> to vector<3x4xbf16>
    %cst_31 = arith.constant dense<0.000000e+00> : vector<3x484xf32>
    %113 = tpu.matmul %112, %1, %cst_31 {dimension_numbers = #tpu.dot_dimension_numbers<[1], [0], [0], [1], [0, 0, 1, 1], [], []>} : vector<3x4xbf16>, vector<4x484xbf16>, vector<3x484xf32> -> vector<3x484xf32>
    %114 = vector.extract_strided_slice %113 {offsets = [0, 72], sizes = [3, 346], strides = [1, 1]} : vector<3x484xf32> to vector<3x346xf32>
    %115 = arith.addf %111, %114 : vector<3x346xf32>
    %116 = vector.extract_strided_slice %2 {offsets = [0, 112], sizes = [3, 4], strides = [1, 1]} : vector<3x196xbf16> to vector<3x4xbf16>
    %cst_32 = arith.constant dense<0.000000e+00> : vector<3x484xf32>
    %117 = tpu.matmul %116, %1, %cst_32 {dimension_numbers = #tpu.dot_dimension_numbers<[1], [0], [0], [1], [0, 0, 1, 1], [], []>} : vector<3x4xbf16>, vector<4x484xbf16>, vector<3x484xf32> -> vector<3x484xf32>
    %118 = vector.extract_strided_slice %117 {offsets = [0, 88], sizes = [3, 346], strides = [1, 1]} : vector<3x484xf32> to vector<3x346xf32>
    %119 = arith.addf %115, %118 : vector<3x346xf32>
    %120 = vector.extract_strided_slice %2 {offsets = [0, 116], sizes = [3, 4], strides = [1, 1]} : vector<3x196xbf16> to vector<3x4xbf16>
    %cst_33 = arith.constant dense<0.000000e+00> : vector<3x484xf32>
    %121 = tpu.matmul %120, %1, %cst_33 {dimension_numbers = #tpu.dot_dimension_numbers<[1], [0], [0], [1], [0, 0, 1, 1], [], []>} : vector<3x4xbf16>, vector<4x484xbf16>, vector<3x484xf32> -> vector<3x484xf32>
    %122 = vector.extract_strided_slice %121 {offsets = [0, 89], sizes = [3, 346], strides = [1, 1]} : vector<3x484xf32> to vector<3x346xf32>
    %123 = arith.addf %119, %122 : vector<3x346xf32>
    %124 = vector.extract_strided_slice %2 {offsets = [0, 120], sizes = [3, 4], strides = [1, 1]} : vector<3x196xbf16> to vector<3x4xbf16>
    %cst_34 = arith.constant dense<0.000000e+00> : vector<3x484xf32>
    %125 = tpu.matmul %124, %1, %cst_34 {dimension_numbers = #tpu.dot_dimension_numbers<[1], [0], [0], [1], [0, 0, 1, 1], [], []>} : vector<3x4xbf16>, vector<4x484xbf16>, vector<3x484xf32> -> vector<3x484xf32>
    %126 = vector.extract_strided_slice %125 {offsets = [0, 90], sizes = [3, 346], strides = [1, 1]} : vector<3x484xf32> to vector<3x346xf32>
    %127 = arith.addf %123, %126 : vector<3x346xf32>
    %128 = vector.extract_strided_slice %2 {offsets = [0, 124], sizes = [3, 4], strides = [1, 1]} : vector<3x196xbf16> to vector<3x4xbf16>
    %cst_35 = arith.constant dense<0.000000e+00> : vector<3x484xf32>
    %129 = tpu.matmul %128, %1, %cst_35 {dimension_numbers = #tpu.dot_dimension_numbers<[1], [0], [0], [1], [0, 0, 1, 1], [], []>} : vector<3x4xbf16>, vector<4x484xbf16>, vector<3x484xf32> -> vector<3x484xf32>
    %130 = vector.extract_strided_slice %129 {offsets = [0, 91], sizes = [3, 346], strides = [1, 1]} : vector<3x484xf32> to vector<3x346xf32>
    %131 = arith.addf %127, %130 : vector<3x346xf32>
    %132 = vector.extract_strided_slice %2 {offsets = [0, 128], sizes = [3, 4], strides = [1, 1]} : vector<3x196xbf16> to vector<3x4xbf16>
    %cst_36 = arith.constant dense<0.000000e+00> : vector<3x484xf32>
    %133 = tpu.matmul %132, %1, %cst_36 {dimension_numbers = #tpu.dot_dimension_numbers<[1], [0], [0], [1], [0, 0, 1, 1], [], []>} : vector<3x4xbf16>, vector<4x484xbf16>, vector<3x484xf32> -> vector<3x484xf32>
    %134 = vector.extract_strided_slice %133 {offsets = [0, 92], sizes = [3, 346], strides = [1, 1]} : vector<3x484xf32> to vector<3x346xf32>
    %135 = arith.addf %131, %134 : vector<3x346xf32>
    %136 = vector.extract_strided_slice %2 {offsets = [0, 132], sizes = [3, 4], strides = [1, 1]} : vector<3x196xbf16> to vector<3x4xbf16>
    %cst_37 = arith.constant dense<0.000000e+00> : vector<3x484xf32>
    %137 = tpu.matmul %136, %1, %cst_37 {dimension_numbers = #tpu.dot_dimension_numbers<[1], [0], [0], [1], [0, 0, 1, 1], [], []>} : vector<3x4xbf16>, vector<4x484xbf16>, vector<3x484xf32> -> vector<3x484xf32>
    %138 = vector.extract_strided_slice %137 {offsets = [0, 93], sizes = [3, 346], strides = [1, 1]} : vector<3x484xf32> to vector<3x346xf32>
    %139 = arith.addf %135, %138 : vector<3x346xf32>
    %140 = vector.extract_strided_slice %2 {offsets = [0, 136], sizes = [3, 4], strides = [1, 1]} : vector<3x196xbf16> to vector<3x4xbf16>
    %cst_38 = arith.constant dense<0.000000e+00> : vector<3x484xf32>
    %141 = tpu.matmul %140, %1, %cst_38 {dimension_numbers = #tpu.dot_dimension_numbers<[1], [0], [0], [1], [0, 0, 1, 1], [], []>} : vector<3x4xbf16>, vector<4x484xbf16>, vector<3x484xf32> -> vector<3x484xf32>
    %142 = vector.extract_strided_slice %141 {offsets = [0, 94], sizes = [3, 346], strides = [1, 1]} : vector<3x484xf32> to vector<3x346xf32>
    %143 = arith.addf %139, %142 : vector<3x346xf32>
    %144 = vector.extract_strided_slice %2 {offsets = [0, 140], sizes = [3, 4], strides = [1, 1]} : vector<3x196xbf16> to vector<3x4xbf16>
    %cst_39 = arith.constant dense<0.000000e+00> : vector<3x484xf32>
    %145 = tpu.matmul %144, %1, %cst_39 {dimension_numbers = #tpu.dot_dimension_numbers<[1], [0], [0], [1], [0, 0, 1, 1], [], []>} : vector<3x4xbf16>, vector<4x484xbf16>, vector<3x484xf32> -> vector<3x484xf32>
    %146 = vector.extract_strided_slice %145 {offsets = [0, 110], sizes = [3, 346], strides = [1, 1]} : vector<3x484xf32> to vector<3x346xf32>
    %147 = arith.addf %143, %146 : vector<3x346xf32>
    %148 = vector.extract_strided_slice %2 {offsets = [0, 144], sizes = [3, 4], strides = [1, 1]} : vector<3x196xbf16> to vector<3x4xbf16>
    %cst_40 = arith.constant dense<0.000000e+00> : vector<3x484xf32>
    %149 = tpu.matmul %148, %1, %cst_40 {dimension_numbers = #tpu.dot_dimension_numbers<[1], [0], [0], [1], [0, 0, 1, 1], [], []>} : vector<3x4xbf16>, vector<4x484xbf16>, vector<3x484xf32> -> vector<3x484xf32>
    %150 = vector.extract_strided_slice %149 {offsets = [0, 111], sizes = [3, 346], strides = [1, 1]} : vector<3x484xf32> to vector<3x346xf32>
    %151 = arith.addf %147, %150 : vector<3x346xf32>
    %152 = vector.extract_strided_slice %2 {offsets = [0, 148], sizes = [3, 4], strides = [1, 1]} : vector<3x196xbf16> to vector<3x4xbf16>
    %cst_41 = arith.constant dense<0.000000e+00> : vector<3x484xf32>
    %153 = tpu.matmul %152, %1, %cst_41 {dimension_numbers = #tpu.dot_dimension_numbers<[1], [0], [0], [1], [0, 0, 1, 1], [], []>} : vector<3x4xbf16>, vector<4x484xbf16>, vector<3x484xf32> -> vector<3x484xf32>
    %154 = vector.extract_strided_slice %153 {offsets = [0, 112], sizes = [3, 346], strides = [1, 1]} : vector<3x484xf32> to vector<3x346xf32>
    %155 = arith.addf %151, %154 : vector<3x346xf32>
    %156 = vector.extract_strided_slice %2 {offsets = [0, 152], sizes = [3, 4], strides = [1, 1]} : vector<3x196xbf16> to vector<3x4xbf16>
    %cst_42 = arith.constant dense<0.000000e+00> : vector<3x484xf32>
    %157 = tpu.matmul %156, %1, %cst_42 {dimension_numbers = #tpu.dot_dimension_numbers<[1], [0], [0], [1], [0, 0, 1, 1], [], []>} : vector<3x4xbf16>, vector<4x484xbf16>, vector<3x484xf32> -> vector<3x484xf32>
    %158 = vector.extract_strided_slice %157 {offsets = [0, 113], sizes = [3, 346], strides = [1, 1]} : vector<3x484xf32> to vector<3x346xf32>
    %159 = arith.addf %155, %158 : vector<3x346xf32>
    %160 = vector.extract_strided_slice %2 {offsets = [0, 156], sizes = [3, 4], strides = [1, 1]} : vector<3x196xbf16> to vector<3x4xbf16>
    %cst_43 = arith.constant dense<0.000000e+00> : vector<3x484xf32>
    %161 = tpu.matmul %160, %1, %cst_43 {dimension_numbers = #tpu.dot_dimension_numbers<[1], [0], [0], [1], [0, 0, 1, 1], [], []>} : vector<3x4xbf16>, vector<4x484xbf16>, vector<3x484xf32> -> vector<3x484xf32>
    %162 = vector.extract_strided_slice %161 {offsets = [0, 114], sizes = [3, 346], strides = [1, 1]} : vector<3x484xf32> to vector<3x346xf32>
    %163 = arith.addf %159, %162 : vector<3x346xf32>
    %164 = vector.extract_strided_slice %2 {offsets = [0, 160], sizes = [3, 4], strides = [1, 1]} : vector<3x196xbf16> to vector<3x4xbf16>
    %cst_44 = arith.constant dense<0.000000e+00> : vector<3x484xf32>
    %165 = tpu.matmul %164, %1, %cst_44 {dimension_numbers = #tpu.dot_dimension_numbers<[1], [0], [0], [1], [0, 0, 1, 1], [], []>} : vector<3x4xbf16>, vector<4x484xbf16>, vector<3x484xf32> -> vector<3x484xf32>
    %166 = vector.extract_strided_slice %165 {offsets = [0, 115], sizes = [3, 346], strides = [1, 1]} : vector<3x484xf32> to vector<3x346xf32>
    %167 = arith.addf %163, %166 : vector<3x346xf32>
    %168 = vector.extract_strided_slice %2 {offsets = [0, 164], sizes = [3, 4], strides = [1, 1]} : vector<3x196xbf16> to vector<3x4xbf16>
    %cst_45 = arith.constant dense<0.000000e+00> : vector<3x484xf32>
    %169 = tpu.matmul %168, %1, %cst_45 {dimension_numbers = #tpu.dot_dimension_numbers<[1], [0], [0], [1], [0, 0, 1, 1], [], []>} : vector<3x4xbf16>, vector<4x484xbf16>, vector<3x484xf32> -> vector<3x484xf32>
    %170 = vector.extract_strided_slice %169 {offsets = [0, 116], sizes = [3, 346], strides = [1, 1]} : vector<3x484xf32> to vector<3x346xf32>
    %171 = arith.addf %167, %170 : vector<3x346xf32>
    %172 = vector.extract_strided_slice %2 {offsets = [0, 168], sizes = [3, 4], strides = [1, 1]} : vector<3x196xbf16> to vector<3x4xbf16>
    %cst_46 = arith.constant dense<0.000000e+00> : vector<3x484xf32>
    %173 = tpu.matmul %172, %1, %cst_46 {dimension_numbers = #tpu.dot_dimension_numbers<[1], [0], [0], [1], [0, 0, 1, 1], [], []>} : vector<3x4xbf16>, vector<4x484xbf16>, vector<3x484xf32> -> vector<3x484xf32>
    %174 = vector.extract_strided_slice %173 {offsets = [0, 132], sizes = [3, 346], strides = [1, 1]} : vector<3x484xf32> to vector<3x346xf32>
    %175 = arith.addf %171, %174 : vector<3x346xf32>
    %176 = vector.extract_strided_slice %2 {offsets = [0, 172], sizes = [3, 4], strides = [1, 1]} : vector<3x196xbf16> to vector<3x4xbf16>
    %cst_47 = arith.constant dense<0.000000e+00> : vector<3x484xf32>
    %177 = tpu.matmul %176, %1, %cst_47 {dimension_numbers = #tpu.dot_dimension_numbers<[1], [0], [0], [1], [0, 0, 1, 1], [], []>} : vector<3x4xbf16>, vector<4x484xbf16>, vector<3x484xf32> -> vector<3x484xf32>
    %178 = vector.extract_strided_slice %177 {offsets = [0, 133], sizes = [3, 346], strides = [1, 1]} : vector<3x484xf32> to vector<3x346xf32>
    %179 = arith.addf %175, %178 : vector<3x346xf32>
    %180 = vector.extract_strided_slice %2 {offsets = [0, 176], sizes = [3, 4], strides = [1, 1]} : vector<3x196xbf16> to vector<3x4xbf16>
    %cst_48 = arith.constant dense<0.000000e+00> : vector<3x484xf32>
    %181 = tpu.matmul %180, %1, %cst_48 {dimension_numbers = #tpu.dot_dimension_numbers<[1], [0], [0], [1], [0, 0, 1, 1], [], []>} : vector<3x4xbf16>, vector<4x484xbf16>, vector<3x484xf32> -> vector<3x484xf32>
    %182 = vector.extract_strided_slice %181 {offsets = [0, 134], sizes = [3, 346], strides = [1, 1]} : vector<3x484xf32> to vector<3x346xf32>
    %183 = arith.addf %179, %182 : vector<3x346xf32>
    %184 = vector.extract_strided_slice %2 {offsets = [0, 180], sizes = [3, 4], strides = [1, 1]} : vector<3x196xbf16> to vector<3x4xbf16>
    %cst_49 = arith.constant dense<0.000000e+00> : vector<3x484xf32>
    %185 = tpu.matmul %184, %1, %cst_49 {dimension_numbers = #tpu.dot_dimension_numbers<[1], [0], [0], [1], [0, 0, 1, 1], [], []>} : vector<3x4xbf16>, vector<4x484xbf16>, vector<3x484xf32> -> vector<3x484xf32>
    %186 = vector.extract_strided_slice %185 {offsets = [0, 135], sizes = [3, 346], strides = [1, 1]} : vector<3x484xf32> to vector<3x346xf32>
    %187 = arith.addf %183, %186 : vector<3x346xf32>
    %188 = vector.extract_strided_slice %2 {offsets = [0, 184], sizes = [3, 4], strides = [1, 1]} : vector<3x196xbf16> to vector<3x4xbf16>
    %cst_50 = arith.constant dense<0.000000e+00> : vector<3x484xf32>
    %189 = tpu.matmul %188, %1, %cst_50 {dimension_numbers = #tpu.dot_dimension_numbers<[1], [0], [0], [1], [0, 0, 1, 1], [], []>} : vector<3x4xbf16>, vector<4x484xbf16>, vector<3x484xf32> -> vector<3x484xf32>
    %190 = vector.extract_strided_slice %189 {offsets = [0, 136], sizes = [3, 346], strides = [1, 1]} : vector<3x484xf32> to vector<3x346xf32>
    %191 = arith.addf %187, %190 : vector<3x346xf32>
    %192 = vector.extract_strided_slice %2 {offsets = [0, 188], sizes = [3, 4], strides = [1, 1]} : vector<3x196xbf16> to vector<3x4xbf16>
    %cst_51 = arith.constant dense<0.000000e+00> : vector<3x484xf32>
    %193 = tpu.matmul %192, %1, %cst_51 {dimension_numbers = #tpu.dot_dimension_numbers<[1], [0], [0], [1], [0, 0, 1, 1], [], []>} : vector<3x4xbf16>, vector<4x484xbf16>, vector<3x484xf32> -> vector<3x484xf32>
    %194 = vector.extract_strided_slice %193 {offsets = [0, 137], sizes = [3, 346], strides = [1, 1]} : vector<3x484xf32> to vector<3x346xf32>
    %195 = arith.addf %191, %194 : vector<3x346xf32>
    %196 = vector.extract_strided_slice %2 {offsets = [0, 192], sizes = [3, 4], strides = [1, 1]} : vector<3x196xbf16> to vector<3x4xbf16>
    %cst_52 = arith.constant dense<0.000000e+00> : vector<3x484xf32>
    %197 = tpu.matmul %196, %1, %cst_52 {dimension_numbers = #tpu.dot_dimension_numbers<[1], [0], [0], [1], [0, 0, 1, 1], [], []>} : vector<3x4xbf16>, vector<4x484xbf16>, vector<3x484xf32> -> vector<3x484xf32>
    %198 = vector.extract_strided_slice %197 {offsets = [0, 138], sizes = [3, 346], strides = [1, 1]} : vector<3x484xf32> to vector<3x346xf32>
    %199 = arith.addf %195, %198 : vector<3x346xf32>
    %c0_53 = arith.constant 0 : index
    %c0_54 = arith.constant 0 : index
    %200 = vector.load %arg3[%c0_53, %c0_54] : memref<3x1xf32, #tpu.memory_space<vmem>>, vector<3x1xf32>
    %201 = vector.broadcast %200 : vector<3x1xf32> to vector<3x346xf32>
    %202 = arith.addf %199, %201 : vector<3x346xf32>
    %203 = math.tanh %202 : vector<3x346xf32>
    %c0_55 = arith.constant 0 : index
    %c0_56 = arith.constant 0 : index
    %c0_57 = arith.constant 0 : index
    %204 = vector.load %arg4[%c0_55, %c0_56, %c0_57] : memref<1x3x346xf32, #tpu.memory_space<vmem>>, vector<1x3x346xf32>
    %205 = vector.shape_cast %204 : vector<1x3x346xf32> to vector<3x346xf32>
    %206 = vector.shape_cast %203 : vector<3x346xf32> to vector<1x3x346xf32>
    tpu.vector_store %arg4[%c0_55, %c0_56, %c0_57], %206 {strides = array<i32>} : memref<1x3x346xf32, #tpu.memory_space<vmem>>, vector<1x3x346xf32>,
    return
  }
  func.func @transform_0(%arg0: i32) -> (i32, i32, i32) {
    %c0_i32 = arith.constant 0 : i32
    %c0_i32_0 = arith.constant 0 : i32
    %c0_i32_1 = arith.constant 0 : i32
    return %arg0, %c0_i32, %c0_i32_0 : i32, i32, i32
  }
  func.func @transform_1(%arg0: i32) -> (i32, i32) {
    %c0_i32 = arith.constant 0 : i32
    %c0_i32_0 = arith.constant 0 : i32
    %c0_i32_1 = arith.constant 0 : i32
    return %c0_i32, %c0_i32_0 : i32, i32
  }
  func.func @transform_2(%arg0: i32) -> (i32, i32) {
    %c0_i32 = arith.constant 0 : i32
    %c0_i32_0 = arith.constant 0 : i32
    %c0_i32_1 = arith.constant 0 : i32
    return %c0_i32, %c0_i32_0 : i32, i32
  }
  func.func @transform_3(%arg0: i32) -> (i32, i32, i32) {
    %c0_i32 = arith.constant 0 : i32
    %c0_i32_0 = arith.constant 0 : i32
    %c0_i32_1 = arith.constant 0 : i32
    return %arg0, %c0_i32, %c0_i32_0 : i32, i32, i32
  }
}

</mosaic_0001>

<bundles_post_ra>
// kernel: outconv_forward.1
= control target key start
LH: loop header
LB: loop body
LE: loop exit
PB: predicated region body
PF: predicated region fallthrough
CT: control target
= control target key end

     0   :  { %8 = vsyncpa [#allocation3], 0  ;;  %s7485_s0 = inlined_call_operand.hbm [shape: bf16[2,4,484], index: 0, kind: input, shape index: {}]   ;;  %s7486_s1 = inlined_call_operand.hbm [shape: bf16[3,196], index: 1, kind: input, shape index: {}]   ;;  %s7487_s2 = inlined_call_operand.hbm [shape: f32[3,1], index: 2, kind: input, shape index: {}]   ;;  %s7488_s3 = inlined_call_operand.hbm [shape: f32[2,3,346], index: 3, kind: output, shape index: {}]  }
   0x1   :  { %10 = vsyncpa [#allocation3 + $0x1], 0 }
   0x2   :  { %11 = vsyncpa [#allocation6], 0 }
   0x3   :  { %12 = vsyncpa [#allocation4], 0 }
   0x4   :  { %14 = vsyncpa [#allocation4 + $0x1], 0  ;;  %s6197_s12 = smov 0   ;;  %s6199_s13 = smov 0  }
   0x5   :  { %s6201_s14 = smov 0   ;;  %s6203_s15 = smov 0  }
   0x6 LB: > { %s6218_s16 = sadd.s32 4294967295, %s6105_s15   ;;  %s5593_s17 = sadd.s32 4294967294, %s6105_s15   ;;  %s6105_s15 = sphi %s6203_s15, %s7550_s15   ;;  %s6101_s14 = sphi %s6201_s14, %s7549_s14   ;;  %s6097_s13 = sphi %s6199_s13, %s7548_s13   ;;  %s6093_s12 = sphi %s6197_s12, %s7547_s12  }
   0x7   : > { %p40_p0 = scmp.ne.s32.totalorder %s6097_s13, %s6093_s12  ;;  %p7489_p1 = scmp.eq.s32.totalorder %s6218_s16, 0 }
   0x8   : > { %p112_p3 = scmp.eq.s32.totalorder %s5593_s17, 1  ;;  %p5594_p5 = scmp.ge.s32.totalorder %s6105_s15, 1 }
   0x9   : > { %p6227_p4 = por %p7489_p1, %p40_p0  ;;  %p119_p7 = scmp.lt.s32.totalorder %s6105_s15, 3 }
   0xa   : > { %p6232_p6 = por %p112_p3, %p40_p0  ;;  %s6107_s21 = smov [#allocation5]  }
   0xb   : > { %s7512_s18 = scalar_select %p6227_p4, 1, 0 }
   0xc   : > { %s7513_s19 = scalar_select %p6232_p6, 1, 0 }
   0xd   : > { %p6237_p8 = pnand %p5594_p5, %p119_p7  ;;  %s132_s22 = sshll.u32 %s6107_s21, 4  ;;  %s133_s22 = int_to_ptr.vmem [resolvable:$true] %s132_s22 }
   0xe   : > { %s6108_s23 = smov [#allocation7]   ;;  %s6253_s26 = sadd.s32 1, %s6105_s15  }
   0xf   : > { %s7514_s20 = scalar_select %p6237_p8, 1, 0 }
  0x10   : > { %p5819_p10 = pneg %p6237_p8  ;;  %s143_s24 = sshll.u32 %s6108_s23, 4  ;;  %s6250_s24 = int_to_ptr.vmem [resolvable:$true] %s143_s24 }
  0x11   : > { %s24_s27 = ssub.s32 %s6105_s15, %s6253_s26  ;;  %s5949_s30 = scalar_lea.hbm %s7486_s1, 64 }
  0x12   : > { %p6246_p11 = pnand %p5819_p10, %p7489_p1  ;;  %p5950_p12 = scmp.ne.s32.totalorder %s7486_s1, %s5949_s30 }
  0x13   : > { %p5956_p5 = scmp.lt.u32.totalorder %s5949_s30, %s7486_s1 }
  0x14   : > { %p5951_p13 = pneg %p6246_p11 }
  0x16   : > { %p5952_p0 = pnand %p5951_p13, %p5950_p12 }
  0x18   : > { %p5953_p3 = pneg %p5952_p0 }
  0x1a   : > { %p5958_p7 = pnand %p5956_p5, %p5953_p3 }
  0x1c   : > { %5961 = shalt.err (!%p5958_p7)
}
  0x1d   : > { %s5962_s8 = scalar_lea.vmem %s133_s22, 64  ;;  %p5970_p2 = scmp.lt.s32.totalorder %s133_s22, %s133_s22 }
  0x1e   : > { %p5963_p10 = scmp.ne.s32.totalorder %s133_s22, %s5962_s8  ;;  %p5971_p6 = scmp.lt.s32.totalorder %s5962_s8, %s5962_s8 }
  0x20   : > { %p5965_p9 = pnand %p5963_p10, %p5951_p13  ;;  %p5972_p4 = por %p5971_p6, %p5970_p2 }
  0x22   : > { %p5966_p1 = pneg %p5965_p9 }
  0x24   : > { %p5973_p8 = pnand %p5972_p4, %p5966_p1 }
  0x26   : > { %5976 = shalt.err (!%p5973_p8)
}
  0x27   : > { %5822 = dma.hbm_to_vmem [thread:$0]  (!%p6246_p11), %s7486_s1, 64, %s133_s22, [#allocation6]  }
  0x28   : > { %s5977_s21 = scalar_lea.hbm %s7487_s2, 64 }
  0x29   : > { %p5978_p9 = scmp.ne.s32.totalorder %s7487_s2, %s5977_s21  ;;  %p5984_p4 = scmp.lt.u32.totalorder %s5977_s21, %s7487_s2 }
  0x2b   : > { %p5980_p2 = pnand %p5978_p9, %p5951_p13 }
  0x2d   : > { %p5981_p1 = pneg %p5980_p2 }
  0x2f   : > { %p5986_p6 = pnand %p5984_p4, %p5981_p1 }
  0x31   : > { %5989 = shalt.err (!%p5986_p6)
}
  0x32   : > { %s5990_s22 = scalar_lea.vmem %s6250_s24, 64  ;;  %p5998_p3 = scmp.lt.s32.totalorder %s6250_s24, %s6250_s24 }
  0x33   : > { %p5991_p8 = scmp.ne.s32.totalorder %s6250_s24, %s5990_s22  ;;  %p5999_p5 = scmp.lt.s32.totalorder %s5990_s22, %s5990_s22 }
  0x35   : > { %p5993_p12 = pnand %p5991_p8, %p5951_p13  ;;  %p6000_p7 = por %p5999_p5, %p5998_p3 }
  0x37   : > { %p5994_p0 = pneg %p5993_p12 }
  0x39   : > { %p6001_p10 = pnand %p6000_p7, %p5994_p0 }
  0x3b   : > { %6004 = shalt.err (!%p6001_p10)
}
  0x3c   : > { %5825 = dma.hbm_to_vmem [thread:$0]  (!%p6246_p11), %s7487_s2, 64, %s6250_s24, [#allocation6]  }
  0x3d   : > { %p25_p13 = scmp.eq.s32.totalorder %s24_s27, 0  ;;  %s27_s6 = sadd.s32 1, %s6101_s14 }
  0x3e   : > { %p34_p9 = scmp.ne.s32.totalorder %s6101_s14, %s6097_s13  ;;  %p35_p2 = scmp.eq.s32.totalorder %s6105_s15, 0 }
  0x3f   : > { %s6312_s25 = scalar_select %p25_p13, %s6101_s14, %s27_s6  }
  0x40   : > { %p36_p1 = por %p35_p2, %p34_p9  ;;  %p7516_p4 = scmp.eq.s32.totalorder %s6218_s16, 1 }
  0x41   : > { %p5836_p8 = scmp.lt.s32.totalorder %s6105_s15, 2  ;;  %s154_s8 = sand.u32 1, %s6101_s14  }
  0x42   : > { %p6316_p6 = por %p7516_p4, %p34_p9  ;;  %s5598_s9 = sshll.u32 %s154_s8, 3 }
  0x43   : > { %s5804_s10 = sshll.u32 %s6105_s15, 7  ;;  %s158_s27 = scalar_lea.vmem [#allocation2], %s5598_s9 }
  0x44   : > { %s6326_s24 = scalar_lea.hbm %s7485_s0, %s5804_s10  ;;  %s166_s21 = sshll.u32 %s158_s27, 4  ;;  %s6328_s21 = int_to_ptr.vmem [resolvable:$true] %s166_s21 }
  0x45   : > { %p6330_p11 = pnand %p5836_p8, %p36_p1  ;;  %s155_s28 = scalar_lea.sflag [#allocation3], %s154_s8 }
  0x46   : > { %s6005_s29 = scalar_lea.hbm %s6326_s24, 128  ;;  %s6010_s4 = scalar_lea.hbm %s7485_s0, 256 }
  0x47   : > { %p6006_p12 = scmp.ne.s32.totalorder %s6326_s24, %s6005_s29  ;;  %p6007_p0 = pneg %p6330_p11 }
  0x48   : > { %p6011_p7 = scmp.lt.u32.totalorder %s6326_s24, %s7485_s0  ;;  %p6012_p10 = scmp.lt.u32.totalorder %s6010_s4, %s6005_s29 }
  0x49   : > { %p6008_p3 = pnand %p6007_p0, %p6006_p12  ;;  %p6014_p9 = scmp.lt.u32.totalorder %s6005_s29, %s6326_s24 }
  0x4a   : > { %p6013_p13 = por %p6012_p10, %p6011_p7 }
  0x4b   : > { %p6009_p5 = pneg %p6008_p3 }
  0x4c   : > { %p6015_p2 = por %p6014_p9, %p6013_p13 }
  0x4e   : > { %p6016_p1 = pnand %p6015_p2, %p6009_p5 }
  0x50   : > { %6019 = shalt.err (!%p6016_p1)
}
  0x51   : > { %s6020_s8 = scalar_lea.vmem %s6328_s21, 128  ;;  %s6109_s9 = smov [#allocation2]  }
  0x52   : > { %p6021_p4 = scmp.ne.s32.totalorder %s6328_s21, %s6020_s8  ;;  %s6025_s10 = sshll.u32 %s6109_s9, 4  ;;  %s6026_s10 = int_to_ptr.vmem [resolvable:$false] %s6025_s10 }
  0x53   : > { %s6027_s11 = scalar_lea.vmem %s6026_s10, 256  ;;  %p6028_p3 = scmp.lt.s32.totalorder %s6328_s21, %s6026_s10 }
  0x54   : > { %p6023_p8 = pnand %p6021_p4, %p6007_p0  ;;  %p6029_p7 = scmp.lt.s32.totalorder %s6027_s11, %s6020_s8 }
  0x56   : > { %p6024_p12 = pneg %p6023_p8  ;;  %p6030_p10 = por %p6029_p7, %p6028_p3 }
  0x58   : > { %p6031_p13 = pnand %p6030_p10, %p6024_p12 }
  0x5a   : > { %6034 = shalt.err (!%p6031_p13)
}
  0x5b   : > { %5829 = dma.hbm_to_vmem [thread:$0]  (!%p6330_p11), %s6326_s24, 128, %s6328_s21, %s155_s28  }
  0x5c   : > { %p7519_p5 = scmp.ne.s32.totalorder %s7514_s20, 0 }
  0x5e   : > { %175 = sbr.rel (%p7519_p5) target bundleno = 973 (0x3cd), region = 32 }
  0x65   : > { %s6362_s17 = sand.u32 1, %s6097_s13   ;;  %p7520_p0 = scmp.ne.s32.totalorder %s7512_s18, 0 }
  0x66   : > { %s5602_s27 = sshll.u32 %s6362_s17, 3  ;;  %s178_s29 = scalar_lea.sflag [#allocation3], %s6362_s17 }
  0x67   : > { %s181_s30 = scalar_lea.vmem [#allocation2], %s5602_s27 }
  0x68   : > { %6080 = dma.done.wait (%p7520_p0), %s178_s29, 128  }
  0x69   : > { %6082 = vsyncadd (%p7520_p0), %s178_s29, 4294967168  ;;  %p7521_p9 = scmp.eq.s32.totalorder %s6218_s16, 0 }
  0x6b   : > { %6084 = dma.done.wait (%p7521_p9), [#allocation6], 128   ;;  %p7522_p11 = pmov %p7521_p9 }
  0x6c   : > { %v220_v0 = vlaneseq  ;;  %v6110_v1 = vmov 1983009808   ;;  %v6111_v4 = vmov 0   ;;  %v213_v7 = vld [vmem:[%s181_s30] sm:$0xff]  ;;  %v214_v8 = vld [vmem:[#allocation5] sm:$0xf] }
  0x6d   : > { %6086 = vsyncadd (%p7522_p11), [#allocation6], 4294967168  ;;  %v218_v2 = vunpack.c.l.s4 %v6110_v1  ;;  %282 = vmatprep.mubr.bf16.mxu0 %v6111_v4  ;;  %323 = vmatprep.mubr.bf16.mxu1 %v6111_v4  ;;  %vm237_vm0 = vcmask 1041408   ;;  %v216_v9 = vcombine.high %v213_v7, %v213_v7  ;;  %s6112_s18 = smov 124   ;;  %s6113_s20 = smov 116   ;;  %vm233_vm1 = vcmask 31744  }
  0x6e   : > { %v221_v3 = vshrl.u32 %v220_v0, 7  ;;  %5940 = vset.pattern.permute.xlu1 %v6111_v4  ;;  %5941 = vset.pattern.permute.xlu0 %v6111_v4  ;;  %s6114_s24 = smov 120   ;;  %s6115_s21 = smov 112   ;;  %v5470_v29 = vld [vmem:[#allocation7] sm:$0x7]  ;;  %vm437_vm2 = vcmask 1039360  }
  0x6f   : > { %v219_v5 = vunpack.c.0.s8 %v218_v2  ;;  %s6116_s23 = smov 108   ;;  %s6117_s28 = smov 104   ;;  %vm541_vm3 = vcmask 1031168   ;;  %vm645_vm4 = vcmask 1022976   ;;  %vm749_vm5 = vcmask 1014784  }
  0x70   : > { %s6118_s22 = smov 100   ;;  %s6119_s4 = smov 96   ;;  %vm853_vm6 = vcmask 1006592   ;;  %vm957_vm7 = vcmask 998400   ;;  %vm1061_vm8 = vcmask 867328   ;;  %vm1165_vm9 = vcmask 859136  }
  0x71   : > { %v222_v6 = vsub.s32 %v219_v5, %v221_v3  ;;  %s6120_s5 = smov 92   ;;  %s6121_s6 = smov 88   ;;  %vm1269_vm10 = vcmask 850944   ;;  %vm1373_vm11 = vcmask 842752   ;;  %vm1477_vm12 = vcmask 834560  }
  0x72   : > { %s7496_s8 = smov 84   ;;  %s7492_s9 = smov 80   ;;  %vm1581_vm13 = vcmask 826368   ;;  %vm1685_vm14 = vcmask 818176   ;;  %vm1793_vm15 = vcmask 687104  }
  0x73   : > { %v223_v10 = vrot.slane %v213_v7, %v222_v6  ;;  %v6378_v11 = vrot.slane %v214_v8, %v222_v6  ;;  %v230_v12 = vrot.slane %v216_v9, %v222_v6  ;;  %s7494_s10 = smov 76   ;;  %s7495_s11 = smov 72  }
  0x74   : > { %s7498_s27 = smov 68   ;;  %s7499_s29 = smov 64  }
  0x75   : > { %v6380_v13 = vcombine.high %v223_v10, %v223_v10  ;;  %v6383_v14 = vsel %vm237_vm0, %v223_v10, 0  ;;  %342 = vrot.lane.b32.xlu0 %v6378_v11, %s6112_s18  ;;  %550 = vrot.lane.b32.xlu1 %v6378_v11, %s6113_s20  ;;  %v6389_v15 = vcombine.high %v230_v12, %v230_v12  ;;  %v6394_v16 = vsel %vm237_vm0, %v230_v12, 0  ;;  %s7500_s30 = smov 60  }
  0x76   : > { %v6479_v19 = vcombine.high %v6378_v11, %v6378_v11 }
  0x77   : > { %5605 = vmatprep.subr.msk.bf16.mxu0 %vm237_vm0, %v6380_v13  ;;  %5607 = vmatprep.subr.msk.bf16.mxu1 %vm237_vm0, %v6389_v15 }
  0x78   : > { %251 = vmatpush1.bf16.msra.mxu0 %v6383_v14  ;;  %292 = vmatpush1.bf16.msra.mxu1 %v6394_v16 }
  0x79   : > { %446 = vrot.lane.b32.xlu0 %v6378_v11, %s6114_s24  ;;  %654 = vrot.lane.b32.xlu1 %v6378_v11, %s6115_s21 }
  0x7a   : > { %5609 = vmatprep.subr.msk.bf16.mxu0 %vm237_vm0, %v6380_v13  ;;  %5611 = vmatprep.subr.msk.bf16.mxu1 %vm237_vm0, %v6389_v15 }
  0x7b   : > { %5606 = vmatmul.mubr.msk.bf16.vlgmr.msra.gmra.mrb[0].mxu0 %vm233_vm1, %v214_v8  ;;  %5608 = vmatmul.mubr.msk.bf16.vlgmr.msra.gmra.mrb[0].mxu1 %vm233_vm1, %v214_v8 }
  0x7c   : > { %348 = vmatpush1.bf16.msra.mxu0 %v6383_v14  ;;  %379 = vmatprep.mubr.bf16.mxu0 %v6111_v4 }
  0x7d   : > { %758 = vrot.lane.b32.xlu0 %v6378_v11, %s6116_s23  ;;  %862 = vrot.lane.b32.xlu1 %v6378_v11, %s6117_s28 }
  0x7e   : > { %389 = vmatpush1.bf16.msra.mxu1 %v6394_v16  ;;  %420 = vmatprep.mubr.bf16.mxu1 %v6111_v4 }
  0x7f   : > { %5613 = vmatprep.subr.msk.bf16.mxu0 %vm237_vm0, %v6380_v13  ;;  %5615 = vmatprep.subr.msk.bf16.mxu1 %vm237_vm0, %v6389_v15 }
  0x81   : > { %966 = vrot.lane.b32.xlu0 %v6378_v11, %s6118_s22  ;;  %1070 = vrot.lane.b32.xlu1 %v6378_v11, %s6119_s4 }
  0x85   : > { %1174 = vrot.lane.b32.xlu0 %v6378_v11, %s6120_s5  ;;  %1278 = vrot.lane.b32.xlu1 %v6378_v11, %s6121_s6 }
  0x89   : > { %1382 = vrot.lane.b32.xlu0 %v6378_v11, %s7496_s8  ;;  %1486 = vrot.lane.b32.xlu1 %v6378_v11, %s7492_s9  ;;  %s7502_s9 = smov 56   ;;  %s6132_s8 = smov 44  }
  0x8d   : > { %1590 = vrot.lane.b32.xlu0 %v6378_v11, %s7494_s10  ;;  %1694 = vrot.lane.b32.xlu1 %v6378_v11, %s7495_s11  ;;  %s6130_s10 = smov 52   ;;  %s6131_s11 = smov 48  }
  0x91   : > { %1803 = vrot.lane.b32.xlu0 %v6378_v11, %s7498_s27  ;;  %1912 = vrot.lane.b32.xlu1 %v6378_v11, %s7499_s29  ;;  %s7504_s27 = smov 40   ;;  %s7506_s29 = smov 36  }
  0x95   : > { %2021 = vrot.lane.b32.xlu0 %v6378_v11, %s7500_s30  ;;  %2130 = vrot.lane.b32.xlu1 %v6378_v11, %s7502_s9  ;;  %s6135_s30 = smov 32   ;;  %s6136_s9 = smov 28  }
  0x99   : > { %2239 = vrot.lane.b32.xlu0 %v6378_v11, %s6130_s10  ;;  %2348 = vrot.lane.b32.xlu1 %v6378_v11, %s6131_s11  ;;  %s6137_s10 = smov 24   ;;  %s6138_s11 = smov 20  }
  0x9d   : > { %2457 = vrot.lane.b32.xlu0 %v6378_v11, %s6132_s8  ;;  %2566 = vrot.lane.b32.xlu1 %v6378_v11, %s7504_s27  ;;  %s6139_s8 = smov 16   ;;  %s6140_s27 = smov 12  }
  0xa1   : > { %2675 = vrot.lane.b32.xlu0 %v6378_v11, %s7506_s29  ;;  %2784 = vrot.lane.b32.xlu1 %v6378_v11, %s6135_s30  ;;  %s6141_s29 = smov 8   ;;  %s6142_s30 = smov 4  }
  0xa5   : > { %2893 = vrot.lane.b32.xlu0 %v6378_v11, %s6136_s9  ;;  %3002 = vrot.lane.b32.xlu1 %v6378_v11, %s6137_s10  ;;  %s6143_s9 = smov 127   ;;  %s6145_s10 = smov 125  }
  0xa9   : > { %3111 = vrot.lane.b32.xlu0 %v6378_v11, %s6138_s11  ;;  %3220 = vrot.lane.b32.xlu1 %v6378_v11, %s6139_s8  ;;  %s6146_s11 = smov 123  }
  0xad   : > { %3329 = vrot.lane.b32.xlu0 %v6378_v11, %s6140_s27  ;;  %3438 = vrot.lane.b32.xlu1 %v6378_v11, %s6141_s29  ;;  %s6144_s29 = smov 126  }
  0xb1   : > { %3547 = vrot.lane.b32.xlu0 %v6378_v11, %s6142_s30  ;;  %3764 = vrot.lane.b32.xlu1 %v6479_v19, %s6112_s18  ;;  %s6147_s30 = smov 122  }
  0xb5   : > { %3873 = vrot.lane.b32.xlu0 %v6479_v19, %s6114_s24  ;;  %3982 = vrot.lane.b32.xlu1 %v6479_v19, %s6113_s20  ;;  %s7523_s20 = smov 84  }
  0xb9   : > { %4091 = vrot.lane.b32.xlu0 %v6479_v19, %s6115_s21  ;;  %4200 = vrot.lane.b32.xlu1 %v6479_v19, %s6116_s23  ;;  %s7524_s21 = smov 80   ;;  %s7525_s23 = smov 76  }
  0xbd   : > { %4309 = vrot.lane.b32.xlu0 %v6479_v19, %s6117_s28  ;;  %4418 = vrot.lane.b32.xlu1 %v6479_v19, %s6118_s22 }
  0xc1   : > { %4527 = vrot.lane.b32.xlu0 %v6479_v19, %s6119_s4  ;;  %4636 = vrot.lane.b32.xlu1 %v6479_v19, %s6120_s5  ;;  %s7526_s4 = smov 72   ;;  %s7527_s5 = smov 68  }
  0xc5   : > { %4745 = vrot.lane.b32.xlu0 %v6479_v19, %s6121_s6  ;;  %4848 = vrot.lane.b32.xlu1 %v6479_v19, %s7523_s20  ;;  %s7528_s6 = smov 64  }
  0xc9   : > { %4951 = vrot.lane.b32.xlu0 %v6479_v19, %s7524_s21  ;;  %5054 = vrot.lane.b32.xlu1 %v6479_v19, %s7525_s23  ;;  %s6148_s23 = smov 106  }
  0xcd   : > { %5158 = vrot.lane.b32.xlu0 %v6479_v19, %s7526_s4  ;;  %5262 = vrot.lane.b32.xlu1 %v6479_v19, %s7527_s5  ;;  %s6149_s4 = smov 105   ;;  %s6150_s5 = smov 103  }
  0xd1   : > { %5366 = vrot.lane.b32.xlu1 %v6479_v19, %s7528_s6  ;;  %s6152_s6 = smov 101  }
  0xd5   : > { %5473 = vperm.xlu1 %5940, %v5470_v29  }
  0xe7   : > { %v343_v17 = vpop.permute.xlu0 %342  ;;  %v551_v20 = vpop.permute.xlu1 %550 }
  0xe8   : > { %5610 = vmatmul.mubr.msk.bf16.vlgmr.msra.gmra.mrb[4].mxu0 %vm233_vm1, %v343_v17  ;;  %5612 = vmatmul.mubr.msk.bf16.vlgmr.msra.gmra.mrb[4].mxu1 %vm233_vm1, %v343_v17 }
  0xe9   : > { %452 = vmatpush1.bf16.msra.mxu0 %v6383_v14  ;;  %493 = vmatpush1.bf16.msra.mxu1 %v6394_v16 }
  0xea   : > { %483 = vmatprep.mubr.bf16.mxu0 %v6111_v4  ;;  %524 = vmatprep.mubr.bf16.mxu1 %v6111_v4 }
  0xeb   : > { %5617 = vmatprep.subr.msk.bf16.mxu0 %vm237_vm0, %v6380_v13  ;;  %5619 = vmatprep.subr.msk.bf16.mxu1 %vm237_vm0, %v6389_v15  ;;  %v447_v18 = vpop.permute.xlu0 %446  ;;  %v655_v21 = vpop.permute.xlu1 %654 }
  0xef   : > { %v759_v22 = vpop.permute.xlu0 %758  ;;  %v863_v23 = vpop.permute.xlu1 %862 }
  0xf0   : > { %5614 = vmatmul.mubr.msk.bf16.vlgmr.msra.gmra.mrb[8].mxu0 %vm233_vm1, %v447_v18  ;;  %5616 = vmatmul.mubr.msk.bf16.vlgmr.msra.gmra.mrb[8].mxu1 %vm233_vm1, %v447_v18 }
  0xf1   : > { %556 = vmatpush1.bf16.msra.mxu0 %v6383_v14  ;;  %597 = vmatpush1.bf16.msra.mxu1 %v6394_v16 }
  0xf2   : > { %587 = vmatprep.mubr.bf16.mxu0 %v6111_v4  ;;  %628 = vmatprep.mubr.bf16.mxu1 %v6111_v4 }
  0xf3   : > { %5621 = vmatprep.subr.msk.bf16.mxu0 %vm237_vm0, %v6380_v13  ;;  %5623 = vmatprep.subr.msk.bf16.mxu1 %vm237_vm0, %v6389_v15  ;;  %v967_v24 = vpop.permute.xlu0 %966  ;;  %v1071_v25 = vpop.permute.xlu1 %1070 }
  0xf7   : > { %v1175_v26 = vpop.permute.xlu0 %1174  ;;  %v1279_v27 = vpop.permute.xlu1 %1278 }
  0xf8   : > { %5618 = vmatmul.mubr.msk.bf16.vlgmr.msra.gmra.mrb[12].mxu0 %vm233_vm1, %v551_v20  ;;  %5620 = vmatmul.mubr.msk.bf16.vlgmr.msra.gmra.mrb[12].mxu1 %vm233_vm1, %v551_v20 }
  0xf9   : > { %660 = vmatpush1.bf16.msra.mxu0 %v6383_v14  ;;  %701 = vmatpush1.bf16.msra.mxu1 %v6394_v16 }
  0xfa   : > { %691 = vmatprep.mubr.bf16.mxu0 %v6111_v4  ;;  %732 = vmatprep.mubr.bf16.mxu1 %v6111_v4 }
  0xfb   : > { %5625 = vmatprep.subr.msk.bf16.mxu0 %vm237_vm0, %v6380_v13  ;;  %5627 = vmatprep.subr.msk.bf16.mxu1 %vm237_vm0, %v6389_v15  ;;  %v1383_v28 = vpop.permute.xlu0 %1382  ;;  %v1487_v30 = vpop.permute.xlu1 %1486 }
  0xff   : > { %v1591_v31 = vpop.permute.xlu0 %1590  ;;  %v1695_v32 = vpop.permute.xlu1 %1694 }
 0x100   : > { %5622 = vmatmul.mubr.msk.bf16.vlgmr.msra.gmra.mrb[16].mxu0 %vm233_vm1, %v655_v21  ;;  %5624 = vmatmul.mubr.msk.bf16.vlgmr.msra.gmra.mrb[16].mxu1 %vm233_vm1, %v655_v21 }
 0x101   : > { %764 = vmatpush1.bf16.msra.mxu0 %v6383_v14  ;;  %805 = vmatpush1.bf16.msra.mxu1 %v6394_v16 }
 0x102   : > { %795 = vmatprep.mubr.bf16.mxu0 %v6111_v4  ;;  %836 = vmatprep.mubr.bf16.mxu1 %v6111_v4 }
 0x103   : > { %5629 = vmatprep.subr.msk.bf16.mxu0 %vm237_vm0, %v6380_v13  ;;  %5631 = vmatprep.subr.msk.bf16.mxu1 %vm237_vm0, %v6389_v15  ;;  %v1804_v41 = vpop.permute.xlu0 %1803  ;;  %v1913_v42 = vpop.permute.xlu1 %1912 }
 0x107   : > { %v2022_v43 = vpop.permute.xlu0 %2021  ;;  %v2131_v44 = vpop.permute.xlu1 %2130 }
 0x108   : > { %5626 = vmatmul.mubr.msk.bf16.vlgmr.msra.gmra.mrb[20].mxu0 %vm233_vm1, %v759_v22  ;;  %5628 = vmatmul.mubr.msk.bf16.vlgmr.msra.gmra.mrb[20].mxu1 %vm233_vm1, %v759_v22 }
 0x109   : > { %868 = vmatpush1.bf16.msra.mxu0 %v6383_v14  ;;  %909 = vmatpush1.bf16.msra.mxu1 %v6394_v16 }
 0x10a   : > { %899 = vmatprep.mubr.bf16.mxu0 %v6111_v4  ;;  %940 = vmatprep.mubr.bf16.mxu1 %v6111_v4 }
 0x10b   : > { %5633 = vmatprep.subr.msk.bf16.mxu0 %vm237_vm0, %v6380_v13  ;;  %5635 = vmatprep.subr.msk.bf16.mxu1 %vm237_vm0, %v6389_v15  ;;  %v2240_v45 = vpop.permute.xlu0 %2239  ;;  %v2349_v46 = vpop.permute.xlu1 %2348 }
 0x10f   : > { %v2458_v47 = vpop.permute.xlu0 %2457  ;;  %v2567_v48 = vpop.permute.xlu1 %2566 }
 0x110   : > { %5630 = vmatmul.mubr.msk.bf16.vlgmr.msra.gmra.mrb[24].mxu0 %vm233_vm1, %v863_v23  ;;  %5632 = vmatmul.mubr.msk.bf16.vlgmr.msra.gmra.mrb[24].mxu1 %vm233_vm1, %v863_v23 }
 0x111   : > { %972 = vmatpush1.bf16.msra.mxu0 %v6383_v14  ;;  %1013 = vmatpush1.bf16.msra.mxu1 %v6394_v16 }
 0x112   : > { %1003 = vmatprep.mubr.bf16.mxu0 %v6111_v4  ;;  %1044 = vmatprep.mubr.bf16.mxu1 %v6111_v4 }
 0x113   : > { %5637 = vmatprep.subr.msk.bf16.mxu0 %vm237_vm0, %v6380_v13  ;;  %5639 = vmatprep.subr.msk.bf16.mxu1 %vm237_vm0, %v6389_v15  ;;  %v2676_v49 = vpop.permute.xlu0 %2675  ;;  %v2785_v50 = vpop.permute.xlu1 %2784 }
 0x117   : > { %v2894_v51 = vpop.permute.xlu0 %2893  ;;  %v3003_v52 = vpop.permute.xlu1 %3002 }
 0x118   : > { %5634 = vmatmul.mubr.msk.bf16.vlgmr.msra.gmra.mrb[28].mxu0 %vm233_vm1, %v967_v24  ;;  %5636 = vmatmul.mubr.msk.bf16.vlgmr.msra.gmra.mrb[28].mxu1 %vm233_vm1, %v967_v24 }
 0x119   : > { %1076 = vmatpush1.bf16.msra.mxu0 %v6383_v14  ;;  %1117 = vmatpush1.bf16.msra.mxu1 %v6394_v16 }
 0x11a   : > { %1107 = vmatprep.mubr.bf16.mxu0 %v6111_v4  ;;  %1148 = vmatprep.mubr.bf16.mxu1 %v6111_v4 }
 0x11b   : > { %5641 = vmatprep.subr.msk.bf16.mxu0 %vm237_vm0, %v6380_v13  ;;  %5643 = vmatprep.subr.msk.bf16.mxu1 %vm237_vm0, %v6389_v15  ;;  %v3112_v53 = vpop.permute.xlu0 %3111  ;;  %v3221_v54 = vpop.permute.xlu1 %3220 }
 0x11f   : > { %v3330_v63 = vpop.permute.xlu0 %3329  ;;  %v3439_v9 = vpop.permute.xlu1 %3438 }
 0x120   : > { %5638 = vmatmul.mubr.msk.bf16.vlgmr.msra.gmra.mrb[32].mxu0 %vm233_vm1, %v1071_v25  ;;  %5640 = vmatmul.mubr.msk.bf16.vlgmr.msra.gmra.mrb[32].mxu1 %vm233_vm1, %v1071_v25 }
 0x121   : > { %1180 = vmatpush1.bf16.msra.mxu0 %v6383_v14  ;;  %1221 = vmatpush1.bf16.msra.mxu1 %v6394_v16 }
 0x122   : > { %1211 = vmatprep.mubr.bf16.mxu0 %v6111_v4  ;;  %1252 = vmatprep.mubr.bf16.mxu1 %v6111_v4 }
 0x123   : > { %5645 = vmatprep.subr.msk.bf16.mxu0 %vm237_vm0, %v6380_v13  ;;  %5647 = vmatprep.subr.msk.bf16.mxu1 %vm237_vm0, %v6389_v15  ;;  %v3548_v23 = vpop.permute.xlu0 %3547 }
 0x128   : > { %5642 = vmatmul.mubr.msk.bf16.vlgmr.msra.gmra.mrb[36].mxu0 %vm233_vm1, %v1175_v26  ;;  %5644 = vmatmul.mubr.msk.bf16.vlgmr.msra.gmra.mrb[36].mxu1 %vm233_vm1, %v1175_v26 }
 0x129   : > { %1284 = vmatpush1.bf16.msra.mxu0 %v6383_v14  ;;  %1325 = vmatpush1.bf16.msra.mxu1 %v6394_v16 }
 0x12a   : > { %1315 = vmatprep.mubr.bf16.mxu0 %v6111_v4  ;;  %1356 = vmatprep.mubr.bf16.mxu1 %v6111_v4 }
 0x12b   : > { %5649 = vmatprep.subr.msk.bf16.mxu0 %vm237_vm0, %v6380_v13  ;;  %5651 = vmatprep.subr.msk.bf16.mxu1 %vm237_vm0, %v6389_v15 }
 0x130   : > { %5646 = vmatmul.mubr.msk.bf16.vlgmr.msra.gmra.mrb[40].mxu0 %vm233_vm1, %v1279_v27  ;;  %5648 = vmatmul.mubr.msk.bf16.vlgmr.msra.gmra.mrb[40].mxu1 %vm233_vm1, %v1279_v27 }
 0x131   : > { %1388 = vmatpush1.bf16.msra.mxu0 %v6383_v14  ;;  %1429 = vmatpush1.bf16.msra.mxu1 %v6394_v16 }
 0x132   : > { %1419 = vmatprep.mubr.bf16.mxu0 %v6111_v4  ;;  %1460 = vmatprep.mubr.bf16.mxu1 %v6111_v4 }
 0x133   : > { %5653 = vmatprep.subr.msk.bf16.mxu0 %vm237_vm0, %v6380_v13  ;;  %5655 = vmatprep.subr.msk.bf16.mxu1 %vm237_vm0, %v6389_v15 }
 0x138   : > { %5650 = vmatmul.mubr.msk.bf16.vlgmr.msra.gmra.mrb[44].mxu0 %vm233_vm1, %v1383_v28  ;;  %5652 = vmatmul.mubr.msk.bf16.vlgmr.msra.gmra.mrb[44].mxu1 %vm233_vm1, %v1383_v28 }
 0x139   : > { %1492 = vmatpush1.bf16.msra.mxu0 %v6383_v14  ;;  %1533 = vmatpush1.bf16.msra.mxu1 %v6394_v16 }
 0x13a   : > { %1523 = vmatprep.mubr.bf16.mxu0 %v6111_v4  ;;  %1564 = vmatprep.mubr.bf16.mxu1 %v6111_v4 }
 0x13b   : > { %5657 = vmatprep.subr.msk.bf16.mxu0 %vm237_vm0, %v6380_v13  ;;  %5659 = vmatprep.subr.msk.bf16.mxu1 %vm237_vm0, %v6389_v15 }
 0x140   : > { %5654 = vmatmul.mubr.msk.bf16.vlgmr.msra.gmra.mrb[48].mxu0 %vm233_vm1, %v1487_v30  ;;  %5656 = vmatmul.mubr.msk.bf16.vlgmr.msra.gmra.mrb[48].mxu1 %vm233_vm1, %v1487_v30 }
 0x141   : > { %1596 = vmatpush1.bf16.msra.mxu0 %v6383_v14  ;;  %1637 = vmatpush1.bf16.msra.mxu1 %v6394_v16 }
 0x142   : > { %1627 = vmatprep.mubr.bf16.mxu0 %v6111_v4  ;;  %1668 = vmatprep.mubr.bf16.mxu1 %v6111_v4 }
 0x143   : > { %5661 = vmatprep.subr.msk.bf16.mxu0 %vm237_vm0, %v6380_v13  ;;  %5663 = vmatprep.subr.msk.bf16.mxu1 %vm237_vm0, %v6389_v15 }
 0x148   : > { %5658 = vmatmul.mubr.msk.bf16.vlgmr.msra.gmra.mrb[52].mxu0 %vm233_vm1, %v1591_v31  ;;  %5660 = vmatmul.mubr.msk.bf16.vlgmr.msra.gmra.mrb[52].mxu1 %vm233_vm1, %v1591_v31 }
 0x149   : > { %1700 = vmatpush1.bf16.msra.mxu0 %v6383_v14  ;;  %1741 = vmatpush1.bf16.msra.mxu1 %v6394_v16 }
 0x14a   : > { %1731 = vmatprep.mubr.bf16.mxu0 %v6111_v4  ;;  %1772 = vmatprep.mubr.bf16.mxu1 %v6111_v4 }
 0x14b   : > { %5665 = vmatprep.subr.msk.bf16.mxu0 %vm237_vm0, %v6380_v13  ;;  %5667 = vmatprep.subr.msk.bf16.mxu1 %vm237_vm0, %v6389_v15 }
 0x14e   : > { %v6629_v33 = vpop.f32.mrb[0].mxu0  ;;  %v6637_v37 = vpop.f32.mrb[0].mxu1 }
 0x14f   : > { %v6631_v34 = vpop.f32.mrb[1].mxu0  ;;  %v327_v38 = vpop.f32.mrb[1].mxu1 }
 0x150   : > { %5662 = vmatmul.mubr.msk.bf16.vlgmr.msra.gmra.mrb[56].mxu0 %vm233_vm1, %v1695_v32  ;;  %5664 = vmatmul.mubr.msk.bf16.vlgmr.msra.gmra.mrb[56].mxu1 %vm233_vm1, %v1695_v32  ;;  %v288_v35 = vpop.f32.mrb[2].mxu0  ;;  %v328_v39 = vpop.f32.mrb[2].mxu1 }
 0x151   : > { %1809 = vmatpush1.bf16.msra.mxu0 %v6383_v14  ;;  %1850 = vmatpush1.bf16.msra.mxu1 %v6394_v16  ;;  %v289_v36 = vpop.f32.mrb[3].mxu0  ;;  %v329_v40 = vpop.f32.mrb[3].mxu1 }
 0x152   : > { %1840 = vmatprep.mubr.bf16.mxu0 %v6111_v4  ;;  %1881 = vmatprep.mubr.bf16.mxu1 %v6111_v4 }
 0x153   : > { %5669 = vmatprep.subr.msk.bf16.mxu0 %vm237_vm0, %v6380_v13  ;;  %5671 = vmatprep.subr.msk.bf16.mxu1 %vm237_vm0, %v6389_v15 }
 0x158   : > { %5666 = vmatmul.mubr.msk.bf16.vlgmr.msra.gmra.mrb[60].mxu0 %vm233_vm1, %v1804_v41  ;;  %5668 = vmatmul.mubr.msk.bf16.vlgmr.msra.gmra.mrb[60].mxu1 %vm233_vm1, %v1804_v41 }
 0x159   : > { %1918 = vmatpush1.bf16.msra.mxu0 %v6383_v14  ;;  %1959 = vmatpush1.bf16.msra.mxu1 %v6394_v16 }
 0x15a   : > { %1949 = vmatprep.mubr.bf16.mxu0 %v6111_v4  ;;  %1990 = vmatprep.mubr.bf16.mxu1 %v6111_v4 }
 0x15b   : > { %5673 = vmatprep.subr.msk.bf16.mxu0 %vm237_vm0, %v6380_v13  ;;  %5675 = vmatprep.subr.msk.bf16.mxu1 %vm237_vm0, %v6389_v15 }
 0x160   : > { %5670 = vmatmul.mubr.msk.bf16.vlgmr.msra.gmra.mrb[64].mxu0 %vm233_vm1, %v1913_v42  ;;  %5672 = vmatmul.mubr.msk.bf16.vlgmr.msra.gmra.mrb[64].mxu1 %vm233_vm1, %v1913_v42 }
 0x161   : > { %2027 = vmatpush1.bf16.msra.mxu0 %v6383_v14  ;;  %2068 = vmatpush1.bf16.msra.mxu1 %v6394_v16 }
 0x162   : > { %2058 = vmatprep.mubr.bf16.mxu0 %v6111_v4  ;;  %2099 = vmatprep.mubr.bf16.mxu1 %v6111_v4 }
 0x163   : > { %5677 = vmatprep.subr.msk.bf16.mxu0 %vm237_vm0, %v6380_v13  ;;  %5679 = vmatprep.subr.msk.bf16.mxu1 %vm237_vm0, %v6389_v15 }
 0x168   : > { %5674 = vmatmul.mubr.msk.bf16.vlgmr.msra.gmra.mrb[68].mxu0 %vm233_vm1, %v2022_v43  ;;  %5676 = vmatmul.mubr.msk.bf16.vlgmr.msra.gmra.mrb[68].mxu1 %vm233_vm1, %v2022_v43  ;;  %v3765_v43 = vpop.permute.xlu1 %3764 }
 0x169   : > { %2136 = vmatpush1.bf16.msra.mxu0 %v6383_v14  ;;  %2177 = vmatpush1.bf16.msra.mxu1 %v6394_v16 }
 0x16a   : > { %2167 = vmatprep.mubr.bf16.mxu0 %v6111_v4  ;;  %2208 = vmatprep.mubr.bf16.mxu1 %v6111_v4 }
 0x16b   : > { %5681 = vmatprep.subr.msk.bf16.mxu0 %vm237_vm0, %v6380_v13  ;;  %5683 = vmatprep.subr.msk.bf16.mxu1 %vm237_vm0, %v6389_v15 }
 0x170   : > { %5678 = vmatmul.mubr.msk.bf16.vlgmr.msra.gmra.mrb[72].mxu0 %vm233_vm1, %v2131_v44  ;;  %5680 = vmatmul.mubr.msk.bf16.vlgmr.msra.gmra.mrb[72].mxu1 %vm233_vm1, %v2131_v44 }
 0x171   : > { %2245 = vmatpush1.bf16.msra.mxu0 %v6383_v14  ;;  %2286 = vmatpush1.bf16.msra.mxu1 %v6394_v16 }
 0x172   : > { %2276 = vmatprep.mubr.bf16.mxu0 %v6111_v4  ;;  %2317 = vmatprep.mubr.bf16.mxu1 %v6111_v4 }
 0x173   : > { %5685 = vmatprep.subr.msk.bf16.mxu0 %vm237_vm0, %v6380_v13  ;;  %5687 = vmatprep.subr.msk.bf16.mxu1 %vm237_vm0, %v6389_v15 }
 0x178   : > { %5682 = vmatmul.mubr.msk.bf16.vlgmr.msra.gmra.mrb[76].mxu0 %vm233_vm1, %v2240_v45  ;;  %5684 = vmatmul.mubr.msk.bf16.vlgmr.msra.gmra.mrb[76].mxu1 %vm233_vm1, %v2240_v45 }
 0x179   : > { %2354 = vmatpush1.bf16.msra.mxu0 %v6383_v14  ;;  %2395 = vmatpush1.bf16.msra.mxu1 %v6394_v16 }
 0x17a   : > { %2385 = vmatprep.mubr.bf16.mxu0 %v6111_v4  ;;  %2426 = vmatprep.mubr.bf16.mxu1 %v6111_v4 }
 0x17b   : > { %5689 = vmatprep.subr.msk.bf16.mxu0 %vm237_vm0, %v6380_v13  ;;  %5691 = vmatprep.subr.msk.bf16.mxu1 %vm237_vm0, %v6389_v15 }
 0x180   : > { %5686 = vmatmul.mubr.msk.bf16.vlgmr.msra.gmra.mrb[80].mxu0 %vm233_vm1, %v2349_v46  ;;  %5688 = vmatmul.mubr.msk.bf16.vlgmr.msra.gmra.mrb[80].mxu1 %vm233_vm1, %v2349_v46 }
 0x181   : > { %2463 = vmatpush1.bf16.msra.mxu0 %v6383_v14  ;;  %2504 = vmatpush1.bf16.msra.mxu1 %v6394_v16 }
 0x182   : > { %2494 = vmatprep.mubr.bf16.mxu0 %v6111_v4  ;;  %2535 = vmatprep.mubr.bf16.mxu1 %v6111_v4 }
 0x183   : > { %5693 = vmatprep.subr.msk.bf16.mxu0 %vm237_vm0, %v6380_v13  ;;  %5695 = vmatprep.subr.msk.bf16.mxu1 %vm237_vm0, %v6389_v15 }
 0x188   : > { %5690 = vmatmul.mubr.msk.bf16.vlgmr.msra.gmra.mrb[84].mxu0 %vm233_vm1, %v2458_v47  ;;  %5692 = vmatmul.mubr.msk.bf16.vlgmr.msra.gmra.mrb[84].mxu1 %vm233_vm1, %v2458_v47 }
 0x189   : > { %2572 = vmatpush1.bf16.msra.mxu0 %v6383_v14  ;;  %2613 = vmatpush1.bf16.msra.mxu1 %v6394_v16 }
 0x18a   : > { %2603 = vmatprep.mubr.bf16.mxu0 %v6111_v4  ;;  %2644 = vmatprep.mubr.bf16.mxu1 %v6111_v4 }
 0x18b   : > { %5697 = vmatprep.subr.msk.bf16.mxu0 %vm237_vm0, %v6380_v13  ;;  %5699 = vmatprep.subr.msk.bf16.mxu1 %vm237_vm0, %v6389_v15 }
 0x190   : > { %5694 = vmatmul.mubr.msk.bf16.vlgmr.msra.gmra.mrb[88].mxu0 %vm233_vm1, %v2567_v48  ;;  %5696 = vmatmul.mubr.msk.bf16.vlgmr.msra.gmra.mrb[88].mxu1 %vm233_vm1, %v2567_v48 }
 0x191   : > { %2681 = vmatpush1.bf16.msra.mxu0 %v6383_v14  ;;  %2722 = vmatpush1.bf16.msra.mxu1 %v6394_v16 }
 0x192   : > { %2712 = vmatprep.mubr.bf16.mxu0 %v6111_v4  ;;  %2753 = vmatprep.mubr.bf16.mxu1 %v6111_v4 }
 0x193   : > { %5701 = vmatprep.subr.msk.bf16.mxu0 %vm237_vm0, %v6380_v13  ;;  %5703 = vmatprep.subr.msk.bf16.mxu1 %vm237_vm0, %v6389_v15 }
 0x198   : > { %5698 = vmatmul.mubr.msk.bf16.vlgmr.msra.gmra.mrb[92].mxu0 %vm233_vm1, %v2676_v49  ;;  %5700 = vmatmul.mubr.msk.bf16.vlgmr.msra.gmra.mrb[92].mxu1 %vm233_vm1, %v2676_v49 }
 0x199   : > { %2790 = vmatpush1.bf16.msra.mxu0 %v6383_v14  ;;  %2831 = vmatpush1.bf16.msra.mxu1 %v6394_v16 }
 0x19a   : > { %2821 = vmatprep.mubr.bf16.mxu0 %v6111_v4  ;;  %2862 = vmatprep.mubr.bf16.mxu1 %v6111_v4 }
 0x19b   : > { %5705 = vmatprep.subr.msk.bf16.mxu0 %vm237_vm0, %v6380_v13  ;;  %5707 = vmatprep.subr.msk.bf16.mxu1 %vm237_vm0, %v6389_v15 }
 0x1a0   : > { %5702 = vmatmul.mubr.msk.bf16.vlgmr.msra.gmra.mrb[96].mxu0 %vm233_vm1, %v2785_v50  ;;  %5704 = vmatmul.mubr.msk.bf16.vlgmr.msra.gmra.mrb[96].mxu1 %vm233_vm1, %v2785_v50 }
 0x1a1   : > { %2899 = vmatpush1.bf16.msra.mxu0 %v6383_v14  ;;  %2940 = vmatpush1.bf16.msra.mxu1 %v6394_v16 }
 0x1a2   : > { %2930 = vmatprep.mubr.bf16.mxu0 %v6111_v4  ;;  %2971 = vmatprep.mubr.bf16.mxu1 %v6111_v4 }
 0x1a3   : > { %5709 = vmatprep.subr.msk.bf16.mxu0 %vm237_vm0, %v6380_v13  ;;  %5711 = vmatprep.subr.msk.bf16.mxu1 %vm237_vm0, %v6389_v15 }
 0x1a8   : > { %5706 = vmatmul.mubr.msk.bf16.vlgmr.msra.gmra.mrb[100].mxu0 %vm233_vm1, %v2894_v51  ;;  %5708 = vmatmul.mubr.msk.bf16.vlgmr.msra.gmra.mrb[100].mxu1 %vm233_vm1, %v2894_v51  ;;  %v3874_v51 = vpop.permute.xlu0 %3873 }
 0x1a9   : > { %3008 = vmatpush1.bf16.msra.mxu0 %v6383_v14  ;;  %3049 = vmatpush1.bf16.msra.mxu1 %v6394_v16 }
 0x1aa   : > { %3039 = vmatprep.mubr.bf16.mxu0 %v6111_v4  ;;  %3080 = vmatprep.mubr.bf16.mxu1 %v6111_v4 }
 0x1ab   : > { %5713 = vmatprep.subr.msk.bf16.mxu0 %vm237_vm0, %v6380_v13  ;;  %5715 = vmatprep.subr.msk.bf16.mxu1 %vm237_vm0, %v6389_v15 }
 0x1b0   : > { %5710 = vmatmul.mubr.msk.bf16.vlgmr.msra.gmra.mrb[104].mxu0 %vm233_vm1, %v3003_v52  ;;  %5712 = vmatmul.mubr.msk.bf16.vlgmr.msra.gmra.mrb[104].mxu1 %vm233_vm1, %v3003_v52  ;;  %v3983_v52 = vpop.permute.xlu1 %3982 }
 0x1b1   : > { %3117 = vmatpush1.bf16.msra.mxu0 %v6383_v14  ;;  %3158 = vmatpush1.bf16.msra.mxu1 %v6394_v16 }
 0x1b2   : > { %3148 = vmatprep.mubr.bf16.mxu0 %v6111_v4  ;;  %3189 = vmatprep.mubr.bf16.mxu1 %v6111_v4 }
 0x1b3   : > { %5717 = vmatprep.subr.msk.bf16.mxu0 %vm237_vm0, %v6380_v13  ;;  %5719 = vmatprep.subr.msk.bf16.mxu1 %vm237_vm0, %v6389_v15 }
 0x1b8   : > { %5714 = vmatmul.mubr.msk.bf16.vlgmr.msra.gmra.mrb[108].mxu0 %vm233_vm1, %v3112_v53  ;;  %5716 = vmatmul.mubr.msk.bf16.vlgmr.msra.gmra.mrb[108].mxu1 %vm233_vm1, %v3112_v53 }
 0x1b9   : > { %3226 = vmatpush1.bf16.msra.mxu0 %v6383_v14  ;;  %3267 = vmatpush1.bf16.msra.mxu1 %v6394_v16 }
 0x1ba   : > { %3257 = vmatprep.mubr.bf16.mxu0 %v6111_v4  ;;  %3298 = vmatprep.mubr.bf16.mxu1 %v6111_v4 }
 0x1bb   : > { %v381_v55 = vpop.f32.mrb[4].mxu0  ;;  %v422_v56 = vpop.f32.mrb[4].mxu1  ;;  %5721 = vmatprep.subr.msk.bf16.mxu0 %vm237_vm0, %v6380_v13  ;;  %5723 = vmatprep.subr.msk.bf16.mxu1 %vm237_vm0, %v6389_v15 }
 0x1bc   : > { %431 = vrot.lane.b32.xlu0 %v381_v55, %s6143_s9  ;;  %v383_v57 = vpop.f32.mrb[5].mxu0  ;;  %435 = vrot.lane.b32.xlu1 %v422_v56, %s6143_s9  ;;  %v424_v58 = vpop.f32.mrb[5].mxu1 }
 0x1bd   : > { %v385_v59 = vpop.f32.mrb[6].mxu0  ;;  %v425_v60 = vpop.f32.mrb[6].mxu1 }
 0x1be   : > { %v386_v61 = vpop.f32.mrb[7].mxu0  ;;  %v426_v62 = vpop.f32.mrb[7].mxu1 }
 0x1bf   : > { %v4201_v61 = vpop.permute.xlu1 %4200 }
 0x1c0   : > { %5718 = vmatmul.mubr.msk.bf16.vlgmr.msra.gmra.mrb[112].mxu0 %vm233_vm1, %v3221_v54  ;;  %433 = vrot.lane.b32.xlu0 %v383_v57, %s6143_s9  ;;  %s6155_s9 = smov 81  }
 0x1c1   : > { %3335 = vmatpush1.bf16.msra.mxu0 %v6383_v14  ;;  %5720 = vmatmul.mubr.msk.bf16.vlgmr.msra.gmra.mrb[112].mxu1 %vm233_vm1, %v3221_v54 }
 0x1c2   : > { %3376 = vmatpush1.bf16.msra.mxu1 %v6394_v16  ;;  %3366 = vmatprep.mubr.bf16.mxu0 %v6111_v4 }
 0x1c3   : > { %v485_v0 = vpop.f32.mrb[8].mxu0  ;;  %v526_v1 = vpop.f32.mrb[8].mxu1  ;;  %3407 = vmatprep.mubr.bf16.mxu1 %v6111_v4  ;;  %5725 = vmatprep.subr.msk.bf16.mxu0 %vm237_vm0, %v6380_v13 }
 0x1c4   : > { %535 = vrot.lane.b32.xlu0 %v485_v0, %s6144_s29  ;;  %v487_v2 = vpop.f32.mrb[9].mxu0  ;;  %v528_v3 = vpop.f32.mrb[9].mxu1  ;;  %5727 = vmatprep.subr.msk.bf16.mxu1 %vm237_vm0, %v6389_v15 }
 0x1c5   : > { %v489_v5 = vpop.f32.mrb[10].mxu0  ;;  %537 = vrot.lane.b32.xlu1 %v487_v2, %s6144_s29  ;;  %v529_v6 = vpop.f32.mrb[10].mxu1 }
 0x1c6   : > { %v490_v7 = vpop.f32.mrb[11].mxu0  ;;  %v530_v8 = vpop.f32.mrb[11].mxu1 }
 0x1c7   : > { %v4092_v7 = vpop.permute.xlu0 %4091  ;;  %v6861_v8 = vpop.permute.xlu1 %4418 }
 0x1c8   : > { %5722 = vmatmul.mubr.msk.bf16.vlgmr.msra.gmra.mrb[116].mxu0 %vm233_vm1, %v3330_v63  ;;  %539 = vrot.lane.b32.xlu0 %v526_v1, %s6144_s29  ;;  %s6156_s29 = smov 79  }
 0x1c9   : > { %5724 = vmatmul.mubr.msk.bf16.vlgmr.msra.gmra.mrb[116].mxu1 %vm233_vm1, %v3330_v63  ;;  %3444 = vmatpush1.bf16.msra.mxu0 %v6383_v14 }
 0x1ca   : > { %3485 = vmatpush1.bf16.msra.mxu1 %v6394_v16  ;;  %3475 = vmatprep.mubr.bf16.mxu0 %v6111_v4 }
 0x1cb   : > { %v589_v10 = vpop.f32.mrb[12].mxu0  ;;  %v630_v11 = vpop.f32.mrb[12].mxu1  ;;  %3516 = vmatprep.mubr.bf16.mxu1 %v6111_v4  ;;  %5729 = vmatprep.subr.msk.bf16.mxu0 %vm237_vm0, %v6380_v13 }
 0x1cc   : > { %v591_v12 = vpop.f32.mrb[13].mxu0  ;;  %639 = vrot.lane.b32.xlu1 %v589_v10, %s6145_s10  ;;  %v632_v17 = vpop.f32.mrb[13].mxu1  ;;  %5731 = vmatprep.subr.msk.bf16.mxu1 %vm237_vm0, %v6389_v15 }
 0x1cd   : > { %v593_v18 = vpop.f32.mrb[14].mxu0  ;;  %641 = vrot.lane.b32.xlu0 %v591_v12, %s6145_s10  ;;  %v633_v20 = vpop.f32.mrb[14].mxu1 }
 0x1ce   : > { %v594_v21 = vpop.f32.mrb[15].mxu0  ;;  %v634_v22 = vpop.f32.mrb[15].mxu1 }
 0x1cf   : > { %v6876_v22 = vpop.permute.xlu1 %4636 }
 0x1d0   : > { %5726 = vmatmul.mubr.msk.bf16.vlgmr.msra.gmra.mrb[120].mxu0 %vm233_vm1, %v3439_v9  ;;  %643 = vrot.lane.b32.xlu1 %v630_v11, %s6145_s10  ;;  %s6158_s10 = smov 62  }
 0x1d1   : > { %5728 = vmatmul.mubr.msk.bf16.vlgmr.msra.gmra.mrb[120].mxu1 %vm233_vm1, %v3439_v9  ;;  %3553 = vmatpush1.bf16.msra.mxu0 %v6383_v14 }
 0x1d2   : > { %3594 = vmatpush1.bf16.msra.mxu1 %v6394_v16  ;;  %3584 = vmatprep.mubr.bf16.mxu0 %v6111_v4 }
 0x1d3   : > { %v693_v24 = vpop.f32.mrb[16].mxu0  ;;  %v734_v25 = vpop.f32.mrb[16].mxu1  ;;  %3625 = vmatprep.mubr.bf16.mxu1 %v6111_v4  ;;  %5733 = vmatprep.subr.msk.bf16.mxu0 %vm237_vm0, %v6380_v13 }
 0x1d4   : > { %v695_v26 = vpop.f32.mrb[17].mxu0  ;;  %743 = vrot.lane.b32.xlu0 %v693_v24, %s6112_s18  ;;  %v736_v27 = vpop.f32.mrb[17].mxu1  ;;  %5735 = vmatprep.subr.msk.bf16.mxu1 %vm237_vm0, %v6389_v15 }
 0x1d5   : > { %v697_v28 = vpop.f32.mrb[18].mxu0  ;;  %745 = vrot.lane.b32.xlu1 %v695_v26, %s6112_s18  ;;  %v737_v29 = vpop.f32.mrb[18].mxu1 }
 0x1d6   : > { %v698_v30 = vpop.f32.mrb[19].mxu0  ;;  %v738_v31 = vpop.f32.mrb[19].mxu1 }
 0x1d7   : > { %v4310_v31 = vpop.permute.xlu0 %4309 }
 0x1d8   : > { %5730 = vmatmul.mubr.msk.bf16.vlgmr.msra.gmra.mrb[124].mxu0 %vm233_vm1, %v3548_v23  ;;  %747 = vrot.lane.b32.xlu0 %v734_v25, %s6112_s18 }
 0x1d9   : > { %5732 = vmatmul.mubr.msk.bf16.vlgmr.msra.gmra.mrb[124].mxu1 %vm233_vm1, %v3548_v23  ;;  %3661 = vmatpush1.bf16.msra.mxu0 %v6383_v14 }
 0x1da   : > { %3702 = vmatpush1.bf16.msra.mxu1 %v6394_v16  ;;  %3692 = vmatprep.mubr.bf16.mxu0 %v6111_v4 }
 0x1db   : > { %v797_v32 = vpop.f32.mrb[20].mxu0  ;;  %v838_v35 = vpop.f32.mrb[20].mxu1  ;;  %3733 = vmatprep.mubr.bf16.mxu1 %v6111_v4  ;;  %5737 = vmatprep.subr.msk.bf16.mxu0 %vm237_vm0, %v6380_v13 }
 0x1dc   : > { %v799_v36 = vpop.f32.mrb[21].mxu0  ;;  %847 = vrot.lane.b32.xlu1 %v797_v32, %s6146_s11  ;;  %v840_v38 = vpop.f32.mrb[21].mxu1  ;;  %5739 = vmatprep.subr.msk.bf16.mxu1 %vm237_vm0, %v6389_v15 }
 0x1dd   : > { %v801_v39 = vpop.f32.mrb[22].mxu0  ;;  %849 = vrot.lane.b32.xlu0 %v799_v36, %s6146_s11  ;;  %v841_v40 = vpop.f32.mrb[22].mxu1 }
 0x1de   : > { %v802_v41 = vpop.f32.mrb[23].mxu0  ;;  %v842_v42 = vpop.f32.mrb[23].mxu1 }
 0x1df   : > { %v6888_v32 = vpop.permute.xlu1 %4848 }
 0x1e0   : > { %5734 = vmatmul.mubr.msk.bf16.vlgmr.msra.gmra.mrb[128].mxu0 %vm233_vm1, %v6479_v19  ;;  %851 = vrot.lane.b32.xlu1 %v838_v35, %s6146_s11 }
 0x1e1   : > { %5736 = vmatmul.mubr.msk.bf16.vlgmr.msra.gmra.mrb[128].mxu1 %vm233_vm1, %v6479_v19  ;;  %3770 = vmatpush1.bf16.msra.mxu0 %v6383_v14 }
 0x1e2   : > { %3811 = vmatpush1.bf16.msra.mxu1 %v6394_v16  ;;  %3801 = vmatprep.mubr.bf16.mxu0 %v6111_v4 }
 0x1e3   : > { %v901_v44 = vpop.f32.mrb[24].mxu0  ;;  %v942_v45 = vpop.f32.mrb[24].mxu1  ;;  %3842 = vmatprep.mubr.bf16.mxu1 %v6111_v4  ;;  %5741 = vmatprep.subr.msk.bf16.mxu0 %vm237_vm0, %v6380_v13 }
 0x1e4   : > { %v903_v46 = vpop.f32.mrb[25].mxu0  ;;  %951 = vrot.lane.b32.xlu0 %v901_v44, %s6147_s30  ;;  %v944_v47 = vpop.f32.mrb[25].mxu1  ;;  %5743 = vmatprep.subr.msk.bf16.mxu1 %vm237_vm0, %v6389_v15 }
 0x1e5   : > { %v905_v19 = vpop.f32.mrb[26].mxu0  ;;  %953 = vrot.lane.b32.xlu1 %v903_v46, %s6147_s30  ;;  %v945_v48 = vpop.f32.mrb[26].mxu1 }
 0x1e6   : > { %v906_v49 = vpop.f32.mrb[27].mxu0  ;;  %v946_v50 = vpop.f32.mrb[27].mxu1 }
 0x1e7   : > { %v4528_v44 = vpop.permute.xlu0 %4527 }
 0x1e8   : > { %5738 = vmatmul.mubr.msk.bf16.vlgmr.msra.gmra.mrb[132].mxu0 %vm233_vm1, %v3765_v43  ;;  %955 = vrot.lane.b32.xlu0 %v942_v45, %s6147_s30  ;;  %v6900_v45 = vpop.permute.xlu1 %5054 }
 0x1e9   : > { %5740 = vmatmul.mubr.msk.bf16.vlgmr.msra.gmra.mrb[132].mxu1 %vm233_vm1, %v3765_v43  ;;  %3879 = vmatpush1.bf16.msra.mxu0 %v6383_v14 }
 0x1ea   : > { %3920 = vmatpush1.bf16.msra.mxu1 %v6394_v16  ;;  %3910 = vmatprep.mubr.bf16.mxu0 %v6111_v4 }
 0x1eb   : > { %v1005_v53 = vpop.f32.mrb[28].mxu0  ;;  %v1046_v54 = vpop.f32.mrb[28].mxu1  ;;  %3951 = vmatprep.mubr.bf16.mxu1 %v6111_v4  ;;  %5745 = vmatprep.subr.msk.bf16.mxu0 %vm237_vm0, %v6380_v13 }
 0x1ec   : > { %v1007_v55 = vpop.f32.mrb[29].mxu0  ;;  %1055 = vrot.lane.b32.xlu1 %v1005_v53, %s6148_s23  ;;  %v1048_v56 = vpop.f32.mrb[29].mxu1  ;;  %5747 = vmatprep.subr.msk.bf16.mxu1 %vm237_vm0, %v6389_v15 }
 0x1ed   : > { %v1009_v57 = vpop.f32.mrb[30].mxu0  ;;  %1057 = vrot.lane.b32.xlu0 %v1007_v55, %s6148_s23  ;;  %v1049_v58 = vpop.f32.mrb[30].mxu1 }
 0x1ee   : > { %v1010_v59 = vpop.f32.mrb[31].mxu0  ;;  %v1050_v60 = vpop.f32.mrb[31].mxu1 }
 0x1ef   : > { %v4746_v53 = vpop.permute.xlu0 %4745 }
 0x1f0   : > { %5742 = vmatmul.mubr.msk.bf16.vlgmr.msra.gmra.mrb[136].mxu0 %vm233_vm1, %v3874_v51  ;;  %1059 = vrot.lane.b32.xlu1 %v1046_v54, %s6148_s23  ;;  %v6914_v54 = vpop.permute.xlu1 %5262  ;;  %s6159_s23 = smov 61  }
 0x1f1   : > { %5744 = vmatmul.mubr.msk.bf16.vlgmr.msra.gmra.mrb[136].mxu1 %vm233_vm1, %v3874_v51  ;;  %3988 = vmatpush1.bf16.msra.mxu0 %v6383_v14 }
 0x1f2   : > { %4029 = vmatpush1.bf16.msra.mxu1 %v6394_v16  ;;  %4019 = vmatprep.mubr.bf16.mxu0 %v6111_v4 }
 0x1f3   : > { %v1109_v62 = vpop.f32.mrb[32].mxu0  ;;  %v1150_v63 = vpop.f32.mrb[32].mxu1  ;;  %4060 = vmatprep.mubr.bf16.mxu1 %v6111_v4  ;;  %5749 = vmatprep.subr.msk.bf16.mxu0 %vm237_vm0, %v6380_v13 }
 0x1f4   : > { %v1111_v0 = vpop.f32.mrb[33].mxu0  ;;  %1159 = vrot.lane.b32.xlu0 %v1109_v62, %s6149_s4  ;;  %v1152_v1 = vpop.f32.mrb[33].mxu1  ;;  %5751 = vmatprep.subr.msk.bf16.mxu1 %vm237_vm0, %v6389_v15 }
 0x1f5   : > { %v1113_v2 = vpop.f32.mrb[34].mxu0  ;;  %1161 = vrot.lane.b32.xlu1 %v1111_v0, %s6149_s4  ;;  %v1153_v3 = vpop.f32.mrb[34].mxu1 }
 0x1f6   : > { %v1114_v5 = vpop.f32.mrb[35].mxu0  ;;  %v1154_v6 = vpop.f32.mrb[35].mxu1 }
 0x1f7   : > { %v6930_v0 = vpop.permute.xlu1 %5366 }
 0x1f8   : > { %5746 = vmatmul.mubr.msk.bf16.vlgmr.msra.gmra.mrb[140].mxu0 %vm233_vm1, %v3983_v52  ;;  %1163 = vrot.lane.b32.xlu0 %v1150_v63, %s6149_s4  ;;  %v6928_v63 = vpop.permute.xlu0 %4951  ;;  %s7530_s4 = smov 60  }
 0x1f9   : > { %5748 = vmatmul.mubr.msk.bf16.vlgmr.msra.gmra.mrb[140].mxu1 %vm233_vm1, %v3983_v52  ;;  %4097 = vmatpush1.bf16.msra.mxu0 %v6383_v14 }
 0x1fa   : > { %4138 = vmatpush1.bf16.msra.mxu1 %v6394_v16  ;;  %4128 = vmatprep.mubr.bf16.mxu0 %v6111_v4 }
 0x1fb   : > { %v1213_v9 = vpop.f32.mrb[36].mxu0  ;;  %v1254_v10 = vpop.f32.mrb[36].mxu1  ;;  %4169 = vmatprep.mubr.bf16.mxu1 %v6111_v4  ;;  %5753 = vmatprep.subr.msk.bf16.mxu0 %vm237_vm0, %v6380_v13 }
 0x1fc   : > { %v1215_v11 = vpop.f32.mrb[37].mxu0  ;;  %1263 = vrot.lane.b32.xlu1 %v1213_v9, %s6117_s28  ;;  %v1256_v12 = vpop.f32.mrb[37].mxu1  ;;  %5755 = vmatprep.subr.msk.bf16.mxu1 %vm237_vm0, %v6389_v15 }
 0x1fd   : > { %v1217_v17 = vpop.f32.mrb[38].mxu0  ;;  %1265 = vrot.lane.b32.xlu0 %v1215_v11, %s6117_s28  ;;  %v1257_v18 = vpop.f32.mrb[38].mxu1 }
 0x1fe   : > { %v1218_v20 = vpop.f32.mrb[39].mxu0  ;;  %v1258_v21 = vpop.f32.mrb[39].mxu1 }
 0x1ff   : > { %v6949_v11 = vpop.permute.xlu1 %5473 }
 0x200   : > { %5750 = vmatmul.mubr.msk.bf16.vlgmr.msra.gmra.mrb[144].mxu0 %vm233_vm1, %v4092_v7  ;;  %1267 = vrot.lane.b32.xlu1 %v1254_v10, %s6117_s28  ;;  %s6151_s28 = smov 102   ;;  %v6943_v10 = vpop.permute.xlu0 %5158  ;;  %7529 = vst [vmem:[#allocation12_spill] sm:$0xff] %v6949_v11 }
 0x201   : > { %5752 = vmatmul.mubr.msk.bf16.vlgmr.msra.gmra.mrb[144].mxu1 %vm233_vm1, %v4092_v7  ;;  %4206 = vmatpush1.bf16.msra.mxu0 %v6383_v14 }
 0x202   : > { %4247 = vmatpush1.bf16.msra.mxu1 %v6394_v16  ;;  %4237 = vmatprep.mubr.bf16.mxu0 %v6111_v4 }
 0x203   : > { %v1317_v23 = vpop.f32.mrb[40].mxu0  ;;  %v1358_v24 = vpop.f32.mrb[40].mxu1  ;;  %4278 = vmatprep.mubr.bf16.mxu1 %v6111_v4  ;;  %5757 = vmatprep.subr.msk.bf16.mxu0 %vm237_vm0, %v6380_v13 }
 0x204   : > { %v1319_v25 = vpop.f32.mrb[41].mxu0  ;;  %1367 = vrot.lane.b32.xlu0 %v1317_v23, %s6150_s5  ;;  %v1360_v26 = vpop.f32.mrb[41].mxu1  ;;  %5759 = vmatprep.subr.msk.bf16.mxu1 %vm237_vm0, %v6389_v15 }
 0x205   : > { %v1321_v27 = vpop.f32.mrb[42].mxu0  ;;  %1369 = vrot.lane.b32.xlu1 %v1319_v25, %s6150_s5  ;;  %v1361_v28 = vpop.f32.mrb[42].mxu1 }
 0x206   : > { %v1322_v29 = vpop.f32.mrb[43].mxu0  ;;  %v1362_v30 = vpop.f32.mrb[43].mxu1 }
 0x208   : > { %5754 = vmatmul.mubr.msk.bf16.vlgmr.msra.gmra.mrb[148].mxu0 %vm233_vm1, %v4201_v61  ;;  %1371 = vrot.lane.b32.xlu0 %v1358_v24, %s6150_s5  ;;  %s6160_s5 = smov 59  }
 0x209   : > { %5756 = vmatmul.mubr.msk.bf16.vlgmr.msra.gmra.mrb[148].mxu1 %vm233_vm1, %v4201_v61  ;;  %4315 = vmatpush1.bf16.msra.mxu0 %v6383_v14 }
 0x20a   : > { %4356 = vmatpush1.bf16.msra.mxu1 %v6394_v16  ;;  %4346 = vmatprep.mubr.bf16.mxu0 %v6111_v4 }
 0x20b   : > { %v1421_v35 = vpop.f32.mrb[44].mxu0  ;;  %v1462_v36 = vpop.f32.mrb[44].mxu1  ;;  %4387 = vmatprep.mubr.bf16.mxu1 %v6111_v4  ;;  %5761 = vmatprep.subr.msk.bf16.mxu0 %vm237_vm0, %v6380_v13 }
 0x20c   : > { %v1423_v38 = vpop.f32.mrb[45].mxu0  ;;  %1471 = vrot.lane.b32.xlu1 %v1421_v35, %s6151_s28  ;;  %v1464_v39 = vpop.f32.mrb[45].mxu1  ;;  %5763 = vmatprep.subr.msk.bf16.mxu1 %vm237_vm0, %v6389_v15 }
 0x20d   : > { %v1425_v40 = vpop.f32.mrb[46].mxu0  ;;  %1473 = vrot.lane.b32.xlu0 %v1423_v38, %s6151_s28  ;;  %v1465_v41 = vpop.f32.mrb[46].mxu1 }
 0x20e   : > { %v1426_v42 = vpop.f32.mrb[47].mxu0  ;;  %v1466_v43 = vpop.f32.mrb[47].mxu1 }
 0x210   : > { %5758 = vmatmul.mubr.msk.bf16.vlgmr.msra.gmra.mrb[152].mxu0 %vm233_vm1, %v4310_v31  ;;  %1475 = vrot.lane.b32.xlu1 %v1462_v36, %s6151_s28  ;;  %s6161_s28 = smov 58  }
 0x211   : > { %5760 = vmatmul.mubr.msk.bf16.vlgmr.msra.gmra.mrb[152].mxu1 %vm233_vm1, %v4310_v31  ;;  %4424 = vmatpush1.bf16.msra.mxu0 %v6383_v14 }
 0x212   : > { %4465 = vmatpush1.bf16.msra.mxu1 %v6394_v16  ;;  %4455 = vmatprep.mubr.bf16.mxu0 %v6111_v4 }
 0x213   : > { %v1525_v46 = vpop.f32.mrb[48].mxu0  ;;  %v1566_v47 = vpop.f32.mrb[48].mxu1  ;;  %4496 = vmatprep.mubr.bf16.mxu1 %v6111_v4  ;;  %5765 = vmatprep.subr.msk.bf16.mxu0 %vm237_vm0, %v6380_v13 }
 0x214   : > { %v1527_v19 = vpop.f32.mrb[49].mxu0  ;;  %1575 = vrot.lane.b32.xlu0 %v1525_v46, %s6152_s6  ;;  %v1568_v48 = vpop.f32.mrb[49].mxu1  ;;  %5767 = vmatprep.subr.msk.bf16.mxu1 %vm237_vm0, %v6389_v15 }
 0x215   : > { %v1529_v49 = vpop.f32.mrb[50].mxu0  ;;  %1577 = vrot.lane.b32.xlu1 %v1527_v19, %s6152_s6  ;;  %v1569_v50 = vpop.f32.mrb[50].mxu1 }
 0x216   : > { %v1530_v51 = vpop.f32.mrb[51].mxu0  ;;  %v1570_v52 = vpop.f32.mrb[51].mxu1 }
 0x218   : > { %5762 = vmatmul.mubr.msk.bf16.vlgmr.msra.gmra.mrb[156].mxu0 %vm233_vm1, %v6861_v8  ;;  %1579 = vrot.lane.b32.xlu0 %v1566_v47, %s6152_s6  ;;  %s6162_s6 = smov 57  }
 0x219   : > { %5764 = vmatmul.mubr.msk.bf16.vlgmr.msra.gmra.mrb[156].mxu1 %vm233_vm1, %v6861_v8  ;;  %4533 = vmatpush1.bf16.msra.mxu0 %v6383_v14 }
 0x21a   : > { %4574 = vmatpush1.bf16.msra.mxu1 %v6394_v16  ;;  %4564 = vmatprep.mubr.bf16.mxu0 %v6111_v4 }
 0x21b   : > { %v1629_v55 = vpop.f32.mrb[52].mxu0  ;;  %v1670_v56 = vpop.f32.mrb[52].mxu1  ;;  %4605 = vmatprep.mubr.bf16.mxu1 %v6111_v4  ;;  %5769 = vmatprep.subr.msk.bf16.mxu0 %vm237_vm0, %v6380_v13 }
 0x21c   : > { %v1631_v57 = vpop.f32.mrb[53].mxu0  ;;  %1679 = vrot.lane.b32.xlu1 %v1629_v55, %s6118_s22  ;;  %v1672_v58 = vpop.f32.mrb[53].mxu1  ;;  %5771 = vmatprep.subr.msk.bf16.mxu1 %vm237_vm0, %v6389_v15 }
 0x21d   : > { %v1633_v59 = vpop.f32.mrb[54].mxu0  ;;  %1681 = vrot.lane.b32.xlu0 %v1631_v57, %s6118_s22  ;;  %v1673_v60 = vpop.f32.mrb[54].mxu1 }
 0x21e   : > { %v1634_v61 = vpop.f32.mrb[55].mxu0  ;;  %v1674_v62 = vpop.f32.mrb[55].mxu1 }
 0x220   : > { %5766 = vmatmul.mubr.msk.bf16.vlgmr.msra.gmra.mrb[160].mxu0 %vm233_vm1, %v4528_v44  ;;  %1683 = vrot.lane.b32.xlu1 %v1670_v56, %s6118_s22  ;;  %s6153_s22 = smov 83  }
 0x221   : > { %5768 = vmatmul.mubr.msk.bf16.vlgmr.msra.gmra.mrb[160].mxu1 %vm233_vm1, %v4528_v44  ;;  %4642 = vmatpush1.bf16.msra.mxu0 %v6383_v14 }
 0x222   : > { %4683 = vmatpush1.bf16.msra.mxu1 %v6394_v16  ;;  %4673 = vmatprep.mubr.bf16.mxu0 %v6111_v4 }
 0x223   : > { %v1733_v1 = vpop.f32.mrb[56].mxu0  ;;  %v1774_v2 = vpop.f32.mrb[56].mxu1  ;;  %4714 = vmatprep.mubr.bf16.mxu1 %v6111_v4  ;;  %5773 = vmatprep.subr.msk.bf16.mxu0 %vm237_vm0, %v6380_v13 }
 0x224   : > { %v1735_v3 = vpop.f32.mrb[57].mxu0  ;;  %1785 = vrot.lane.b32.xlu0 %v1733_v1, %s7523_s20  ;;  %v1776_v5 = vpop.f32.mrb[57].mxu1  ;;  %5775 = vmatprep.subr.msk.bf16.mxu1 %vm237_vm0, %v6389_v15 }
 0x225   : > { %v1737_v6 = vpop.f32.mrb[58].mxu0  ;;  %1787 = vrot.lane.b32.xlu1 %v1735_v3, %s7523_s20  ;;  %v1778_v7 = vpop.f32.mrb[58].mxu1 }
 0x226   : > { %v1738_v8 = vpop.f32.mrb[59].mxu0  ;;  %v1779_v9 = vpop.f32.mrb[59].mxu1 }
 0x228   : > { %5770 = vmatmul.mubr.msk.bf16.vlgmr.msra.gmra.mrb[164].mxu0 %vm233_vm1, %v6876_v22  ;;  %1789 = vrot.lane.b32.xlu0 %v1774_v2, %s7523_s20 }
 0x229   : > { %5772 = vmatmul.mubr.msk.bf16.vlgmr.msra.gmra.mrb[164].mxu1 %vm233_vm1, %v6876_v22  ;;  %4751 = vmatpush1.bf16.msra.mxu0 %v6383_v14 }
 0x22a   : > { %1791 = vrot.lane.b32.xlu1 %v1776_v5, %s7523_s20  ;;  %4791 = vmatpush1.bf16.msra.mxu1 %v6394_v16  ;;  %s6154_s20 = smov 82  }
 0x22b   : > { %v1842_v12 = vpop.f32.mrb[60].mxu0  ;;  %v1883_v17 = vpop.f32.mrb[60].mxu1  ;;  %4782 = vmatprep.mubr.bf16.mxu0 %v6111_v4  ;;  %4822 = vmatprep.mubr.bf16.mxu1 %v6111_v4 }
 0x22c   : > { %v1844_v18 = vpop.f32.mrb[61].mxu0  ;;  %1894 = vrot.lane.b32.xlu0 %v1842_v12, %s6153_s22  ;;  %v1885_v20 = vpop.f32.mrb[61].mxu1  ;;  %5777 = vmatprep.subr.msk.bf16.mxu0 %vm237_vm0, %v6380_v13 }
 0x22d   : > { %v1846_v21 = vpop.f32.mrb[62].mxu0  ;;  %v1887_v22 = vpop.f32.mrb[62].mxu1  ;;  %5779 = vmatprep.subr.msk.bf16.mxu1 %vm237_vm0, %v6389_v15 }
 0x22e   : > { %1896 = vrot.lane.b32.xlu1 %v1844_v18, %s6153_s22  ;;  %v6958_v23 = vpop.permute.xlu0 %431  ;;  %v1847_v24 = vpop.f32.mrb[63].mxu0 }
 0x22f   : > { %v1888_v25 = vpop.f32.mrb[63].mxu1  ;;  %v6963_v26 = vpop.permute.xlu1 %435 }
 0x230   : > { %5774 = vmatmul.mubr.msk.bf16.vlgmr.msra.gmra.mrb[168].mxu0 %vm233_vm1, %v4746_v53  ;;  %1898 = vrot.lane.b32.xlu0 %v1883_v17, %s6153_s22 }
 0x231   : > { %5776 = vmatmul.mubr.msk.bf16.vlgmr.msra.gmra.mrb[168].mxu1 %vm233_vm1, %v4746_v53  ;;  %4854 = vmatpush1.bf16.msra.mxu0 %v6383_v14 }
 0x232   : > { %1900 = vrot.lane.b32.xlu1 %v1885_v20, %s6153_s22  ;;  %v6965_v27 = vpop.permute.xlu0 %433  ;;  %4894 = vmatpush1.bf16.msra.mxu1 %v6394_v16  ;;  %s7531_s22 = smov 56  }
 0x233   : > { %v1951_v28 = vpop.f32.mrb[64].mxu0  ;;  %v1992_v29 = vpop.f32.mrb[64].mxu1  ;;  %4885 = vmatprep.mubr.bf16.mxu0 %v6111_v4  ;;  %4925 = vmatprep.mubr.bf16.mxu1 %v6111_v4 }
 0x234   : > { %v1953_v30 = vpop.f32.mrb[65].mxu0  ;;  %2003 = vrot.lane.b32.xlu0 %v1951_v28, %s6154_s20  ;;  %v1994_v31 = vpop.f32.mrb[65].mxu1  ;;  %5781 = vmatprep.subr.msk.bf16.mxu0 %vm237_vm0, %v6380_v13 }
 0x235   : > { %v1955_v35 = vpop.f32.mrb[66].mxu0  ;;  %v1996_v36 = vpop.f32.mrb[66].mxu1  ;;  %5783 = vmatprep.subr.msk.bf16.mxu1 %vm237_vm0, %v6389_v15 }
 0x236   : > { %2005 = vrot.lane.b32.xlu1 %v1953_v30, %s6154_s20  ;;  %v6974_v38 = vpop.permute.xlu0 %535  ;;  %v1956_v39 = vpop.f32.mrb[67].mxu0 }
 0x237   : > { %v1997_v40 = vpop.f32.mrb[67].mxu1  ;;  %v6981_v41 = vpop.permute.xlu1 %537 }
 0x238   : > { %5778 = vmatmul.mubr.msk.bf16.vlgmr.msra.gmra.mrb[172].mxu0 %vm233_vm1, %v6888_v32  ;;  %2007 = vrot.lane.b32.xlu0 %v1992_v29, %s6154_s20 }
 0x239   : > { %5780 = vmatmul.mubr.msk.bf16.vlgmr.msra.gmra.mrb[172].mxu1 %vm233_vm1, %v6888_v32  ;;  %4957 = vmatpush1.bf16.msra.mxu0 %v6383_v14 }
 0x23a   : > { %2009 = vrot.lane.b32.xlu1 %v1994_v31, %s6154_s20  ;;  %v6983_v42 = vpop.permute.xlu0 %539  ;;  %4997 = vmatpush1.bf16.msra.mxu1 %v6394_v16  ;;  %s7532_s20 = smov 40  }
 0x23b   : > { %v2060_v43 = vpop.f32.mrb[68].mxu0  ;;  %v2101_v44 = vpop.f32.mrb[68].mxu1  ;;  %4988 = vmatprep.mubr.bf16.mxu0 %v6111_v4  ;;  %5028 = vmatprep.mubr.bf16.mxu1 %v6111_v4 }
 0x23c   : > { %v2062_v46 = vpop.f32.mrb[69].mxu0  ;;  %2112 = vrot.lane.b32.xlu0 %v2060_v43, %s6155_s9  ;;  %v2103_v47 = vpop.f32.mrb[69].mxu1  ;;  %5785 = vmatprep.subr.msk.bf16.mxu0 %vm237_vm0, %v6380_v13 }
 0x23d   : > { %v2064_v32 = vpop.f32.mrb[70].mxu0  ;;  %v2105_v19 = vpop.f32.mrb[70].mxu1  ;;  %5787 = vmatprep.subr.msk.bf16.mxu1 %vm237_vm0, %v6389_v15 }
 0x23e   : > { %2114 = vrot.lane.b32.xlu1 %v2062_v46, %s6155_s9  ;;  %v2065_v48 = vpop.f32.mrb[71].mxu0  ;;  %v6992_v49 = vpop.permute.xlu1 %639 }
 0x23f   : > { %v2106_v50 = vpop.f32.mrb[71].mxu1  ;;  %v6999_v51 = vpop.permute.xlu0 %641 }
 0x240   : > { %5782 = vmatmul.mubr.msk.bf16.vlgmr.msra.gmra.mrb[176].mxu0 %vm233_vm1, %v6928_v63  ;;  %2116 = vrot.lane.b32.xlu0 %v2101_v44, %s6155_s9 }
 0x241   : > { %5784 = vmatmul.mubr.msk.bf16.vlgmr.msra.gmra.mrb[176].mxu1 %vm233_vm1, %v6928_v63  ;;  %5060 = vmatpush1.bf16.msra.mxu0 %v6383_v14 }
 0x242   : > { %2118 = vrot.lane.b32.xlu1 %v2103_v47, %s6155_s9  ;;  %v7001_v52 = vpop.permute.xlu1 %643  ;;  %5100 = vmatpush1.bf16.msra.mxu1 %v6394_v16  ;;  %s6163_s9 = smov 39  }
 0x243   : > { %v2169_v53 = vpop.f32.mrb[72].mxu0  ;;  %v2210_v55 = vpop.f32.mrb[72].mxu1  ;;  %5091 = vmatprep.mubr.bf16.mxu0 %v6111_v4  ;;  %5131 = vmatprep.mubr.bf16.mxu1 %v6111_v4 }
 0x244   : > { %v2171_v56 = vpop.f32.mrb[73].mxu0  ;;  %2221 = vrot.lane.b32.xlu0 %v2169_v53, %s7524_s21  ;;  %v2212_v57 = vpop.f32.mrb[73].mxu1  ;;  %5789 = vmatprep.subr.msk.bf16.mxu0 %vm237_vm0, %v6380_v13 }
 0x245   : > { %v2173_v58 = vpop.f32.mrb[74].mxu0  ;;  %v2214_v59 = vpop.f32.mrb[74].mxu1  ;;  %5791 = vmatprep.subr.msk.bf16.mxu1 %vm237_vm0, %v6389_v15 }
 0x246   : > { %2223 = vrot.lane.b32.xlu1 %v2171_v56, %s7524_s21  ;;  %v2174_v60 = vpop.f32.mrb[75].mxu0  ;;  %v7012_v61 = vpop.permute.xlu0 %743 }
 0x247   : > { %v2215_v62 = vpop.f32.mrb[75].mxu1  ;;  %v7020_v63 = vpop.permute.xlu1 %745 }
 0x248   : > { %5786 = vmatmul.mubr.msk.bf16.vlgmr.msra.gmra.mrb[180].mxu0 %vm233_vm1, %v6900_v45  ;;  %2225 = vrot.lane.b32.xlu0 %v2210_v55, %s7524_s21 }
 0x249   : > { %5788 = vmatmul.mubr.msk.bf16.vlgmr.msra.gmra.mrb[180].mxu1 %vm233_vm1, %v6900_v45  ;;  %5164 = vmatpush1.bf16.msra.mxu0 %v6383_v14 }
 0x24a   : > { %2227 = vrot.lane.b32.xlu1 %v2212_v57, %s7524_s21  ;;  %v7023_v1 = vpop.permute.xlu0 %747  ;;  %5204 = vmatpush1.bf16.msra.mxu1 %v6394_v16  ;;  %s6157_s21 = smov 78  }
 0x24b   : > { %v2278_v2 = vpop.f32.mrb[76].mxu0  ;;  %v2319_v3 = vpop.f32.mrb[76].mxu1  ;;  %5195 = vmatprep.mubr.bf16.mxu0 %v6111_v4  ;;  %5235 = vmatprep.mubr.bf16.mxu1 %v6111_v4 }
 0x24c   : > { %v2280_v5 = vpop.f32.mrb[77].mxu0  ;;  %2330 = vrot.lane.b32.xlu0 %v2278_v2, %s6156_s29  ;;  %v2321_v45 = vpop.f32.mrb[77].mxu1  ;;  %5793 = vmatprep.subr.msk.bf16.mxu0 %vm237_vm0, %v6380_v13 }
 0x24d   : > { %v2282_v6 = vpop.f32.mrb[78].mxu0  ;;  %v2323_v7 = vpop.f32.mrb[78].mxu1  ;;  %5795 = vmatprep.subr.msk.bf16.mxu1 %vm237_vm0, %v6389_v15 }
 0x24e   : > { %2332 = vrot.lane.b32.xlu1 %v2280_v5, %s6156_s29  ;;  %v2283_v8 = vpop.f32.mrb[79].mxu0  ;;  %v7032_v9 = vpop.permute.xlu1 %847 }
 0x24f   : > { %v2324_v12 = vpop.f32.mrb[79].mxu1  ;;  %v7039_v17 = vpop.permute.xlu0 %849 }
 0x250   : > { %5790 = vmatmul.mubr.msk.bf16.vlgmr.msra.gmra.mrb[184].mxu0 %vm233_vm1, %v6943_v10  ;;  %2334 = vrot.lane.b32.xlu0 %v2319_v3, %s6156_s29 }
 0x251   : > { %5792 = vmatmul.mubr.msk.bf16.vlgmr.msra.gmra.mrb[184].mxu1 %vm233_vm1, %v6943_v10  ;;  %5268 = vmatpush1.bf16.msra.mxu0 %v6383_v14 }
 0x252   : > { %2336 = vrot.lane.b32.xlu1 %v2321_v45, %s6156_s29  ;;  %v7041_v18 = vpop.permute.xlu1 %851  ;;  %5308 = vmatpush1.bf16.msra.mxu1 %v6394_v16  ;;  %s6164_s29 = smov 38  }
 0x253   : > { %v2387_v20 = vpop.f32.mrb[80].mxu0  ;;  %v2428_v21 = vpop.f32.mrb[80].mxu1  ;;  %5299 = vmatprep.mubr.bf16.mxu0 %v6111_v4  ;;  %5339 = vmatprep.mubr.bf16.mxu1 %v6111_v4 }
 0x254   : > { %v2389_v22 = vpop.f32.mrb[81].mxu0  ;;  %2439 = vrot.lane.b32.xlu0 %v2387_v20, %s6157_s21  ;;  %v2430_v24 = vpop.f32.mrb[81].mxu1  ;;  %5797 = vmatprep.subr.msk.bf16.mxu0 %vm237_vm0, %v6380_v13 }
 0x255   : > { %v2391_v10 = vpop.f32.mrb[82].mxu0  ;;  %v2432_v25 = vpop.f32.mrb[82].mxu1  ;;  %5799 = vmatprep.subr.msk.bf16.mxu1 %vm237_vm0, %v6389_v15  ;;  %vm1902_vm0 = vcmask 678912  }
 0x256   : > { %2441 = vrot.lane.b32.xlu1 %v2389_v22, %s6157_s21  ;;  %v2392_v28 = vpop.f32.mrb[83].mxu0  ;;  %v7050_v29 = vpop.permute.xlu0 %951 }
 0x257   : > { %v2433_v30 = vpop.f32.mrb[83].mxu1  ;;  %v7057_v13 = vpop.permute.xlu1 %953 }
 0x258   : > { %5794 = vmatmul.mubr.msk.bf16.vlgmr.msra.gmra.mrb[188].mxu0 %vm233_vm1, %v6914_v54  ;;  %2443 = vrot.lane.b32.xlu0 %v2428_v21, %s6157_s21 }
 0x259   : > { %5796 = vmatmul.mubr.msk.bf16.vlgmr.msra.gmra.mrb[188].mxu1 %vm233_vm1, %v6914_v54  ;;  %5372 = vmatpush1.bf16.msra.mxu0 %v6383_v14 }
 0x25a   : > { %2445 = vrot.lane.b32.xlu1 %v2430_v24, %s6157_s21  ;;  %v7059_v31 = vpop.permute.xlu0 %955  ;;  %5412 = vmatpush1.bf16.msra.mxu1 %v6394_v16  ;;  %s6165_s21 = smov 37  }
 0x25b   : > { %v2496_v15 = vpop.f32.mrb[84].mxu0  ;;  %v2537_v35 = vpop.f32.mrb[84].mxu1  ;;  %5403 = vmatprep.mubr.bf16.mxu0 %v6111_v4  ;;  %5443 = vmatprep.mubr.bf16.mxu1 %v6111_v4 }
 0x25c   : > { %v2498_v36 = vpop.f32.mrb[85].mxu0  ;;  %2548 = vrot.lane.b32.xlu0 %v2496_v15, %s6158_s10  ;;  %v2539_v39 = vpop.f32.mrb[85].mxu1 }
 0x25d   : > { %v2500_v54 = vpop.f32.mrb[86].mxu0  ;;  %v2541_v40 = vpop.f32.mrb[86].mxu1 }
 0x25e   : > { %2550 = vrot.lane.b32.xlu1 %v2498_v36, %s6158_s10  ;;  %v2501_v14 = vpop.f32.mrb[87].mxu0  ;;  %v7064_v43 = vpop.permute.xlu1 %1055 }
 0x25f   : > { %v2542_v44 = vpop.f32.mrb[87].mxu1  ;;  %v7070_v16 = vpop.permute.xlu0 %1057 }
 0x260   : > { %5798 = vmatmul.mubr.msk.bf16.vlgmr.msra.gmra.mrb[192].mxu0 %vm233_vm1, %v6930_v0  ;;  %2552 = vrot.lane.b32.xlu0 %v2537_v35, %s6158_s10 }
 0x261   : > { %5800 = vmatmul.mubr.msk.bf16.vlgmr.msra.gmra.mrb[192].mxu1 %vm233_vm1, %v6930_v0  ;;  %vm2011_vm1 = vcmask 670720  }
 0x262   : > { %2554 = vrot.lane.b32.xlu1 %v2539_v39, %s6158_s10  ;;  %v7072_v4 = vpop.permute.xlu1 %1059  ;;  %s7538_s10 = smov 36  }
 0x263   : > { %v2605_v46 = vpop.f32.mrb[88].mxu0  ;;  %v2646_v47 = vpop.f32.mrb[88].mxu1 }
 0x264   : > { %v2607_v32 = vpop.f32.mrb[89].mxu0  ;;  %2657 = vrot.lane.b32.xlu0 %v2605_v46, %s6159_s23  ;;  %v2648_v19 = vpop.f32.mrb[89].mxu1 }
 0x265   : > { %v2609_v48 = vpop.f32.mrb[90].mxu0  ;;  %v2650_v50 = vpop.f32.mrb[90].mxu1 }
 0x266   : > { %2659 = vrot.lane.b32.xlu1 %v2607_v32, %s6159_s23  ;;  %v2610_v53 = vpop.f32.mrb[91].mxu0  ;;  %v7074_v55 = vpop.permute.xlu0 %1159 }
 0x267   : > { %v2651_v56 = vpop.f32.mrb[91].mxu1  ;;  %v7076_v0 = vpop.permute.xlu1 %1161 }
 0x268   : > { %2661 = vrot.lane.b32.xlu0 %v2646_v47, %s6159_s23 }
 0x26a   : > { %2663 = vrot.lane.b32.xlu1 %v2648_v19, %s6159_s23  ;;  %v7078_v57 = vpop.permute.xlu0 %1163  ;;  %s6166_s23 = smov 35  }
 0x26b   : > { %v2714_v58 = vpop.f32.mrb[92].mxu0  ;;  %v2755_v59 = vpop.f32.mrb[92].mxu1 }
 0x26c   : > { %v2716_v60 = vpop.f32.mrb[93].mxu0  ;;  %2766 = vrot.lane.b32.xlu0 %v2714_v58, %s7530_s4  ;;  %v2757_v62 = vpop.f32.mrb[93].mxu1 }
 0x26d   : > { %v2718_v2 = vpop.f32.mrb[94].mxu0  ;;  %v2759_v3 = vpop.f32.mrb[94].mxu1 }
 0x26e   : > { %2768 = vrot.lane.b32.xlu1 %v2716_v60, %s7530_s4  ;;  %v2719_v5 = vpop.f32.mrb[95].mxu0  ;;  %v7082_v45 = vpop.permute.xlu1 %1263 }
 0x26f   : > { %v2760_v6 = vpop.f32.mrb[95].mxu1  ;;  %v7085_v7 = vpop.permute.xlu0 %1265 }
 0x270   : > { %2770 = vrot.lane.b32.xlu0 %v2755_v59, %s7530_s4 }
 0x272   : > { %2772 = vrot.lane.b32.xlu1 %v2757_v62, %s7530_s4  ;;  %v7088_v8 = vpop.permute.xlu1 %1267  ;;  %s6167_s4 = smov 34  }
 0x273   : > { %v2823_v12 = vpop.f32.mrb[96].mxu0  ;;  %v2864_v20 = vpop.f32.mrb[96].mxu1 }
 0x274   : > { %v2825_v21 = vpop.f32.mrb[97].mxu0  ;;  %2875 = vrot.lane.b32.xlu0 %v2823_v12, %s6160_s5  ;;  %v2866_v22 = vpop.f32.mrb[97].mxu1 }
 0x275   : > { %v2827_v24 = vpop.f32.mrb[98].mxu0  ;;  %v2868_v10 = vpop.f32.mrb[98].mxu1 }
 0x276   : > { %2877 = vrot.lane.b32.xlu1 %v2825_v21, %s6160_s5  ;;  %v2828_v25 = vpop.f32.mrb[99].mxu0  ;;  %v7090_v28 = vpop.permute.xlu0 %1367 }
 0x277   : > { %v2869_v30 = vpop.f32.mrb[99].mxu1  ;;  %v7092_v15 = vpop.permute.xlu1 %1369 }
 0x278   : > { %2879 = vrot.lane.b32.xlu0 %v2864_v20, %s6160_s5 }
 0x27a   : > { %2881 = vrot.lane.b32.xlu1 %v2866_v22, %s6160_s5  ;;  %v7094_v35 = vpop.permute.xlu0 %1371  ;;  %s6168_s5 = smov 18  }
 0x27b   : > { %v2932_v36 = vpop.f32.mrb[100].mxu0  ;;  %v2973_v39 = vpop.f32.mrb[100].mxu1 }
 0x27c   : > { %v2934_v54 = vpop.f32.mrb[101].mxu0  ;;  %2984 = vrot.lane.b32.xlu0 %v2932_v36, %s6161_s28  ;;  %v2975_v40 = vpop.f32.mrb[101].mxu1 }
 0x27d   : > { %v2936_v14 = vpop.f32.mrb[102].mxu0  ;;  %v2977_v44 = vpop.f32.mrb[102].mxu1 }
 0x27e   : > { %2986 = vrot.lane.b32.xlu1 %v2934_v54, %s6161_s28  ;;  %v2937_v46 = vpop.f32.mrb[103].mxu0  ;;  %v7096_v47 = vpop.permute.xlu1 %1471 }
 0x27f   : > { %v2978_v32 = vpop.f32.mrb[103].mxu1  ;;  %v7098_v19 = vpop.permute.xlu0 %1473 }
 0x280   : > { %2988 = vrot.lane.b32.xlu0 %v2973_v39, %s6161_s28 }
 0x282   : > { %2990 = vrot.lane.b32.xlu1 %v2975_v40, %s6161_s28  ;;  %v7100_v48 = vpop.permute.xlu1 %1475  ;;  %s6169_s28 = smov 17  }
 0x283   : > { %v3041_v50 = vpop.f32.mrb[104].mxu0  ;;  %v3082_v53 = vpop.f32.mrb[104].mxu1 }
 0x284   : > { %v3043_v56 = vpop.f32.mrb[105].mxu0  ;;  %3093 = vrot.lane.b32.xlu0 %v3041_v50, %s6162_s6  ;;  %v3084_v58 = vpop.f32.mrb[105].mxu1 }
 0x285   : > { %v3045_v59 = vpop.f32.mrb[106].mxu0  ;;  %v3086_v60 = vpop.f32.mrb[106].mxu1 }
 0x286   : > { %3095 = vrot.lane.b32.xlu1 %v3043_v56, %s6162_s6  ;;  %v3046_v62 = vpop.f32.mrb[107].mxu0  ;;  %v7102_v2 = vpop.permute.xlu0 %1575 }
 0x287   : > { %v3087_v3 = vpop.f32.mrb[107].mxu1  ;;  %v7104_v5 = vpop.permute.xlu1 %1577 }
 0x288   : > { %3097 = vrot.lane.b32.xlu0 %v3082_v53, %s6162_s6 }
 0x28a   : > { %3099 = vrot.lane.b32.xlu1 %v3084_v58, %s6162_s6  ;;  %v7106_v6 = vpop.permute.xlu0 %1579  ;;  %s6170_s6 = smov 15  }
 0x28b   : > { %v3150_v12 = vpop.f32.mrb[108].mxu0  ;;  %v3191_v20 = vpop.f32.mrb[108].mxu1 }
 0x28c   : > { %v3152_v21 = vpop.f32.mrb[109].mxu0  ;;  %3202 = vrot.lane.b32.xlu0 %v3150_v12, %s7531_s22  ;;  %v3193_v22 = vpop.f32.mrb[109].mxu1 }
 0x28d   : > { %v3154_v24 = vpop.f32.mrb[110].mxu0  ;;  %v3195_v10 = vpop.f32.mrb[110].mxu1 }
 0x28e   : > { %3204 = vrot.lane.b32.xlu1 %v3152_v21, %s7531_s22  ;;  %v3155_v25 = vpop.f32.mrb[111].mxu0  ;;  %v7110_v30 = vpop.permute.xlu1 %1679 }
 0x28f   : > { %v3196_v36 = vpop.f32.mrb[111].mxu1  ;;  %v7116_v54 = vpop.permute.xlu0 %1681 }
 0x290   : > { %3206 = vrot.lane.b32.xlu0 %v3191_v20, %s7531_s22 }
 0x292   : > { %3208 = vrot.lane.b32.xlu1 %v3193_v22, %s7531_s22  ;;  %v7114_v39 = vpop.permute.xlu1 %1683  ;;  %s6172_s22 = smov 13  }
 0x293   : > { %v3259_v40 = vpop.f32.mrb[112].mxu0 }
 0x294   : > { %v3300_v14 = vpop.f32.mrb[112].mxu1  ;;  %v3261_v44 = vpop.f32.mrb[113].mxu0  ;;  %3311 = vrot.lane.b32.xlu0 %v3259_v40, %s7532_s20 }
 0x295   : > { %v3302_v46 = vpop.f32.mrb[113].mxu1  ;;  %v3263_v32 = vpop.f32.mrb[114].mxu0 }
 0x296   : > { %3313 = vrot.lane.b32.xlu1 %v3261_v44, %s7532_s20  ;;  %v3304_v50 = vpop.f32.mrb[114].mxu1  ;;  %v3264_v53 = vpop.f32.mrb[115].mxu0 }
 0x297   : > { %v7120_v56 = vpop.permute.xlu0 %1785  ;;  %v3305_v58 = vpop.f32.mrb[115].mxu1 }
 0x298   : > { %v7122_v59 = vpop.permute.xlu1 %1787  ;;  %3315 = vrot.lane.b32.xlu0 %v3300_v14, %s7532_s20 }
 0x29a   : > { %3317 = vrot.lane.b32.xlu1 %v3302_v46, %s7532_s20 }
 0x29b   : > { %v7126_v60 = vpop.permute.xlu0 %1789  ;;  %v3368_v62 = vpop.f32.mrb[116].mxu0 }
 0x29c   : > { %v7128_v3 = vpop.permute.xlu1 %1791  ;;  %v3409_v12 = vpop.f32.mrb[116].mxu1  ;;  %3420 = vrot.lane.b32.xlu0 %v3368_v62, %s6163_s9 }
 0x29d   : > { %v3370_v20 = vpop.f32.mrb[117].mxu0  ;;  %v3411_v21 = vpop.f32.mrb[117].mxu1 }
 0x29e   : > { %v3372_v22 = vpop.f32.mrb[118].mxu0  ;;  %3422 = vrot.lane.b32.xlu1 %v3370_v20, %s6163_s9  ;;  %v3413_v24 = vpop.f32.mrb[118].mxu1 }
 0x29f   : > { %v3373_v10 = vpop.f32.mrb[119].mxu0  ;;  %v7130_v25 = vpop.permute.xlu0 %1894 }
 0x2a0   : > { %v3414_v36 = vpop.f32.mrb[119].mxu1  ;;  %v7132_v40 = vpop.permute.xlu1 %1896  ;;  %3424 = vrot.lane.b32.xlu0 %v3409_v12, %s6163_s9 }
 0x2a2   : > { %3426 = vrot.lane.b32.xlu1 %v3411_v21, %s6163_s9 }
 0x2a3   : > { %v7134_v14 = vpop.permute.xlu0 %1898  ;;  %v3477_v44 = vpop.f32.mrb[120].mxu0 }
 0x2a4   : > { %v7136_v46 = vpop.permute.xlu1 %1900  ;;  %v3518_v32 = vpop.f32.mrb[120].mxu1  ;;  %3529 = vrot.lane.b32.xlu0 %v3477_v44, %s6164_s29 }
 0x2a5   : > { %v3479_v50 = vpop.f32.mrb[121].mxu0  ;;  %v3520_v53 = vpop.f32.mrb[121].mxu1 }
 0x2a6   : > { %v3481_v58 = vpop.f32.mrb[122].mxu0  ;;  %3531 = vrot.lane.b32.xlu1 %v3479_v50, %s6164_s29  ;;  %v3522_v62 = vpop.f32.mrb[122].mxu1 }
 0x2a7   : > { %v3482_v20 = vpop.f32.mrb[123].mxu0  ;;  %v7138_v22 = vpop.permute.xlu0 %2003 }
 0x2a8   : > { %7533 = vst [vmem:[#allocation13_spill] sm:$0xff] %v7138_v22  ;;  %v3523_v24 = vpop.f32.mrb[123].mxu1  ;;  %v7140_v10 = vpop.permute.xlu1 %2005  ;;  %3533 = vrot.lane.b32.xlu0 %v3518_v32, %s6164_s29 }
 0x2a9   : > { %7534 = vst [vmem:[#allocation14_spill] sm:$0xff] %v7140_v10 }
 0x2aa   : > { %3535 = vrot.lane.b32.xlu1 %v3520_v53, %s6164_s29  ;;  %v438_v53 = vsel %vm437_vm2, %v6958_v23, %v6965_v27  ;;  %v439_v23 = vsel %vm437_vm2, %v6965_v27, %v6963_v26  ;;  %vm2120_vm2 = vcmask 662528  }
 0x2ab   : > { %v7142_v12 = vpop.permute.xlu0 %2007  ;;  %v3586_v21 = vpop.f32.mrb[124].mxu0 }
 0x2ac   : > { %v7144_v36 = vpop.permute.xlu1 %2009  ;;  %v3627_v11 = vpop.f32.mrb[124].mxu1  ;;  %3638 = vrot.lane.b32.xlu0 %v3586_v21, %s6165_s21 }
 0x2ad   : > { %v3588_v44 = vpop.f32.mrb[125].mxu0  ;;  %v3629_v58 = vpop.f32.mrb[125].mxu1 }
 0x2ae   : > { %v3590_v50 = vpop.f32.mrb[126].mxu0  ;;  %3640 = vrot.lane.b32.xlu1 %v3588_v44, %s6165_s21  ;;  %v3631_v62 = vpop.f32.mrb[126].mxu1  ;;  %v445_v44 = vadd.f32 %v6963_v26, %v6637_v37  ;;  %v543_v26 = vsel %vm541_vm3, %v6981_v41, %v6983_v42 }
 0x2af   : > { %v3591_v20 = vpop.f32.mrb[127].mxu0  ;;  %v7146_v22 = vpop.permute.xlu0 %2112 }
 0x2b0   : > { %7535 = vst [vmem:[#allocation15_spill] sm:$0xff] %v7146_v22  ;;  %v3632_v24 = vpop.f32.mrb[127].mxu1  ;;  %v7148_v32 = vpop.permute.xlu1 %2114  ;;  %3642 = vrot.lane.b32.xlu0 %v3627_v11, %s6165_s21  ;;  %v542_v11 = vsel %vm541_vm3, %v6974_v38, %v6981_v41  ;;  %v549_v37 = vadd.f32 %v6983_v42, %v445_v44  ;;  %vm2229_vm3 = vcmask 654336  }
 0x2b1   : > { %7536 = vst [vmem:[#allocation16_spill] sm:$0xff] %v7148_v32  ;;  %v443_v24 = vadd.f32 %v438_v53, %v6629_v33 }
 0x2b2   : > { %3644 = vrot.lane.b32.xlu1 %v3629_v58, %s6165_s21  ;;  %v653_v33 = vadd.f32 %v7001_v52, %v549_v37 }
 0x2b3   : > { %v7153_v21 = vpop.permute.xlu0 %2116  ;;  %v3694_v10 = vpop.f32.mrb[128].mxu0 }
 0x2b4   : > { %7537 = vst [vmem:[#allocation17_spill] sm:$0xff] %v7153_v21  ;;  %v7157_v50 = vpop.permute.xlu1 %2118  ;;  %v3696_v62 = vpop.f32.mrb[129].mxu0  ;;  %3746 = vrot.lane.b32.xlu0 %v3694_v10, %s7538_s10  ;;  %v646_v10 = vsel %vm645_vm4, %v6992_v49, %v6999_v51  ;;  %v547_v21 = vadd.f32 %v542_v11, %v443_v24  ;;  %v750_v49 = vsel %vm749_vm5, %v7012_v61, %v7020_v63 }
 0x2b5   : > { %v3735_v58 = vpop.f32.mrb[128].mxu1  ;;  %v3698_v20 = vpop.f32.mrb[130].mxu0  ;;  %v757_v41 = vadd.f32 %v7023_v1, %v653_v33  ;;  %v854_v11 = vsel %vm853_vm6, %v7032_v9, %v7039_v17  ;;  %v751_v61 = vsel %vm749_vm5, %v7020_v63, %v7023_v1  ;;  %v958_v9 = vsel %vm957_vm7, %v7050_v29, %v7057_v13 }
 0x2b6   : > { %3748 = vrot.lane.b32.xlu1 %v3696_v62, %s7538_s10  ;;  %v3737_v22 = vpop.f32.mrb[129].mxu1  ;;  %v3699_v32 = vpop.f32.mrb[131].mxu0  ;;  %v651_v44 = vadd.f32 %v646_v10, %v547_v21  ;;  %v647_v62 = vsel %vm645_vm4, %v6999_v51, %v7001_v52  ;;  %v855_v63 = vsel %vm853_vm6, %v7039_v17, %v7041_v18  ;;  %vm2338_vm4 = vcmask 646144  }
 0x2b7   : > { %v7172_v38 = vpop.permute.xlu0 %2221  ;;  %v3739_v20 = vpop.f32.mrb[130].mxu1  ;;  %v444_v32 = vadd.f32 %v439_v23, %v6631_v34  ;;  %v861_v51 = vadd.f32 %v7041_v18, %v757_v41 }
 0x2b8   : > { %v7178_v27 = vpop.permute.xlu1 %2223  ;;  %v3740_v53 = vpop.f32.mrb[131].mxu1  ;;  %3750 = vrot.lane.b32.xlu0 %v3735_v58, %s7538_s10  ;;  %v755_v23 = vadd.f32 %v750_v49, %v651_v44  ;;  %v959_v44 = vsel %vm957_vm7, %v7057_v13, %v7059_v31 }
 0x2b9   : > { %v548_v42 = vadd.f32 %v543_v26, %v444_v32  ;;  %v965_v1 = vadd.f32 %v7059_v31, %v861_v51  ;;  %v1062_v53 = vsel %vm1061_vm8, %v7064_v43, %v7070_v16  ;;  %v1166_v43 = vsel %vm1165_vm9, %v7074_v55, %v7076_v0 }
 0x2ba   : > { %3752 = vrot.lane.b32.xlu1 %v3737_v22, %s7538_s10  ;;  %v859_v10 = vadd.f32 %v854_v11, %v755_v23  ;;  %v1063_v11 = vsel %vm1061_vm8, %v7070_v16, %v7072_v4  ;;  %v1270_v31 = vsel %vm1269_vm10, %v7082_v45, %v7085_v7  ;;  %v1167_v55 = vsel %vm1165_vm9, %v7076_v0, %v7078_v57 }
 0x2bb   : > { %v7193_v34 = vpop.permute.xlu0 %2225  ;;  %v3803_v58 = vpop.f32.mrb[132].mxu0  ;;  %v652_v22 = vadd.f32 %v647_v62, %v548_v42  ;;  %v1069_v17 = vadd.f32 %v7072_v4, %v965_v1  ;;  %v1374_v45 = vsel %vm1373_vm11, %v7090_v28, %v7092_v15  ;;  %v1271_v0 = vsel %vm1269_vm10, %v7085_v7, %v7088_v8 }
 0x2bc   : > { %v7199_v52 = vpop.permute.xlu1 %2227  ;;  %v3844_v21 = vpop.f32.mrb[132].mxu1  ;;  %3855 = vrot.lane.b32.xlu0 %v3803_v58, %s6166_s23  ;;  %v963_v49 = vadd.f32 %v958_v9, %v859_v10  ;;  %vm2447_vm8 = vcmask 637952   ;;  %vm2556_vm9 = vcmask 506880   ;;  %vm2665_vm10 = vcmask 498688  }
 0x2bd   : > { %v3805_v24 = vpop.f32.mrb[133].mxu0  ;;  %v3846_v37 = vpop.f32.mrb[133].mxu1  ;;  %v756_v33 = vadd.f32 %v751_v61, %v652_v22  ;;  %v1173_v58 = vadd.f32 %v7078_v57, %v1069_v17  ;;  %v1479_v17 = vsel %vm1477_vm12, %v7098_v19, %v7100_v48 }
 0x2be   : > { %v3807_v20 = vpop.f32.mrb[134].mxu0  ;;  %3857 = vrot.lane.b32.xlu1 %v3805_v24, %s6166_s23  ;;  %v3848_v26 = vpop.f32.mrb[134].mxu1  ;;  %v1067_v42 = vadd.f32 %v1062_v53, %v963_v49  ;;  %v1375_v53 = vsel %vm1373_vm11, %v7092_v15, %v7094_v35  ;;  %vm2774_vm11 = vcmask 490496  }
 0x2bf   : > { %v3808_v32 = vpop.f32.mrb[135].mxu0  ;;  %v7211_v29 = vpop.permute.xlu0 %2330  ;;  %v860_v41 = vadd.f32 %v855_v63, %v756_v33  ;;  %v1478_v20 = vsel %vm1477_vm12, %v7096_v47, %v7098_v19  ;;  %v1582_v47 = vsel %vm1581_vm13, %v7102_v2, %v7104_v5  ;;  %v1583_v19 = vsel %vm1581_vm13, %v7104_v5, %v7106_v6 }
 0x2c0   : > { %v3849_v18 = vpop.f32.mrb[135].mxu1  ;;  %v7217_v62 = vpop.permute.xlu1 %2332  ;;  %3859 = vrot.lane.b32.xlu0 %v3844_v21, %s6166_s23  ;;  %v1171_v51 = vadd.f32 %v1166_v43, %v1067_v42  ;;  %v1277_v21 = vadd.f32 %v7088_v8, %v1173_v58  ;;  %vm2883_vm12 = vcmask 482304   ;;  %vm2992_vm13 = vcmask 474112  }
 0x2c1   : > { %v964_v13 = vadd.f32 %v959_v44, %v860_v41  ;;  %v1796_v41 = vsel %vm1793_vm15, %v7126_v60, %v7128_v3  ;;  %v1794_v3 = vsel %vm1793_vm15, %v7120_v56, %v7122_v59  ;;  %v1903_v56 = vsel %vm1902_vm0, %v7130_v25, %v7132_v40 }
 0x2c2   : > { %3861 = vrot.lane.b32.xlu1 %v3846_v37, %s6166_s23  ;;  %v1275_v37 = vadd.f32 %v1270_v31, %v1171_v51  ;;  %v1381_v57 = vadd.f32 %v7094_v35, %v1277_v21  ;;  %v1686_v35 = vsel %vm1685_vm14, %v7110_v30, %v7116_v54  ;;  %s5490_s23 = scalar_lea.sflag [#allocation4], %s6362_s17 }
 0x2c3   : > { %v7229_v23 = vpop.permute.xlu0 %2334  ;;  %v3912_v61 = vpop.f32.mrb[136].mxu0  ;;  %v1068_v22 = vadd.f32 %v1063_v11, %v964_v13  ;;  %v1905_v13 = vsel %vm1902_vm0, %v7134_v14, %v7136_v46  ;;  %v2014_v46 = vsel %vm2011_vm1, %v7142_v12, %v7144_v36 }
 0x2c4   : > { %v7235_v16 = vpop.permute.xlu1 %2336  ;;  %v3953_v4 = vpop.f32.mrb[136].mxu1  ;;  %3964 = vrot.lane.b32.xlu0 %v3912_v61, %s6167_s4  ;;  %v1379_v33 = vadd.f32 %v1374_v45, %v1275_v37  ;;  %v1485_v7 = vadd.f32 %v7100_v48, %v1381_v57  ;;  %v1687_v61 = vsel %vm1685_vm14, %v7116_v54, %v7114_v39  ;;  %v7540_v57 = vld [vmem:[#allocation13_spill] sm:$0xff]  ;;  %vm3101_vm14 = vcmask 465920  }
 0x2c5   : > { %v3914_v9 = vpop.f32.mrb[137].mxu0  ;;  %v3955_v24 = vpop.f32.mrb[137].mxu1  ;;  %v1172_v1 = vadd.f32 %v1167_v55, %v1068_v22 }
 0x2c6   : > { %v3916_v10 = vpop.f32.mrb[138].mxu0  ;;  %3966 = vrot.lane.b32.xlu1 %v3914_v9, %s6167_s4  ;;  %v3957_v63 = vpop.f32.mrb[138].mxu1  ;;  %v1483_v44 = vadd.f32 %v1478_v20, %v1379_v33  ;;  %v1589_v18 = vadd.f32 %v7106_v6, %v1485_v7  ;;  %v7543_v33 = vld [vmem:[#allocation15_spill] sm:$0xff]  ;;  %v2232_v7 = vsel %vm2229_vm3, %v7193_v34, %v7199_v52  ;;  %v2341_v52 = vsel %vm2338_vm4, %v7229_v23, %v7235_v16 }
 0x2c7   : > { %v3917_v26 = vpop.f32.mrb[139].mxu0  ;;  %v7247_v28 = vpop.permute.xlu0 %2439  ;;  %v1276_v49 = vadd.f32 %v1271_v0, %v1172_v1  ;;  %v7539_v0 = vld [vmem:[#allocation14_spill] sm:$0xff]  ;;  %v7541_v10 = vld [vmem:[#allocation17_spill] sm:$0xff] }
 0x2c8   : > { %v3958_v8 = vpop.f32.mrb[139].mxu1  ;;  %v7253_v32 = vpop.permute.xlu1 %2441  ;;  %3968 = vrot.lane.b32.xlu0 %v3953_v4, %s6167_s4  ;;  %v1587_v42 = vadd.f32 %v1582_v47, %v1483_v44  ;;  %v1693_v48 = vadd.f32 %v7114_v39, %v1589_v18  ;;  %v1795_v39 = vsel %vm1793_vm15, %v7122_v59, %v7126_v60  ;;  %v2012_v36 = vsel %vm2011_vm1, %v7540_v57, %v7539_v0  ;;  %v7542_v26 = vld [vmem:[#allocation16_spill] sm:$0xff] }
 0x2c9   : > { %v1380_v15 = vadd.f32 %v1375_v53, %v1276_v49  ;;  %v2123_v63 = vsel %vm2120_vm2, %v7541_v10, %v7157_v50  ;;  %v1904_v59 = vsel %vm1902_vm0, %v7132_v40, %v7134_v14  ;;  %v2121_v53 = vsel %vm2120_vm2, %v7543_v33, %v7542_v26 }
 0x2ca   : > { %3970 = vrot.lane.b32.xlu1 %v3955_v24, %s6167_s4  ;;  %v1691_v6 = vadd.f32 %v1686_v35, %v1587_v42  ;;  %v1802_v51 = vadd.f32 %v1796_v41, %v1693_v48  ;;  %v2013_v40 = vsel %vm2011_vm1, %v7539_v0, %v7142_v12  ;;  %v2230_v18 = vsel %vm2229_vm3, %v7172_v38, %v7178_v27  ;;  %s6176_s4 = smov [#allocation8]  }
 0x2cb   : > { %v7268_v43 = vpop.permute.xlu0 %2443  ;;  %v4021_v2 = vpop.f32.mrb[140].mxu0  ;;  %v1484_v30 = vadd.f32 %v1479_v17, %v1380_v15  ;;  %v2122_v12 = vsel %vm2120_vm2, %v7542_v26, %v7541_v10  ;;  %v2339_v38 = vsel %vm2338_vm4, %v7211_v29, %v7217_v62  ;;  %v2448_v29 = vsel %vm2447_vm8, %v7247_v28, %v7253_v32 }
 0x2cc   : > { %v7274_v11 = vpop.permute.xlu1 %2445  ;;  %v4062_v58 = vpop.f32.mrb[140].mxu1  ;;  %4073 = vrot.lane.b32.xlu0 %v4021_v2, %s6168_s5  ;;  %v1800_v9 = vadd.f32 %v1794_v3, %v1691_v6  ;;  %v1911_v54 = vadd.f32 %v1905_v13, %v1802_v51  ;;  %v2231_v13 = vsel %vm2229_vm3, %v7178_v27, %v7193_v34  ;;  %v2449_v28 = vsel %vm2447_vm8, %v7253_v32, %v7268_v43 }
 0x2cd   : > { %v4023_v31 = vpop.f32.mrb[141].mxu0  ;;  %v4064_v5 = vpop.f32.mrb[141].mxu1  ;;  %v1588_v4 = vadd.f32 %v1583_v19, %v1484_v30  ;;  %v2450_v16 = vsel %vm2447_vm8, %v7268_v43, %v7274_v11  ;;  %vm3210_vm15 = vcmask 457728   ;;  %vm3319_vm0 = vcmask 326656  }
 0x2ce   : > { %v4025_v55 = vpop.f32.mrb[142].mxu0  ;;  %4075 = vrot.lane.b32.xlu1 %v4023_v31, %s6168_s5  ;;  %v4066_v21 = vpop.f32.mrb[142].mxu1  ;;  %v1909_v1 = vadd.f32 %v1903_v56, %v1800_v9  ;;  %v2020_v60 = vadd.f32 %v2014_v46, %v1911_v54  ;;  %vm3428_vm1 = vcmask 318464   ;;  %vm3537_vm2 = vcmask 310272  }
 0x2cf   : > { %v4026_v22 = vpop.f32.mrb[143].mxu0  ;;  %v7293_v45 = vpop.permute.xlu0 %2548  ;;  %v1692_v25 = vadd.f32 %v1687_v61, %v1588_v4  ;;  %v2340_v55 = vsel %vm2338_vm4, %v7217_v62, %v7229_v23  ;;  %vm3646_vm3 = vcmask 302080   ;;  %vm3754_vm4 = vcmask 293888  }
 0x2d0   : > { %v4067_v24 = vpop.f32.mrb[143].mxu1  ;;  %v7298_v37 = vpop.permute.xlu1 %2550  ;;  %4077 = vrot.lane.b32.xlu0 %v4062_v58, %s6168_s5  ;;  %v2018_v49 = vadd.f32 %v2012_v36, %v1909_v1  ;;  %v2129_v14 = vadd.f32 %v2123_v63, %v2020_v60  ;;  %vm3863_vm8 = vcmask 285696  }
 0x2d1   : > { %v1801_v20 = vadd.f32 %v1795_v39, %v1692_v25  ;;  %v2557_v34 = vsel %vm2556_vm9, %v7293_v45, %v7298_v37 }
 0x2d2   : > { %4079 = vrot.lane.b32.xlu1 %v4064_v5, %s6168_s5  ;;  %v2127_v41 = vadd.f32 %v2121_v53, %v2018_v49  ;;  %v2238_v2 = vadd.f32 %v2232_v7, %v2129_v14  ;;  %s6039_s5 = sshll.u32 %s6176_s4, 4  ;;  %s6040_s5 = int_to_ptr.vmem [resolvable:$false] %s6039_s5 }
 0x2d3   : > { %v2553_v8 = vpop.permute.xlu0 %2552  ;;  %v4130_v50 = vpop.f32.mrb[144].mxu0  ;;  %v1910_v17 = vadd.f32 %v1904_v59, %v1801_v20 }
 0x2d4   : > { %v2555_v47 = vpop.permute.xlu1 %2554  ;;  %v4171_v44 = vpop.f32.mrb[144].mxu1  ;;  %4182 = vrot.lane.b32.xlu0 %v4130_v50, %s6169_s28  ;;  %v2236_v3 = vadd.f32 %v2230_v18, %v2127_v41  ;;  %v2347_v31 = vadd.f32 %v2341_v52, %v2238_v2  ;;  %v2558_v0 = vsel %vm2556_vm9, %v7298_v37, %v2553_v8 }
 0x2d5   : > { %v4132_v15 = vpop.f32.mrb[145].mxu0  ;;  %v4173_v35 = vpop.f32.mrb[145].mxu1  ;;  %v2019_v48 = vadd.f32 %v2013_v40, %v1910_v17  ;;  %v2559_v11 = vsel %vm2556_vm9, %v2553_v8, %v2555_v47  ;;  %vm3972_vm9 = vcmask 277504  }
 0x2d6   : > { %v4134_v42 = vpop.f32.mrb[146].mxu0  ;;  %4184 = vrot.lane.b32.xlu1 %v4132_v15, %s6169_s28  ;;  %v4175_v19 = vpop.f32.mrb[146].mxu1  ;;  %v2345_v51 = vadd.f32 %v2339_v38, %v2236_v3  ;;  %v2456_v21 = vadd.f32 %v2450_v16, %v2347_v31 }
 0x2d7   : > { %v4135_v58 = vpop.f32.mrb[147].mxu0  ;;  %v2658_v30 = vpop.permute.xlu0 %2657  ;;  %v2128_v61 = vadd.f32 %v2122_v12, %v2019_v48 }
 0x2d8   : > { %v4176_v5 = vpop.f32.mrb[147].mxu1  ;;  %v2660_v6 = vpop.permute.xlu1 %2659  ;;  %4186 = vrot.lane.b32.xlu0 %v4171_v44, %s6169_s28  ;;  %v2454_v46 = vadd.f32 %v2448_v29, %v2345_v51  ;;  %v2565_v22 = vadd.f32 %v2559_v11, %v2456_v21 }
 0x2d9   : > { %v2237_v27 = vadd.f32 %v2231_v13, %v2128_v61  ;;  %v2666_v23 = vsel %vm2665_vm10, %v2658_v30, %v2660_v6 }
 0x2da   : > { %4188 = vrot.lane.b32.xlu1 %v4173_v35, %s6169_s28  ;;  %v2563_v45 = vadd.f32 %v2557_v34, %v2454_v46  ;;  %s6041_s28 = scalar_lea.vmem %s6040_s5, 384 }
 0x2db   : > { %v2662_v4 = vpop.permute.xlu0 %2661  ;;  %v4239_v56 = vpop.f32.mrb[148].mxu0  ;;  %v2346_v62 = vadd.f32 %v2340_v55, %v2237_v27 }
 0x2dc   : > { %v2664_v9 = vpop.permute.xlu1 %2663  ;;  %v4280_v39 = vpop.f32.mrb[148].mxu1  ;;  %4291 = vrot.lane.b32.xlu0 %v4239_v56, %s6139_s8  ;;  %v2672_v1 = vadd.f32 %v2666_v23, %v2563_v45  ;;  %v2667_v59 = vsel %vm2665_vm10, %v2660_v6, %v2662_v4 }
 0x2dd   : > { %v2668_v54 = vsel %vm2665_vm10, %v2662_v4, %v2664_v9  ;;  %v4241_v24 = vpop.f32.mrb[149].mxu0  ;;  %v4282_v25 = vpop.f32.mrb[149].mxu1  ;;  %v2455_v43 = vadd.f32 %v2449_v28, %v2346_v62  ;;  %vm4081_vm10 = vcmask 146432  }
 0x2de   : > { %v2674_v57 = vadd.f32 %v2668_v54, %v2565_v22  ;;  %v4243_v36 = vpop.f32.mrb[150].mxu0  ;;  %4293 = vrot.lane.b32.xlu1 %v4241_v24, %s6139_s8  ;;  %v4284_v32 = vpop.f32.mrb[150].mxu1 }
 0x2df   : > { %v4244_v10 = vpop.f32.mrb[151].mxu0  ;;  %v2767_v63 = vpop.permute.xlu0 %2766  ;;  %v2564_v26 = vadd.f32 %v2558_v0, %v2455_v43 }
 0x2e0   : > { %v4285_v60 = vpop.f32.mrb[151].mxu1  ;;  %v2769_v20 = vpop.permute.xlu1 %2768  ;;  %4295 = vrot.lane.b32.xlu0 %v4280_v39, %s6139_s8 }
 0x2e1   : > { %v2775_v33 = vsel %vm2774_vm11, %v2767_v63, %v2769_v20  ;;  %v2673_v53 = vadd.f32 %v2667_v59, %v2564_v26 }
 0x2e2   : > { %v2781_v37 = vadd.f32 %v2775_v33, %v2672_v1  ;;  %4297 = vrot.lane.b32.xlu1 %v4282_v25, %s6139_s8  ;;  %s6171_s8 = smov 14  }
 0x2e3   : > { %v2771_v7 = vpop.permute.xlu0 %2770  ;;  %v4348_v8 = vpop.f32.mrb[152].mxu0 }
 0x2e4   : > { %v2776_v50 = vsel %vm2774_vm11, %v2769_v20, %v2771_v7  ;;  %v2773_v49 = vpop.permute.xlu1 %2772  ;;  %v4389_v40 = vpop.f32.mrb[152].mxu1  ;;  %4400 = vrot.lane.b32.xlu0 %v4348_v8, %s6170_s6 }
 0x2e5   : > { %v2782_v14 = vadd.f32 %v2776_v50, %v2673_v53  ;;  %v2777_v47 = vsel %vm2774_vm11, %v2771_v7, %v2773_v49  ;;  %v4350_v44 = vpop.f32.mrb[153].mxu0  ;;  %v4391_v17 = vpop.f32.mrb[153].mxu1  ;;  %vm4190_vm11 = vcmask 138240  }
 0x2e6   : > { %v2783_v18 = vadd.f32 %v2777_v47, %v2674_v57  ;;  %v4352_v52 = vpop.f32.mrb[154].mxu0  ;;  %4402 = vrot.lane.b32.xlu1 %v4350_v44, %s6170_s6  ;;  %v4393_v15 = vpop.f32.mrb[154].mxu1 }
 0x2e7   : > { %v4353_v35 = vpop.f32.mrb[155].mxu0  ;;  %v2876_v41 = vpop.permute.xlu0 %2875 }
 0x2e8   : > { %v4394_v12 = vpop.f32.mrb[155].mxu1  ;;  %v2878_v2 = vpop.permute.xlu1 %2877  ;;  %4404 = vrot.lane.b32.xlu0 %v4389_v40, %s6170_s6 }
 0x2e9   : > { %v2884_v42 = vsel %vm2883_vm12, %v2876_v41, %v2878_v2 }
 0x2ea   : > { %v2890_v19 = vadd.f32 %v2884_v42, %v2781_v37  ;;  %4406 = vrot.lane.b32.xlu1 %v4391_v17, %s6170_s6 }
 0x2eb   : > { %v2880_v48 = vpop.permute.xlu0 %2879  ;;  %v4457_v38 = vpop.f32.mrb[156].mxu0 }
 0x2ec   : > { %v2885_v16 = vsel %vm2883_vm12, %v2878_v2, %v2880_v48  ;;  %v2882_v58 = vpop.permute.xlu1 %2881  ;;  %v4498_v30 = vpop.f32.mrb[156].mxu1  ;;  %4509 = vrot.lane.b32.xlu0 %v4457_v38, %s6171_s8 }
 0x2ed   : > { %v2891_v3 = vadd.f32 %v2885_v16, %v2782_v14  ;;  %v2886_v13 = vsel %vm2883_vm12, %v2880_v48, %v2882_v58  ;;  %v4459_v31 = vpop.f32.mrb[157].mxu0  ;;  %v4500_v5 = vpop.f32.mrb[157].mxu1  ;;  %vm4299_vm12 = vcmask 130048  }
 0x2ee   : > { %v2892_v6 = vadd.f32 %v2886_v13, %v2783_v18  ;;  %v4461_v61 = vpop.f32.mrb[158].mxu0  ;;  %4511 = vrot.lane.b32.xlu1 %v4459_v31, %s6171_s8  ;;  %v4502_v29 = vpop.f32.mrb[158].mxu1 }
 0x2ef   : > { %v4462_v11 = vpop.f32.mrb[159].mxu0  ;;  %v2985_v51 = vpop.permute.xlu0 %2984 }
 0x2f0   : > { %v4503_v55 = vpop.f32.mrb[159].mxu1  ;;  %v2987_v21 = vpop.permute.xlu1 %2986  ;;  %4513 = vrot.lane.b32.xlu0 %v4498_v30, %s6171_s8 }
 0x2f1   : > { %v2993_v27 = vsel %vm2992_vm13, %v2985_v51, %v2987_v21 }
 0x2f2   : > { %v2999_v34 = vadd.f32 %v2993_v27, %v2890_v19  ;;  %4515 = vrot.lane.b32.xlu1 %v4500_v5, %s6171_s8 }
 0x2f3   : > { %v2989_v4 = vpop.permute.xlu0 %2988  ;;  %v4566_v56 = vpop.f32.mrb[160].mxu0 }
 0x2f4   : > { %v2994_v46 = vsel %vm2992_vm13, %v2987_v21, %v2989_v4  ;;  %v2991_v28 = vpop.permute.xlu1 %2990  ;;  %v4607_v22 = vpop.f32.mrb[160].mxu1  ;;  %4618 = vrot.lane.b32.xlu0 %v4566_v56, %s6172_s22 }
 0x2f5   : > { %v3000_v9 = vadd.f32 %v2994_v46, %v2891_v3  ;;  %v2995_v39 = vsel %vm2992_vm13, %v2989_v4, %v2991_v28  ;;  %v4568_v62 = vpop.f32.mrb[161].mxu0  ;;  %v4609_v23 = vpop.f32.mrb[161].mxu1  ;;  %vm4408_vm13 = vcmask 121856  }
 0x2f6   : > { %v3001_v54 = vadd.f32 %v2995_v39, %v2892_v6  ;;  %v4570_v24 = vpop.f32.mrb[162].mxu0  ;;  %4620 = vrot.lane.b32.xlu1 %v4568_v62, %s6172_s22  ;;  %v4611_v25 = vpop.f32.mrb[162].mxu1 }
 0x2f7   : > { %v4571_v45 = vpop.f32.mrb[163].mxu0  ;;  %v3094_v0 = vpop.permute.xlu0 %3093 }
 0x2f8   : > { %v4612_v57 = vpop.f32.mrb[163].mxu1  ;;  %v3096_v36 = vpop.permute.xlu1 %3095  ;;  %4622 = vrot.lane.b32.xlu0 %v4607_v22, %s6172_s22 }
 0x2f9   : > { %v3102_v32 = vsel %vm3101_vm14, %v3094_v0, %v3096_v36 }
 0x2fa   : > { %v3108_v43 = vadd.f32 %v3102_v32, %v2999_v34  ;;  %4624 = vrot.lane.b32.xlu1 %v4609_v23, %s6172_s22 }
 0x2fb   : > { %v3098_v10 = vpop.permute.xlu0 %3097  ;;  %v4675_v63 = vpop.f32.mrb[164].mxu0 }
 0x2fc   : > { %v3103_v1 = vsel %vm3101_vm14, %v3096_v36, %v3098_v10  ;;  %v3100_v59 = vpop.permute.xlu1 %3099  ;;  %v4716_v60 = vpop.f32.mrb[164].mxu1  ;;  %4727 = vrot.lane.b32.xlu0 %v4675_v63, %s6140_s27 }
 0x2fd   : > { %v3109_v20 = vadd.f32 %v3103_v1, %v3000_v9  ;;  %v3104_v26 = vsel %vm3101_vm14, %v3098_v10, %v3100_v59  ;;  %v4677_v33 = vpop.f32.mrb[165].mxu0  ;;  %v4718_v37 = vpop.f32.mrb[165].mxu1  ;;  %vm4517_vm14 = vcmask 113664  }
 0x2fe   : > { %v3110_v53 = vadd.f32 %v3104_v26, %v3001_v54  ;;  %v4679_v7 = vpop.f32.mrb[166].mxu0  ;;  %4729 = vrot.lane.b32.xlu1 %v4677_v33, %s6140_s27  ;;  %v4720_v8 = vpop.f32.mrb[166].mxu1 }
 0x2ff   : > { %v4680_v50 = vpop.f32.mrb[167].mxu0  ;;  %v3203_v49 = vpop.permute.xlu0 %3202 }
 0x300   : > { %v4721_v40 = vpop.f32.mrb[167].mxu1  ;;  %v3205_v14 = vpop.permute.xlu1 %3204  ;;  %4731 = vrot.lane.b32.xlu0 %v4716_v60, %s6140_s27 }
 0x301   : > { %v3211_v47 = vsel %vm3210_vm15, %v3203_v49, %v3205_v14 }
 0x302   : > { %v3217_v44 = vadd.f32 %v3211_v47, %v3108_v43  ;;  %4733 = vrot.lane.b32.xlu1 %v4718_v37, %s6140_s27  ;;  %s6174_s27 = smov 119  }
 0x303   : > { %v3207_v17 = vpop.permute.xlu0 %3206  ;;  %v4784_v18 = vpop.f32.mrb[168].mxu0 }
 0x304   : > { %v3212_v52 = vsel %vm3210_vm15, %v3205_v14, %v3207_v17  ;;  %v3209_v15 = vpop.permute.xlu1 %3208  ;;  %v4824_v35 = vpop.f32.mrb[168].mxu1 }
 0x305   : > { %v3218_v41 = vadd.f32 %v3212_v52, %v3109_v20  ;;  %v3213_v12 = vsel %vm3210_vm15, %v3207_v17, %v3209_v15  ;;  %v4785_v2 = vpop.f32.mrb[169].mxu0  ;;  %v4826_v42 = vpop.f32.mrb[169].mxu1  ;;  %vm4626_vm15 = vcmask 105472  }
 0x306   : > { %v3219_v19 = vadd.f32 %v3213_v12, %v3110_v53  ;;  %v4787_v48 = vpop.f32.mrb[170].mxu0  ;;  %4834 = vrot.lane.b32.xlu0 %v4785_v2, %s6112_s18  ;;  %4836 = vrot.lane.b32.xlu1 %v4824_v35, %s6112_s18  ;;  %v4828_v38 = vpop.f32.mrb[170].mxu1 }
 0x307   : > { %v4788_v16 = vpop.f32.mrb[171].mxu0  ;;  %v3312_v58 = vpop.permute.xlu0 %3311 }
 0x308   : > { %v4829_v30 = vpop.f32.mrb[171].mxu1  ;;  %v3314_v3 = vpop.permute.xlu1 %3313 }
 0x309   : > { %v3320_v13 = vsel %vm3319_vm0, %v3312_v58, %v3314_v3 }
 0x30a   : > { %v3326_v31 = vadd.f32 %v3320_v13, %v3217_v44  ;;  %4838 = vrot.lane.b32.xlu0 %v4826_v42, %s6112_s18  ;;  %s6173_s18 = smov 121  }
 0x30b   : > { %v3316_v5 = vpop.permute.xlu0 %3315  ;;  %v4887_v6 = vpop.f32.mrb[172].mxu0 }
 0x30c   : > { %v3321_v61 = vsel %vm3319_vm0, %v3314_v3, %v3316_v5  ;;  %v3318_v29 = vpop.permute.xlu1 %3317  ;;  %v4927_v11 = vpop.f32.mrb[172].mxu1 }
 0x30d   : > { %v3327_v51 = vadd.f32 %v3321_v61, %v3218_v41  ;;  %v3322_v55 = vsel %vm3319_vm0, %v3316_v5, %v3318_v29  ;;  %v4888_v21 = vpop.f32.mrb[173].mxu0  ;;  %v4929_v27 = vpop.f32.mrb[173].mxu1  ;;  %vm4735_vm0 = vcmask 97280  }
 0x30e   : > { %v3328_v34 = vadd.f32 %v3322_v55, %v3219_v19  ;;  %v4890_v4 = vpop.f32.mrb[174].mxu0  ;;  %4937 = vrot.lane.b32.xlu1 %v4888_v21, %s6146_s11  ;;  %4939 = vrot.lane.b32.xlu0 %v4927_v11, %s6146_s11  ;;  %v4931_v56 = vpop.f32.mrb[174].mxu1 }
 0x30f   : > { %v4891_v46 = vpop.f32.mrb[175].mxu0  ;;  %v3421_v28 = vpop.permute.xlu0 %3420 }
 0x310   : > { %v4932_v22 = vpop.f32.mrb[175].mxu1  ;;  %v3423_v9 = vpop.permute.xlu1 %3422 }
 0x311   : > { %v3429_v39 = vsel %vm3428_vm1, %v3421_v28, %v3423_v9 }
 0x312   : > { %v3435_v62 = vadd.f32 %v3429_v39, %v3326_v31  ;;  %4941 = vrot.lane.b32.xlu1 %v4929_v27, %s6146_s11  ;;  %s5805_s11 = smul.u32 12, %s6362_s17 }
 0x313   : > { %v3425_v23 = vpop.permute.xlu0 %3424  ;;  %v4990_v54 = vpop.f32.mrb[176].mxu0 }
 0x314   : > { %v3430_v24 = vsel %vm3428_vm1, %v3423_v9, %v3425_v23  ;;  %v3427_v25 = vpop.permute.xlu1 %3426  ;;  %v5030_v45 = vpop.f32.mrb[176].mxu1  ;;  %s211_s20 = scalar_lea.vmem [#allocation8], %s5805_s11 }
 0x315   : > { %v3436_v0 = vadd.f32 %v3430_v24, %v3327_v51  ;;  %v3431_v57 = vsel %vm3428_vm1, %v3425_v23, %v3427_v25  ;;  %v4991_v36 = vpop.f32.mrb[177].mxu0  ;;  %v5032_v32 = vpop.f32.mrb[177].mxu1  ;;  %vm5149_vm1 = vcmask 990208   ;;  %s5504_s9 = sshll.u32 %s211_s20, 4  ;;  %s7443_s9 = int_to_ptr.vmem [resolvable:$true] %s5504_s9 }
 0x316   : > { %v3437_v43 = vadd.f32 %v3431_v57, %v3328_v34  ;;  %v4993_v10 = vpop.f32.mrb[178].mxu0  ;;  %5040 = vrot.lane.b32.xlu0 %v4991_v36, %s6147_s30  ;;  %5042 = vrot.lane.b32.xlu1 %v5030_v45, %s6147_s30  ;;  %v5034_v63 = vpop.f32.mrb[178].mxu1  ;;  %p6042_p8 = scmp.lt.s32.totalorder %s7443_s9, %s6040_s5 }
 0x317   : > { %v4994_v1 = vpop.f32.mrb[179].mxu0  ;;  %v3530_v59 = vpop.permute.xlu0 %3529 }
 0x318   : > { %v5035_v60 = vpop.f32.mrb[179].mxu1  ;;  %v3532_v20 = vpop.permute.xlu1 %3531 }
 0x319   : > { %v3538_v26 = vsel %vm3537_vm2, %v3530_v59, %v3532_v20 }
 0x31a   : > { %v3544_v33 = vadd.f32 %v3538_v26, %v3435_v62  ;;  %5044 = vrot.lane.b32.xlu0 %v5032_v32, %s6147_s30  ;;  %s5806_s30 = smul.u32 192, %s6218_s16  ;;  %s6035_s16 = scalar_lea.vmem %s7443_s9, 192 }
 0x31b   : > { %v3534_v37 = vpop.permute.xlu0 %3533  ;;  %v5093_v53 = vpop.f32.mrb[180].mxu0  ;;  %p6036_p2 = scmp.ne.s32.totalorder %s7443_s9, %s6035_s16  ;;  %p6043_p12 = scmp.lt.s32.totalorder %s6041_s28, %s6035_s16 }
 0x31c   : > { %v3539_v7 = vsel %vm3537_vm2, %v3532_v20, %v3534_v37  ;;  %v3536_v8 = vpop.permute.xlu1 %3535  ;;  %v5133_v50 = vpop.f32.mrb[180].mxu1  ;;  %s7441_s10 = scalar_lea.hbm %s7488_s3, %s5806_s30 }
 0x31d   : > { %v3545_v49 = vadd.f32 %v3539_v7, %v3436_v0  ;;  %v3540_v40 = vsel %vm3537_vm2, %v3534_v37, %v3536_v8  ;;  %v5094_v14 = vpop.f32.mrb[181].mxu0  ;;  %v5135_v47 = vpop.f32.mrb[181].mxu1  ;;  %vm5253_vm2 = vcmask 982016   ;;  %p6037_p1 = pnand %p6036_p2, %p6316_p6  ;;  %p6044_p3 = por %p6043_p12, %p6042_p8 }
 0x31e   : > { %v3546_v44 = vadd.f32 %v3540_v40, %v3437_v43  ;;  %v5096_v17 = vpop.f32.mrb[182].mxu0  ;;  %5143 = vrot.lane.b32.xlu1 %v5094_v14, %s6173_s18  ;;  %5145 = vrot.lane.b32.xlu0 %v5133_v50, %s6173_s18  ;;  %v5137_v18 = vpop.f32.mrb[182].mxu1 }
 0x31f   : > { %v5097_v52 = vpop.f32.mrb[183].mxu0  ;;  %v3639_v15 = vpop.permute.xlu0 %3638  ;;  %p6038_p4 = pneg %p6037_p1 }
 0x320   : > { %v5138_v35 = vpop.f32.mrb[183].mxu1  ;;  %v3641_v41 = vpop.permute.xlu1 %3640 }
 0x321   : > { %v3647_v12 = vsel %vm3646_vm3, %v3639_v15, %v3641_v41  ;;  %p6045_p7 = pnand %p6044_p3, %p6038_p4 }
 0x322   : > { %v3653_v2 = vadd.f32 %v3647_v12, %v3544_v33  ;;  %5147 = vrot.lane.b32.xlu1 %v5135_v47, %s6173_s18 }
 0x323   : > { %v3643_v42 = vpop.permute.xlu0 %3642  ;;  %v5197_v19 = vpop.f32.mrb[184].mxu0 }
 0x324   : > { %v3648_v48 = vsel %vm3646_vm3, %v3641_v41, %v3643_v42  ;;  %v3645_v38 = vpop.permute.xlu1 %3644  ;;  %v5237_v16 = vpop.f32.mrb[184].mxu1 }
 0x325   : > { %v3654_v58 = vadd.f32 %v3648_v48, %v3545_v49  ;;  %v3649_v30 = vsel %vm3646_vm3, %v3643_v42, %v3645_v38  ;;  %v5198_v3 = vpop.f32.mrb[185].mxu0  ;;  %v5239_v13 = vpop.f32.mrb[185].mxu1  ;;  %vm5357_vm3 = vcmask 973824  }
 0x326   : > { %v3655_v31 = vadd.f32 %v3649_v30, %v3546_v44  ;;  %v5200_v5 = vpop.f32.mrb[186].mxu0  ;;  %5247 = vrot.lane.b32.xlu0 %v5198_v3, %s6114_s24  ;;  %5249 = vrot.lane.b32.xlu1 %v5237_v16, %s6114_s24  ;;  %v5241_v6 = vpop.f32.mrb[186].mxu1 }
 0x327   : > { %v5201_v61 = vpop.f32.mrb[187].mxu0  ;;  %v3747_v29 = vpop.permute.xlu0 %3746 }
 0x328   : > { %v5242_v11 = vpop.f32.mrb[187].mxu1  ;;  %v3749_v51 = vpop.permute.xlu1 %3748 }
 0x329   : > { %v3755_v55 = vsel %vm3754_vm4, %v3747_v29, %v3749_v51 }
 0x32a   : > { %v3761_v21 = vadd.f32 %v3755_v55, %v3653_v2  ;;  %5251 = vrot.lane.b32.xlu0 %v5239_v13, %s6114_s24  ;;  %s6175_s24 = smov 118  }
 0x32b   : > { %v3751_v27 = vpop.permute.xlu0 %3750  ;;  %v5301_v34 = vpop.f32.mrb[188].mxu0 }
 0x32c   : > { %v3756_v4 = vsel %vm3754_vm4, %v3749_v51, %v3751_v27  ;;  %v3753_v56 = vpop.permute.xlu1 %3752  ;;  %v5341_v46 = vpop.f32.mrb[188].mxu1 }
 0x32d   : > { %v3762_v28 = vadd.f32 %v3756_v4, %v3654_v58  ;;  %v3757_v22 = vsel %vm3754_vm4, %v3751_v27, %v3753_v56  ;;  %v5302_v9 = vpop.f32.mrb[189].mxu0  ;;  %5353 = vrot.lane.b32.xlu1 %v5341_v46, %s6174_s27  ;;  %v5343_v39 = vpop.f32.mrb[189].mxu1 }
 0x32e   : > { %v3763_v62 = vadd.f32 %v3757_v22, %v3655_v31  ;;  %v5304_v23 = vpop.f32.mrb[190].mxu0  ;;  %5351 = vrot.lane.b32.xlu0 %v5302_v9, %s6174_s27  ;;  %v5345_v54 = vpop.f32.mrb[190].mxu1 }
 0x32f   : > { %v5305_v24 = vpop.f32.mrb[191].mxu0  ;;  %v3856_v25 = vpop.permute.xlu0 %3855 }
 0x330   : > { %v5346_v45 = vpop.f32.mrb[191].mxu1  ;;  %v3858_v0 = vpop.permute.xlu1 %3857 }
 0x331   : > { %v3864_v57 = vsel %vm3863_vm8, %v3856_v25, %v3858_v0 }
 0x332   : > { %v3870_v36 = vadd.f32 %v3864_v57, %v3761_v21  ;;  %5355 = vrot.lane.b32.xlu0 %v5343_v39, %s6174_s27 }
 0x333   : > { %v3860_v32 = vpop.permute.xlu0 %3859  ;;  %v5405_v43 = vpop.f32.mrb[192].mxu0 }
 0x334   : > { %v3865_v10 = vsel %vm3863_vm8, %v3858_v0, %v3860_v32  ;;  %v3862_v63 = vpop.permute.xlu1 %3861  ;;  %v5445_v1 = vpop.f32.mrb[192].mxu1 }
 0x335   : > { %v3871_v59 = vadd.f32 %v3865_v10, %v3762_v28  ;;  %v3866_v60 = vsel %vm3863_vm8, %v3860_v32, %v3862_v63  ;;  %v5406_v20 = vpop.f32.mrb[193].mxu0  ;;  %v5447_v26 = vpop.f32.mrb[193].mxu1 }
 0x336   : > { %v3872_v33 = vadd.f32 %v3866_v60, %v3763_v62  ;;  %v5408_v37 = vpop.f32.mrb[194].mxu0  ;;  %5455 = vrot.lane.b32.xlu1 %v5406_v20, %s6175_s24  ;;  %5457 = vrot.lane.b32.xlu0 %v5445_v1, %s6175_s24  ;;  %v5449_v53 = vpop.f32.mrb[194].mxu1 }
 0x337   : > { %v5409_v7 = vpop.f32.mrb[195].mxu0  ;;  %v3965_v8 = vpop.permute.xlu0 %3964 }
 0x338   : > { %v5450_v50 = vpop.f32.mrb[195].mxu1  ;;  %v3967_v49 = vpop.permute.xlu1 %3966 }
 0x339   : > { %v3973_v40 = vsel %vm3972_vm9, %v3965_v8, %v3967_v49 }
 0x33a   : > { %v3979_v14 = vadd.f32 %v3973_v40, %v3870_v36  ;;  %5459 = vrot.lane.b32.xlu1 %v5447_v26, %s6175_s24 }
 0x33b   : > { %v3969_v47 = vpop.permute.xlu0 %3968 }
 0x33c   : > { %v3974_v44 = vsel %vm3972_vm9, %v3967_v49, %v3969_v47  ;;  %v3971_v17 = vpop.permute.xlu1 %3970 }
 0x33d   : > { %v3980_v18 = vadd.f32 %v3974_v44, %v3871_v59  ;;  %v3975_v52 = vsel %vm3972_vm9, %v3969_v47, %v3971_v17 }
 0x33e   : > { %v3981_v15 = vadd.f32 %v3975_v52, %v3872_v33 }
 0x33f   : > { %v4074_v35 = vpop.permute.xlu0 %4073 }
 0x340   : > { %v4076_v41 = vpop.permute.xlu1 %4075 }
 0x341   : > { %v4082_v12 = vsel %vm4081_vm10, %v4074_v35, %v4076_v41 }
 0x342   : > { %v4088_v2 = vadd.f32 %v4082_v12, %v3979_v14 }
 0x343   : > { %v4078_v42 = vpop.permute.xlu0 %4077 }
 0x344   : > { %v4083_v19 = vsel %vm4081_vm10, %v4076_v41, %v4078_v42  ;;  %v4080_v48 = vpop.permute.xlu1 %4079 }
 0x345   : > { %v4089_v38 = vadd.f32 %v4083_v19, %v3980_v18  ;;  %v4084_v16 = vsel %vm4081_vm10, %v4078_v42, %v4080_v48 }
 0x346   : > { %v4090_v58 = vadd.f32 %v4084_v16, %v3981_v15 }
 0x347   : > { %v4183_v30 = vpop.permute.xlu0 %4182 }
 0x348   : > { %v4185_v3 = vpop.permute.xlu1 %4184 }
 0x349   : > { %v4191_v13 = vsel %vm4190_vm11, %v4183_v30, %v4185_v3 }
 0x34a   : > { %v4197_v31 = vadd.f32 %v4191_v13, %v4088_v2 }
 0x34b   : > { %v4187_v5 = vpop.permute.xlu0 %4186 }
 0x34c   : > { %v4189_v6 = vpop.permute.xlu1 %4188  ;;  %v4192_v26 = vsel %vm4190_vm11, %v4185_v3, %v4187_v5 }
 0x34d   : > { %v4193_v60 = vsel %vm4190_vm11, %v4187_v5, %v4189_v6  ;;  %v4198_v40 = vadd.f32 %v4192_v26, %v4089_v38 }
 0x34e   : > { %v4199_v8 = vadd.f32 %v4193_v60, %v4090_v58 }
 0x34f   : > { %v4292_v61 = vpop.permute.xlu0 %4291 }
 0x350   : > { %v4294_v29 = vpop.permute.xlu1 %4293 }
 0x351   : > { %v4300_v59 = vsel %vm4299_vm12, %v4292_v61, %v4294_v29 }
 0x352   : > { %v4306_v37 = vadd.f32 %v4300_v59, %v4197_v31 }
 0x353   : > { %v4296_v11 = vpop.permute.xlu0 %4295 }
 0x354   : > { %v4298_v51 = vpop.permute.xlu1 %4297  ;;  %v4301_v50 = vsel %vm4299_vm12, %v4294_v29, %v4296_v11 }
 0x355   : > { %v4302_v53 = vsel %vm4299_vm12, %v4296_v11, %v4298_v51  ;;  %v4307_v52 = vadd.f32 %v4301_v50, %v4198_v40 }
 0x356   : > { %v4308_v44 = vadd.f32 %v4302_v53, %v4199_v8 }
 0x357   : > { %v4401_v55 = vpop.permute.xlu0 %4400 }
 0x358   : > { %v4403_v21 = vpop.permute.xlu1 %4402 }
 0x359   : > { %v4409_v33 = vsel %vm4408_vm13, %v4401_v55, %v4403_v21 }
 0x35a   : > { %v4415_v14 = vadd.f32 %v4409_v33, %v4306_v37 }
 0x35b   : > { %v4405_v27 = vpop.permute.xlu0 %4404 }
 0x35c   : > { %v4407_v34 = vpop.permute.xlu1 %4406  ;;  %v4410_v17 = vsel %vm4408_vm13, %v4403_v21, %v4405_v27 }
 0x35d   : > { %v4411_v47 = vsel %vm4408_vm13, %v4405_v27, %v4407_v34  ;;  %v4416_v48 = vadd.f32 %v4410_v17, %v4307_v52 }
 0x35e   : > { %v4417_v2 = vadd.f32 %v4411_v47, %v4308_v44  ;;  %v7544_v47 = vld [vmem:[#allocation12_spill] sm:$0xff] }
 0x35f   : > { %v4510_v4 = vpop.permute.xlu0 %4509 }
 0x360   : > { %v4512_v56 = vpop.permute.xlu1 %4511 }
 0x361   : > { %v4518_v49 = vsel %vm4517_vm14, %v4510_v4, %v4512_v56 }
 0x362   : > { %v4524_v15 = vadd.f32 %v4518_v49, %v4415_v14 }
 0x363   : > { %v4514_v46 = vpop.permute.xlu0 %4513 }
 0x364   : > { %v4516_v28 = vpop.permute.xlu1 %4515  ;;  %v4519_v42 = vsel %vm4517_vm14, %v4512_v56, %v4514_v46 }
 0x365   : > { %v4520_v35 = vsel %vm4517_vm14, %v4514_v46, %v4516_v28  ;;  %v4525_v13 = vadd.f32 %v4519_v42, %v4416_v48 }
 0x366   : > { %v4526_v58 = vadd.f32 %v4520_v35, %v4417_v2 }
 0x367   : > { %v4619_v22 = vpop.permute.xlu0 %4618 }
 0x368   : > { %v4621_v9 = vpop.permute.xlu1 %4620 }
 0x369   : > { %v4627_v18 = vsel %vm4626_vm15, %v4619_v22, %v4621_v9 }
 0x36a   : > { %v4633_v38 = vadd.f32 %v4627_v18, %v4524_v15 }
 0x36b   : > { %v4623_v39 = vpop.permute.xlu0 %4622 }
 0x36c   : > { %v4625_v62 = vpop.permute.xlu1 %4624  ;;  %v4628_v30 = vsel %vm4626_vm15, %v4621_v9, %v4623_v39 }
 0x36d   : > { %v4629_v16 = vsel %vm4626_vm15, %v4623_v39, %v4625_v62  ;;  %v4634_v51 = vadd.f32 %v4628_v30, %v4525_v13 }
 0x36e   : > { %v4635_v61 = vadd.f32 %v4629_v16, %v4526_v58 }
 0x36f   : > { %v4728_v23 = vpop.permute.xlu0 %4727 }
 0x370   : > { %v4730_v54 = vpop.permute.xlu1 %4729 }
 0x371   : > { %v4736_v19 = vsel %vm4735_vm0, %v4728_v23, %v4730_v54 }
 0x372   : > { %v4742_v31 = vadd.f32 %v4736_v19, %v4633_v38 }
 0x373   : > { %v4732_v24 = vpop.permute.xlu0 %4731 }
 0x374   : > { %v4734_v25 = vpop.permute.xlu1 %4733  ;;  %v4737_v29 = vsel %vm4735_vm0, %v4730_v54, %v4732_v24 }
 0x375   : > { %v4738_v5 = vsel %vm4735_vm0, %v4732_v24, %v4734_v25  ;;  %v4743_v56 = vadd.f32 %v4737_v29, %v4634_v51 }
 0x376   : > { %v4744_v27 = vadd.f32 %v4738_v5, %v4635_v61 }
 0x378   : > { %v4835_v45 = vpop.permute.xlu0 %4834  ;;  %v4837_v0 = vpop.permute.xlu1 %4836 }
 0x379   : > { %v4840_v3 = vsel %vm749_vm5, %v4835_v45, %v4837_v0 }
 0x37a   : > { %v4845_v55 = vadd.f32 %v4840_v3, %v4742_v31 }
 0x37c   : > { %v4839_v57 = vpop.permute.xlu0 %4838 }
 0x37d   : > { %v4841_v34 = vsel %vm749_vm5, %v4837_v0, %v4839_v57  ;;  %v4847_v22 = vadd.f32 %v4839_v57, %v4744_v27  ;;  %vm5461_vm5 = vcmask 965632  }
 0x37e   : > { %v4846_v62 = vadd.f32 %v4841_v34, %v4743_v56 }
 0x380   : > { %v4938_v36 = vpop.permute.xlu1 %4937  ;;  %v4940_v32 = vpop.permute.xlu0 %4939 }
 0x381   : > { %v4943_v11 = vsel %vm853_vm6, %v4938_v36, %v4940_v32 }
 0x382   : > { %v4948_v46 = vadd.f32 %v4943_v11, %v4845_v55 }
 0x384   : > { %v7393_v43 = vpop.permute.xlu1 %4941 }
 0x385   : > { %v4944_v9 = vsel %vm853_vm6, %v4940_v32, %v7393_v43  ;;  %v4950_v24 = vadd.f32 %v7393_v43, %v4847_v22  ;;  %vm5487_vm6 = vcmask 731136  }
 0x386   : > { %v4949_v0 = vadd.f32 %v4944_v9, %v4846_v62 }
 0x388   : > { %v5041_v10 = vpop.permute.xlu0 %5040  ;;  %v7395_v63 = vpop.permute.xlu1 %5042 }
 0x389   : > { %v5046_v4 = vsel %vm957_vm7, %v5041_v10, %v7395_v63 }
 0x38a   : > { %v5051_v23 = vadd.f32 %v5046_v4, %v4948_v46 }
 0x38c   : > { %v7397_v1 = vpop.permute.xlu0 %5044 }
 0x38d   : > { %v5047_v25 = vsel %vm957_vm7, %v7395_v63, %v7397_v1  ;;  %v5053_v10 = vadd.f32 %v7397_v1, %v4950_v24 }
 0x38e   : > { %v5052_v60 = vadd.f32 %v5047_v25, %v4949_v0 }
 0x390   : > { %v5144_v20 = vpop.permute.xlu1 %5143  ;;  %v5146_v7 = vpop.permute.xlu0 %5145 }
 0x391   : > { %v5150_v39 = vsel %vm5149_vm1, %v5144_v20, %v5146_v7 }
 0x392   : > { %v5155_v36 = vadd.f32 %v5150_v39, %v5051_v23 }
 0x394   : > { %v5148_v41 = vpop.permute.xlu1 %5147 }
 0x395   : > { %v5151_v32 = vsel %vm5149_vm1, %v5146_v7, %v5148_v41  ;;  %v5157_v26 = vadd.f32 %v5148_v41, %v5053_v10 }
 0x396   : > { %v5156_v33 = vadd.f32 %v5151_v32, %v5052_v60 }
 0x398   : > { %v5248_v12 = vpop.permute.xlu0 %5247  ;;  %v5250_v21 = vpop.permute.xlu1 %5249 }
 0x399   : > { %v5254_v45 = vsel %vm5253_vm2, %v5248_v12, %v5250_v21 }
 0x39a   : > { %v5259_v20 = vadd.f32 %v5254_v45, %v5155_v36 }
 0x39c   : > { %v5252_v6 = vpop.permute.xlu0 %5251 }
 0x39d   : > { %v5255_v43 = vsel %vm5253_vm2, %v5250_v21, %v5252_v6  ;;  %v5261_v8 = vadd.f32 %v5252_v6, %v5157_v26 }
 0x39e   : > { %v5260_v49 = vadd.f32 %v5255_v43, %v5156_v33 }
 0x39f   : > { %v5354_v54 = vpop.permute.xlu1 %5353 }
 0x3a0   : > { %v5352_v28 = vpop.permute.xlu0 %5351 }
 0x3a1   : > { %v5358_v59 = vsel %vm5357_vm3, %v5352_v28, %v5354_v54 }
 0x3a2   : > { %v5363_v37 = vadd.f32 %v5358_v59, %v5259_v20 }
 0x3a4   : > { %v5356_v57 = vpop.permute.xlu0 %5355 }
 0x3a5   : > { %v5359_v50 = vsel %vm5357_vm3, %v5354_v54, %v5356_v57  ;;  %v5365_v40 = vadd.f32 %v5356_v57, %v5261_v8 }
 0x3a6   : > { %v5364_v14 = vadd.f32 %v5359_v50, %v5260_v49 }
 0x3a8   : > { %v5456_v63 = vpop.permute.xlu1 %5455  ;;  %v5458_v53 = vpop.permute.xlu0 %5457 }
 0x3a9   : > { %v5462_v1 = vsel %vm5461_vm5, %v5456_v63, %v5458_v53 }
 0x3aa   : > { %v5467_v7 = vadd.f32 %v5462_v1, %v5363_v37 }
 0x3ac   : > { %v5476_v44 = vadd.f32 %v7544_v47, %v5467_v7  ;;  %v5460_v17 = vpop.permute.xlu1 %5459 }
 0x3ad   : > { %v5463_v18 = vsel %vm5461_vm5, %v5458_v53, %v5460_v17  ;;  %v5469_v52 = vadd.f32 %v5460_v17, %v5365_v40 }
 0x3ae   : > { %v5468_v15 = vadd.f32 %v5463_v18, %v5364_v14  ;;  %5943 = vtanh.f32 %v5476_v44 }
 0x3af   : > { %v5478_v35 = vadd.f32 %v7544_v47, %v5469_v52 }
 0x3b0   : > { %v5477_v41 = vadd.f32 %v7544_v47, %v5468_v15 }
 0x3b1   : > { %5945 = vtanh.f32 %v5478_v35 }
 0x3b2   : > { %5947 = vtanh.f32 %v5477_v41 }
 0x3b8   : > { %v5944_v12 = vpop.eup %5943 }
 0x3bb   : > { %v5946_v2 = vpop.eup %5945 }
 0x3bc   : > { %v5948_v42 = vpop.eup %5947  ;;  %5488 = vst.msk [vmem:[%s211_s20 + $0x8] sm:$0x7] %vm5487_vm6, %v5946_v2 }
 0x3bd   : > { %v5484_v19 = vcombine.low %v5944_v12, %v5948_v42 }
 0x3bf   : > { %5486 = vst [vmem:[%s211_s20] sm:$0x77] %v5484_v19 }
 0x3c0   : > { %6048 = shalt.err (!%p6045_p7)
}
 0x3c1   : > { %s6049_s17 = scalar_lea.hbm %s7441_s10, 192  ;;  %s6053_s22 = scalar_lea.hbm %s7488_s3, 384 }
 0x3c2   : > { %p6050_p10 = scmp.ne.s32.totalorder %s7441_s10, %s6049_s17  ;;  %p6054_p0 = scmp.lt.u32.totalorder %s7441_s10, %s7488_s3 }
 0x3c3   : > { %p6055_p9 = scmp.lt.u32.totalorder %s6053_s22, %s6049_s17  ;;  %p6057_p2 = scmp.lt.u32.totalorder %s6049_s17, %s7441_s10 }
 0x3c4   : > { %p6051_p13 = pnand %p6050_p10, %p6316_p6 }
 0x3c5   : > { %p6056_p11 = por %p6055_p9, %p6054_p0 }
 0x3c6   : > { %p6052_p5 = pneg %p6051_p13 }
 0x3c7   : > { %p6058_p1 = por %p6057_p2, %p6056_p11 }
 0x3c9   : > { %p6059_p4 = pnand %p6058_p1, %p6052_p5 }
 0x3cb   : > { %6062 = shalt.err (!%p6059_p4)
}
 0x3cc   : > { %5817 = dma.vmem_to_hbm [thread:$0]  (%p6316_p6), %s7443_s9, 192, %s7441_s10, %s5490_s23  }
 0x3cd PF: > { %s5516_s24 = sand.u32 1, %s6093_s12   ;;  %p7545_p8 = scmp.ne.s32.totalorder %s7513_s19, 0 }
 0x3ce   : > { %p7546_p12 = scmp.ge.s32.totalorder %s6105_s15, 2  ;;  %s5517_s11 = scalar_lea.sflag [#allocation4], %s5516_s24 }
 0x3d0   : > { %p5831_p3 = pnand %p7546_p12, %p7545_p8 }
 0x3d2   : > { %6088 = dma.done.wait (!%p5831_p3), %s5517_s11, 192  }
 0x3d3   : > { %6090 = vsyncadd (!%p5831_p3), %s5517_s11, 4294967104  ;;  %p17_p7 = scmp.ge.s32.totalorder %s6253_s26, 4   ;;  %s7547_s12 = smov %s6097_s13 }
 0x3d4   : > { %s7548_s13 = smov %s6101_s14  ;;  %s7549_s14 = smov %s6312_s25 }
 0x3d5   : > { %s7550_s15 = smov %s6253_s26  ;;  %19 = sbr.rel (!%p17_p7) target bundleno = 6 (0x6), region = 85 }
 0x3dc   :  { %5522 = vsyncpa [#allocation3], 1 }
 0x3dd   :  { %5524 = vsyncpa [#allocation3 + $0x1], 1 }
 0x3de   :  { %5525 = vsyncpa [#allocation6], 1 }
 0x3df   :  { %5526 = vsyncpa [#allocation4], 1 }
 0x3e0   :  { %5528 = vsyncpa [#allocation4 + $0x1], 1 }

</bundles_post_ra>
